<compile_context>
chip_gen: v7x
topology: tpu7x:2x2x1
jax: 0.10.0
libtpu: 0.0.40
codegen_flags: <defaults>
</compile_context>

<pallas_src>
import functools
import math

import jax
import jax.numpy as jnp
from jax.experimental import pallas as pl
from jax.experimental.pallas import tpu as pltpu

HIDDEN = 1024
LANE = 128
NEG_SLOPE = 0.01  # nn.LeakyReLU default


def _leaky_relu(x):
    # 2 VPU ops (mul + max) instead of cmp + mul + select.
    return jnp.maximum(x, NEG_SLOPE * x)


def _round_up(a, b):
    return ((a + b - 1) // b) * b


# ----------------------------------------------------------------------------
# Kernel: fused 4-layer MLP on one (TM, 3) row tile.
# ----------------------------------------------------------------------------
def mlp_kernel(x_ref,
               w1_ref, b1_ref,
               w2_ref, b2_ref,
               w3_ref, b3_ref,
               w4_ref, b4_ref,
               o_ref):
    x = x_ref[...]                                   # (TM, 3) f32

    # ---- Linear(3 -> 1024) on the MXU.  Pad K from 3 -> 8 in-kernel (keeps
    #      the input DMA at 12 B/row); w1 is pre-padded with zero rows so the
    #      result is exact.  Dropout = identity (eval mode).
    x8 = jnp.concatenate(
        [x, jnp.zeros((x.shape[0], 5), dtype=x.dtype)], axis=-1)   # (TM, 8)
    h = jnp.dot(x8, w1_ref[...],
                preferred_element_type=jnp.float32) + b1_ref[...]
    h = _leaky_relu(h)

    # Compute dtype fed to the MXU / elementwise path for the wide layers
    # (bf16 on the fast path, f32 when use_bf16=False). Accumulation is f32.
    cdt = w2_ref.dtype
    h = h.astype(cdt)

    # ---- Linear(1024 -> 1024) + LeakyReLU  (bias + activation in bf16,
    #      downcast fused straight off the f32 accumulator).
    t = jnp.dot(h, w2_ref[...], preferred_element_type=jnp.float32).astype(cdt)
    h = _leaky_relu(t + b2_ref[...])

    # ---- Linear(1024 -> 1024) + LeakyReLU
    t = jnp.dot(h, w3_ref[...], preferred_element_type=jnp.float32).astype(cdt)
    h = _leaky_relu(t + b3_ref[...])

    # ---- Linear(1024 -> out_pad) + Tanh (f32 epilogue, f32 store)
    out = jnp.dot(h, w4_ref[...],
                  preferred_element_type=jnp.float32) + b4_ref[...]
    o_ref[...] = jnp.tanh(out).astype(o_ref.dtype)


# ----------------------------------------------------------------------------
# One-time parameter preparation (model-load time, NOT per call).
# ----------------------------------------------------------------------------
def prepare_params(params, use_bf16=True):
    """Cast / pad raw params into kernel-ready form.  Run ONCE at load time.

    Returns (prepared_tuple, out_feature).
    """
    w1, b1, w2, b2, w3, b3, w4, b4 = params
    out_feature = w4.shape[1]
    n_pad = _round_up(out_feature, LANE)
    wdt = jnp.bfloat16 if use_bf16 else jnp.float32

    # Layer 1 stays f32 (tiny, accuracy-sensitive); pad K 3 -> 8 with zeros.
    w1p = jnp.pad(w1.astype(jnp.float32), ((0, 8 - w1.shape[0]), (0, 0)))
    b1p = b1.astype(jnp.float32).reshape(1, HIDDEN)

    # Wide layers: bf16 weights AND bf16 biases (bias-add runs in bf16).
    w2p = w2.astype(wdt)
    b2p = b2.astype(wdt).reshape(1, HIDDEN)
    w3p = w3.astype(wdt)
    b3p = b3.astype(wdt).reshape(1, HIDDEN)

    # Final layer: bf16 weight padded to lane-dense n_pad; f32 bias (f32 epilogue).
    w4p = jnp.pad(w4.astype(wdt), ((0, 0), (0, n_pad - out_feature)))
    b4p = jnp.pad(b4.astype(jnp.float32).reshape(1, -1),
                  ((0, 0), (0, n_pad - out_feature)))

    prepared = tuple(jax.device_put(a)
                     for a in (w1p, b1p, w2p, b2p, w3p, b3p, w4p, b4p))
    return prepared, out_feature


# ----------------------------------------------------------------------------
# Forward wrapper.
# ----------------------------------------------------------------------------
@functools.partial(jax.jit, static_argnames=("out_feature", "tile_m"))
def simple_encoder_forward(x, prepared, out_feature, tile_m=512):
    """x: (..., 3) float32 -> (..., out_feature) float32 (eval-mode forward).

    `prepared` must come from prepare_params() (done once at model-load time).
    """
    w1p, b1p, w2p, b2p, w3p, b3p, w4p, b4p = prepared
    n_pad = w4p.shape[1]

    lead_shape = x.shape[:-1]
    m = math.prod(lead_shape) if lead_shape else 1
    x2 = x.reshape(m, 3).astype(jnp.float32)

    # ---- Row tile / grid: a grid split duplicates the ~4.3 MiB weight DMA and
    #      adds ~0.35 us per step, so only split when each step gets >= tile_m
    #      rows (i.e. M >= ~2*tile_m).  Otherwise: one grid step, tm = M.
    m8 = _round_up(m, 8)
    tm_req = min(_round_up(tile_m, 8), 1024)
    tm = m8 if m8 < 2 * tm_req else tm_req

    m_pad = _round_up(m, tm)
    if m_pad != m:
        x2 = jnp.pad(x2, ((0, m_pad - m), (0, 0)))

    grid = (m_pad // tm,)

    # Weights / biases are grid-invariant: full-extent blocks, single-buffered
    # so they sit in VMEM once for the whole grid (no useless second buffer).
    def const_spec(shape):
        return pl.BlockSpec(shape, lambda i: (0, 0),
                            pipeline_mode=pl.Buffered(1))

    out = pl.pallas_call(
        mlp_kernel,
        out_shape=jax.ShapeDtypeStruct((m_pad, n_pad), jnp.float32),
        grid=grid,
        in_specs=[
            pl.BlockSpec((tm, 3), lambda i: (i, 0)),                   # x rows
            const_spec((8, HIDDEN)),      const_spec((1, HIDDEN)),     # layer 1
            const_spec((HIDDEN, HIDDEN)), const_spec((1, HIDDEN)),     # layer 2
            const_spec((HIDDEN, HIDDEN)), const_spec((1, HIDDEN)),     # layer 3
            const_spec((HIDDEN, n_pad)),  const_spec((1, n_pad)),      # layer 4
        ],
        out_specs=pl.BlockSpec((tm, n_pad), lambda i: (i, 0)),
        compiler_params=pltpu.CompilerParams(
            dimension_semantics=("parallel",),
            vmem_limit_bytes=48 << 20,    # footprint ~10-15 MiB; safe on v7x
        ),
    )(x2, w1p, b1p, w2p, b2p, w3p, b3p, w4p, b4p)

    # Slice padded rows / lanes off immediately (padded rows hold garbage).
    return out[:m, :out_feature].reshape(*lead_shape, out_feature)


# ----------------------------------------------------------------------------
# Param init (matches nn.Linear default) and pure-JAX reference.
# ----------------------------------------------------------------------------
def init_params(key, out_feature):
    dims = [(3, HIDDEN), (HIDDEN, HIDDEN), (HIDDEN, HIDDEN), (HIDDEN, out_feature)]
    params = []
    keys = jax.random.split(key, 2 * len(dims))
    for idx, (fan_in, fan_out) in enumerate(dims):
        bound = 1.0 / jnp.sqrt(jnp.float32(fan_in))
        w = jax.random.uniform(keys[2 * idx], (fan_in, fan_out),
                               minval=-bound, maxval=bound, dtype=jnp.float32)
        b = jax.random.uniform(keys[2 * idx + 1], (1, fan_out),
                               minval=-bound, maxval=bound, dtype=jnp.float32)
        params += [w, b]
    return tuple(params)


def reference_forward(x, params):
    """Pure-JAX f32 reference (eval-mode dropout = identity)."""
    w1, b1, w2, b2, w3, b3, w4, b4 = params
    h = jnp.maximum(x @ w1 + b1[0], NEG_SLOPE * (x @ w1 + b1[0]))
    h = jnp.maximum(h @ w2 + b2[0], NEG_SLOPE * (h @ w2 + b2[0]))
    h = jnp.maximum(h @ w3 + b3[0], NEG_SLOPE * (h @ w3 + b3[0]))
    return jnp.tanh(h @ w4 + b4[0])


if __name__ == "__main__":
    key = jax.random.PRNGKey(0)
    k_param, k_x = jax.random.split(key)

    num_joint = 8
    out_feature = 64
    batch = 2

    params = init_params(k_param, out_feature)
    x = jax.random.normal(k_x, (batch, num_joint, 3), dtype=jnp.float32)

    y_ref = reference_forward(x, params)

    # Fast path: bf16 weights + bf16 activations on the MXU, f32 accumulation.
    prep_bf16, of = prepare_params(params, use_bf16=True)
    y = jax.block_until_ready(simple_encoder_forward(x, prep_bf16, of))
    assert y.shape == (batch, num_joint, out_feature), y.shape
    assert jnp.allclose(y, y_ref, atol=3e-2), float(jnp.max(jnp.abs(y - y_ref)))

    # Full-f32 path: tighter numerical check.
    prep_f32, of32 = prepare_params(params, use_bf16=False)
    y32 = jax.block_until_ready(simple_encoder_forward(x, prep_f32, of32))
    assert jnp.allclose(y32, y_ref, atol=1e-2), float(jnp.max(jnp.abs(y32 - y_ref)))

    print("KERNEL_OK")
</pallas_src>

<mosaic_0001>
module attributes {stable_mosaic.version = 11 : i64} {
  func.func @mlp_kernel(%arg0: i32, %arg1: memref<16x3xf32, #tpu.memory_space<vmem>>, %arg2: memref<8x1024xf32, #tpu.memory_space<vmem>>, %arg3: memref<1x1024xf32, #tpu.memory_space<vmem>>, %arg4: memref<1024x1024xbf16, #tpu.memory_space<vmem>>, %arg5: memref<1x1024xbf16, #tpu.memory_space<vmem>>, %arg6: memref<1024x1024xbf16, #tpu.memory_space<vmem>>, %arg7: memref<1x1024xbf16, #tpu.memory_space<vmem>>, %arg8: memref<1024x128xbf16, #tpu.memory_space<vmem>>, %arg9: memref<1x128xf32, #tpu.memory_space<vmem>>, %arg10: memref<16x128xf32, #tpu.memory_space<vmem>>) attributes {dimension_semantics = [#tpu.dimension_semantics<parallel>], iteration_bounds = array<i64: 1>, scalar_prefetch = 0 : i64, scratch_operands = 0 : i64, tpu.core_type = #tpu.core_type<tc>, window_params = [{transform_indices = @transform_0, window_bounds = array<i64: 16, 3>}, {pipeline_mode = #tpu.pipeline_mode<synchronous>, transform_indices = @transform_1, window_bounds = array<i64: 8, 1024>}, {pipeline_mode = #tpu.pipeline_mode<synchronous>, transform_indices = @transform_2, window_bounds = array<i64: 1, 1024>}, {pipeline_mode = #tpu.pipeline_mode<synchronous>, transform_indices = @transform_3, window_bounds = array<i64: 1024, 1024>}, {pipeline_mode = #tpu.pipeline_mode<synchronous>, transform_indices = @transform_4, window_bounds = array<i64: 1, 1024>}, {pipeline_mode = #tpu.pipeline_mode<synchronous>, transform_indices = @transform_5, window_bounds = array<i64: 1024, 1024>}, {pipeline_mode = #tpu.pipeline_mode<synchronous>, transform_indices = @transform_6, window_bounds = array<i64: 1, 1024>}, {pipeline_mode = #tpu.pipeline_mode<synchronous>, transform_indices = @transform_7, window_bounds = array<i64: 1024, 128>}, {pipeline_mode = #tpu.pipeline_mode<synchronous>, transform_indices = @transform_8, window_bounds = array<i64: 1, 128>}, {transform_indices = @transform_9, window_bounds = array<i64: 16, 128>}]} {
    %c0 = arith.constant 0 : index
    %c0_0 = arith.constant 0 : index
    %0 = vector.load %arg1[%c0, %c0_0] : memref<16x3xf32, #tpu.memory_space<vmem>>, vector<16x3xf32>
    %cst = arith.constant 0.000000e+00 : f32
    %1 = vector.broadcast %cst : f32 to vector<16x5xf32>
    %2 = tpu.concatenate %0, %1 in 1 : vector<16x3xf32>, vector<16x5xf32> -> vector<16x8xf32>
    %c0_1 = arith.constant 0 : index
    %c0_2 = arith.constant 0 : index
    %3 = vector.load %arg2[%c0_1, %c0_2] : memref<8x1024xf32, #tpu.memory_space<vmem>>, vector<8x1024xf32>
    %cst_3 = arith.constant dense<0.000000e+00> : vector<16x1024xf32>
    %4 = tpu.matmul %2, %3, %cst_3 {dimension_numbers = #tpu.dot_dimension_numbers<[1], [0], [0], [1], [0, 0, 1, 1], [], []>} : vector<16x8xf32>, vector<8x1024xf32>, vector<16x1024xf32> -> vector<16x1024xf32>
    %c0_4 = arith.constant 0 : index
    %c0_5 = arith.constant 0 : index
    %5 = vector.load %arg3[%c0_4, %c0_5] : memref<1x1024xf32, #tpu.memory_space<vmem>>, vector<1x1024xf32>
    %6 = vector.broadcast %5 : vector<1x1024xf32> to vector<16x1024xf32>
    %7 = arith.addf %4, %6 : vector<16x1024xf32>
    %cst_6 = arith.constant 0.00999999977 : f32
    %8 = vector.broadcast %cst_6 : f32 to vector<16x1024xf32>
    %9 = arith.mulf %8, %7 : vector<16x1024xf32>
    %10 = arith.maximumf %7, %9 : vector<16x1024xf32>
    %11 = arith.truncf %10 : vector<16x1024xf32> to vector<16x1024xbf16>
    %c0_7 = arith.constant 0 : index
    %c0_8 = arith.constant 0 : index
    %12 = vector.load %arg4[%c0_7, %c0_8] : memref<1024x1024xbf16, #tpu.memory_space<vmem>>, vector<1024x1024xbf16>
    %cst_9 = arith.constant dense<0.000000e+00> : vector<16x1024xf32>
    %13 = tpu.matmul %11, %12, %cst_9 {dimension_numbers = #tpu.dot_dimension_numbers<[1], [0], [0], [1], [0, 0, 1, 1], [], []>} : vector<16x1024xbf16>, vector<1024x1024xbf16>, vector<16x1024xf32> -> vector<16x1024xf32>
    %14 = arith.truncf %13 : vector<16x1024xf32> to vector<16x1024xbf16>
    %c0_10 = arith.constant 0 : index
    %c0_11 = arith.constant 0 : index
    %15 = vector.load %arg5[%c0_10, %c0_11] : memref<1x1024xbf16, #tpu.memory_space<vmem>>, vector<1x1024xbf16>
    %16 = vector.broadcast %15 : vector<1x1024xbf16> to vector<16x1024xbf16>
    %17 = arith.addf %14, %16 : vector<16x1024xbf16>
    %cst_12 = arith.constant 1.000980e-02 : bf16
    %18 = vector.broadcast %cst_12 : bf16 to vector<16x1024xbf16>
    %19 = arith.mulf %18, %17 : vector<16x1024xbf16>
    %20 = arith.maximumf %17, %19 : vector<16x1024xbf16>
    %c0_13 = arith.constant 0 : index
    %c0_14 = arith.constant 0 : index
    %21 = vector.load %arg6[%c0_13, %c0_14] : memref<1024x1024xbf16, #tpu.memory_space<vmem>>, vector<1024x1024xbf16>
    %cst_15 = arith.constant dense<0.000000e+00> : vector<16x1024xf32>
    %22 = tpu.matmul %20, %21, %cst_15 {dimension_numbers = #tpu.dot_dimension_numbers<[1], [0], [0], [1], [0, 0, 1, 1], [], []>} : vector<16x1024xbf16>, vector<1024x1024xbf16>, vector<16x1024xf32> -> vector<16x1024xf32>
    %23 = arith.truncf %22 : vector<16x1024xf32> to vector<16x1024xbf16>
    %c0_16 = arith.constant 0 : index
    %c0_17 = arith.constant 0 : index
    %24 = vector.load %arg7[%c0_16, %c0_17] : memref<1x1024xbf16, #tpu.memory_space<vmem>>, vector<1x1024xbf16>
    %25 = vector.broadcast %24 : vector<1x1024xbf16> to vector<16x1024xbf16>
    %26 = arith.addf %23, %25 : vector<16x1024xbf16>
    %cst_18 = arith.constant 1.000980e-02 : bf16
    %27 = vector.broadcast %cst_18 : bf16 to vector<16x1024xbf16>
    %28 = arith.mulf %27, %26 : vector<16x1024xbf16>
    %29 = arith.maximumf %26, %28 : vector<16x1024xbf16>
    %c0_19 = arith.constant 0 : index
    %c0_20 = arith.constant 0 : index
    %30 = vector.load %arg8[%c0_19, %c0_20] : memref<1024x128xbf16, #tpu.memory_space<vmem>>, vector<1024x128xbf16>
    %cst_21 = arith.constant dense<0.000000e+00> : vector<16x128xf32>
    %31 = tpu.matmul %29, %30, %cst_21 {dimension_numbers = #tpu.dot_dimension_numbers<[1], [0], [0], [1], [0, 0, 1, 1], [], []>} : vector<16x1024xbf16>, vector<1024x128xbf16>, vector<16x128xf32> -> vector<16x128xf32>
    %c0_22 = arith.constant 0 : index
    %c0_23 = arith.constant 0 : index
    %32 = vector.load %arg9[%c0_22, %c0_23] : memref<1x128xf32, #tpu.memory_space<vmem>>, vector<1x128xf32>
    %33 = vector.broadcast %32 : vector<1x128xf32> to vector<16x128xf32>
    %34 = arith.addf %31, %33 : vector<16x128xf32>
    %35 = math.tanh %34 : vector<16x128xf32>
    %c0_24 = arith.constant 0 : index
    %c0_25 = arith.constant 0 : index
    %36 = vector.load %arg10[%c0_24, %c0_25] : memref<16x128xf32, #tpu.memory_space<vmem>>, vector<16x128xf32>
    tpu.vector_store %arg10[%c0_24, %c0_25], %35 {strides = array<i32>} : memref<16x128xf32, #tpu.memory_space<vmem>>, vector<16x128xf32>,
    return
  }
  func.func @transform_0(%arg0: i32) -> (i32, i32) {
    %c0_i32 = arith.constant 0 : i32
    %c0_i32_0 = arith.constant 0 : i32
    return %arg0, %c0_i32 : i32, i32
  }
  func.func @transform_1(%arg0: i32) -> (i32, i32) {
    %c0_i32 = arith.constant 0 : i32
    %c0_i32_0 = arith.constant 0 : i32
    %c0_i32_1 = arith.constant 0 : i32
    return %c0_i32, %c0_i32_0 : i32, i32
  }
  func.func @transform_2(%arg0: i32) -> (i32, i32) {
    %c0_i32 = arith.constant 0 : i32
    %c0_i32_0 = arith.constant 0 : i32
    %c0_i32_1 = arith.constant 0 : i32
    return %c0_i32, %c0_i32_0 : i32, i32
  }
  func.func @transform_3(%arg0: i32) -> (i32, i32) {
    %c0_i32 = arith.constant 0 : i32
    %c0_i32_0 = arith.constant 0 : i32
    %c0_i32_1 = arith.constant 0 : i32
    return %c0_i32, %c0_i32_0 : i32, i32
  }
  func.func @transform_4(%arg0: i32) -> (i32, i32) {
    %c0_i32 = arith.constant 0 : i32
    %c0_i32_0 = arith.constant 0 : i32
    %c0_i32_1 = arith.constant 0 : i32
    return %c0_i32, %c0_i32_0 : i32, i32
  }
  func.func @transform_5(%arg0: i32) -> (i32, i32) {
    %c0_i32 = arith.constant 0 : i32
    %c0_i32_0 = arith.constant 0 : i32
    %c0_i32_1 = arith.constant 0 : i32
    return %c0_i32, %c0_i32_0 : i32, i32
  }
  func.func @transform_6(%arg0: i32) -> (i32, i32) {
    %c0_i32 = arith.constant 0 : i32
    %c0_i32_0 = arith.constant 0 : i32
    %c0_i32_1 = arith.constant 0 : i32
    return %c0_i32, %c0_i32_0 : i32, i32
  }
  func.func @transform_7(%arg0: i32) -> (i32, i32) {
    %c0_i32 = arith.constant 0 : i32
    %c0_i32_0 = arith.constant 0 : i32
    %c0_i32_1 = arith.constant 0 : i32
    return %c0_i32, %c0_i32_0 : i32, i32
  }
  func.func @transform_8(%arg0: i32) -> (i32, i32) {
    %c0_i32 = arith.constant 0 : i32
    %c0_i32_0 = arith.constant 0 : i32
    %c0_i32_1 = arith.constant 0 : i32
    return %c0_i32, %c0_i32_0 : i32, i32
  }
  func.func @transform_9(%arg0: i32) -> (i32, i32) {
    %c0_i32 = arith.constant 0 : i32
    %c0_i32_0 = arith.constant 0 : i32
    return %arg0, %c0_i32 : i32, i32
  }
}

</mosaic_0001>

<bundles_post_ra>
// kernel: simple_encoder_forward.1
= control target key start
LH: loop header
LB: loop body
LE: loop exit
PB: predicated region body
PF: predicated region fallthrough
CT: control target
= control target key end

     0   :  { %14 = vsyncpa [#allocation3], 0  ;;  %s11065_s0 = inlined_call_operand.vmem [shape: f32[16,3], index: 0, kind: input, shape index: {}]   ;;  %s11066_s1 = inlined_call_operand.hbm [shape: f32[8,1024], index: 1, kind: input, shape index: {}]   ;;  %s11067_s2 = inlined_call_operand.hbm [shape: f32[1,1024], index: 2, kind: input, shape index: {}]   ;;  %s11068_s3 = inlined_call_operand.hbm [shape: bf16[1024,1024], index: 3, kind: input, shape index: {}]   ;;  %s11069_s4 = inlined_call_operand.hbm [shape: bf16[1,1024], index: 4, kind: input, shape index: {}]   ;;  %s11070_s5 = inlined_call_operand.hbm [shape: bf16[1024,1024], index: 5, kind: input, shape index: {}]   ;;  %s11071_s6 = inlined_call_operand.hbm [shape: bf16[1,1024], index: 6, kind: input, shape index: {}]   ;;  %s11072_s7 = inlined_call_operand.hbm [shape: bf16[1024,128], index: 7, kind: input, shape index: {}]   ;;  %s11073_s8 = inlined_call_operand.hbm [shape: f32[1,128], index: 8, kind: input, shape index: {}]   ;;  %s11074_s9 = inlined_call_operand.vmem [shape: f32[16,128], index: 9, kind: output, shape index: {}]  }
   0x1   :  { %15 = vsyncpa [#allocation5], 0 }
   0x2   :  { %16 = vsyncpa [#allocation8], 0 }
   0x3   :  { %17 = vsyncpa [#allocation11], 0 }
   0x4   :  { %18 = vsyncpa [#allocation14], 0  ;;  %s10590_s30 = smov [#allocation4]   ;;  %s10591_s11 = smov [#allocation7]  }
   0x5   :  { %s37_s10 = sshll.u32 %s10590_s30, 4  ;;  %s59_s12 = sshll.u32 %s10591_s11, 4  ;;  %s38_s10 = int_to_ptr.vmem [resolvable:$true] %s37_s10  ;;  %s60_s12 = int_to_ptr.vmem [resolvable:$true] %s59_s12 }
   0x6   :  { %s10404_s15 = scalar_lea.hbm %s11067_s2, 128 }
   0x7   :  { %p10405_p0 = scmp.ne.s32.totalorder %s11067_s2, %s10404_s15  ;;  %p10408_p1 = scmp.lt.u32.totalorder %s10404_s15, %s11067_s2 }
   0x9   :  { %p10410_p2 = pnand %p10408_p1, %p10405_p0 }
   0xb   :  { %10413 = shalt.err (!%p10410_p2)
}
   0xc   :  { %s10414_s20 = scalar_lea.vmem %s38_s10, 128  ;;  %p10419_p4 = scmp.lt.s32.totalorder %s38_s10, %s38_s10 }
   0xd   :  { %p10415_p3 = scmp.ne.s32.totalorder %s38_s10, %s10414_s20  ;;  %p10420_p5 = scmp.lt.s32.totalorder %s10414_s20, %s10414_s20 }
   0xf   :  { %p10421_p6 = por %p10420_p5, %p10419_p4 }
  0x11   :  { %p10422_p7 = pnand %p10421_p6, %p10415_p3 }
  0x13   :  { %10425 = shalt.err (!%p10422_p7)
}
  0x14   :  { %40 = dma.hbm_to_vmem [thread:$0]  %s11067_s2, 128, %s38_s10, [#allocation5]  }
  0x15   :  { %s10426_s25 = scalar_lea.hbm %s11069_s4, 128 }
  0x16   :  { %p10427_p8 = scmp.ne.s32.totalorder %s11069_s4, %s10426_s25  ;;  %p10430_p9 = scmp.lt.u32.totalorder %s10426_s25, %s11069_s4 }
  0x18   :  { %p10432_p10 = pnand %p10430_p9, %p10427_p8 }
  0x1a   :  { %10435 = shalt.err (!%p10432_p10)
}
  0x1b   :  { %s10436_s30 = scalar_lea.vmem %s60_s12, 128  ;;  %p10441_p12 = scmp.lt.s32.totalorder %s60_s12, %s60_s12 }
  0x1c   :  { %p10437_p11 = scmp.ne.s32.totalorder %s60_s12, %s10436_s30  ;;  %p10442_p13 = scmp.lt.s32.totalorder %s10436_s30, %s10436_s30 }
  0x1e   :  { %p10443_p0 = por %p10442_p13, %p10441_p12 }
  0x20   :  { %p10444_p1 = pnand %p10443_p0, %p10437_p11 }
  0x22   :  { %10447 = shalt.err (!%p10444_p1)
}
  0x23   :  { %62 = dma.hbm_to_vmem [thread:$0]  %s11069_s4, 128, %s60_s12, [#allocation8]  }
  0x24   :  { %s10592_s11 = smov [#allocation10]   ;;  %s10593_s14 = smov [#allocation2]  }
  0x25   :  { %s81_s13 = sshll.u32 %s10592_s11, 4  ;;  %s27_s15 = sshll.u32 %s10593_s14, 4  ;;  %s82_s13 = int_to_ptr.vmem [resolvable:$true] %s81_s13  ;;  %s28_s15 = int_to_ptr.vmem [resolvable:$true] %s27_s15 }
  0x26   :  { %s10448_s18 = scalar_lea.hbm %s11071_s6, 128 }
  0x27   :  { %p10449_p2 = scmp.ne.s32.totalorder %s11071_s6, %s10448_s18  ;;  %p10452_p3 = scmp.lt.u32.totalorder %s10448_s18, %s11071_s6 }
  0x29   :  { %p10454_p4 = pnand %p10452_p3, %p10449_p2 }
  0x2b   :  { %10457 = shalt.err (!%p10454_p4)
}
  0x2c   :  { %s10458_s4 = scalar_lea.vmem %s82_s13, 128  ;;  %p10463_p6 = scmp.lt.s32.totalorder %s82_s13, %s82_s13 }
  0x2d   :  { %p10459_p5 = scmp.ne.s32.totalorder %s82_s13, %s10458_s4  ;;  %p10464_p7 = scmp.lt.s32.totalorder %s10458_s4, %s10458_s4 }
  0x2f   :  { %p10465_p8 = por %p10464_p7, %p10463_p6 }
  0x31   :  { %p10466_p9 = pnand %p10465_p8, %p10459_p5 }
  0x33   :  { %10469 = shalt.err (!%p10466_p9)
}
  0x34   :  { %84 = dma.hbm_to_vmem [thread:$0]  %s11071_s6, 128, %s82_s13, [#allocation11]  }
  0x35   :  { %s10470_s26 = scalar_lea.hbm %s11066_s1, 1024 }
  0x36   :  { %p10471_p10 = scmp.ne.s32.totalorder %s11066_s1, %s10470_s26  ;;  %p10474_p11 = scmp.lt.u32.totalorder %s10470_s26, %s11066_s1 }
  0x38   :  { %p10476_p12 = pnand %p10474_p11, %p10471_p10 }
  0x3a   :  { %10479 = shalt.err (!%p10476_p12)
}
  0x3b   :  { %s10480_s2 = scalar_lea.vmem %s28_s15, 1024  ;;  %p10485_p0 = scmp.lt.s32.totalorder %s28_s15, %s28_s15 }
  0x3c   :  { %p10481_p13 = scmp.ne.s32.totalorder %s28_s15, %s10480_s2  ;;  %p10486_p1 = scmp.lt.s32.totalorder %s10480_s2, %s10480_s2 }
  0x3e   :  { %p10487_p2 = por %p10486_p1, %p10485_p0 }
  0x40   :  { %p10488_p3 = pnand %p10487_p2, %p10481_p13 }
  0x42   :  { %10491 = shalt.err (!%p10488_p3)
}
  0x43   :  { %30 = dma.hbm_to_vmem [thread:$0]  %s11066_s1, 1024, %s28_s15, [#allocation3]  }
  0x44   :  { %s10594_s11 = smov [#allocation6]   ;;  %s10492_s17 = scalar_lea.hbm %s11068_s3, 65536 }
  0x45   :  { %s46_s13 = sshll.u32 %s10594_s11, 4  ;;  %p10493_p4 = scmp.ne.s32.totalorder %s11068_s3, %s10492_s17  ;;  %s47_s13 = int_to_ptr.vmem [resolvable:$true] %s46_s13 }
  0x46   :  { %p10496_p5 = scmp.lt.u32.totalorder %s10492_s17, %s11068_s3 }
  0x48   :  { %p10498_p6 = pnand %p10496_p5, %p10493_p4 }
  0x4a   :  { %10501 = shalt.err (!%p10498_p6)
}
  0x4b   :  { %s10502_s22 = scalar_lea.vmem %s47_s13, 65536  ;;  %p10507_p8 = scmp.lt.s32.totalorder %s47_s13, %s47_s13 }
  0x4c   :  { %p10503_p7 = scmp.ne.s32.totalorder %s47_s13, %s10502_s22  ;;  %p10508_p9 = scmp.lt.s32.totalorder %s10502_s22, %s10502_s22 }
  0x4e   :  { %p10509_p10 = por %p10508_p9, %p10507_p8 }
  0x50   :  { %p10510_p11 = pnand %p10509_p10, %p10503_p7 }
  0x52   :  { %10513 = shalt.err (!%p10510_p11)
}
  0x53   :  { %s10595_s1 = smov 512   ;;  %s10596_s15 = smov 32  }
  0x54   :  { %52 = dma.hbm_to_vmem [thread:$0]  %s11068_s3, 65536, %s47_s13, [#allocation5], %s10595_s1, %s10595_s1, %s10596_s15  }
  0x55   :  { %s10597_s23 = smov [#allocation9]   ;;  %s10598_s25 = smov [#allocation12]  }
  0x56   :  { %s68_s24 = sshll.u32 %s10597_s23, 4  ;;  %s90_s26 = sshll.u32 %s10598_s25, 4  ;;  %s69_s24 = int_to_ptr.vmem [resolvable:$true] %s68_s24  ;;  %s91_s26 = int_to_ptr.vmem [resolvable:$true] %s90_s26 }
  0x57   :  { %s10514_s29 = scalar_lea.hbm %s11070_s5, 65536 }
  0x58   :  { %p10515_p12 = scmp.ne.s32.totalorder %s11070_s5, %s10514_s29  ;;  %p10518_p13 = scmp.lt.u32.totalorder %s10514_s29, %s11070_s5 }
  0x5a   :  { %p10520_p0 = pnand %p10518_p13, %p10515_p12 }
  0x5c   :  { %10523 = shalt.err (!%p10520_p0)
}
  0x5d   :  { %s10524_s3 = scalar_lea.vmem %s69_s24, 65536  ;;  %p10529_p2 = scmp.lt.s32.totalorder %s69_s24, %s69_s24 }
  0x5e   :  { %p10525_p1 = scmp.ne.s32.totalorder %s69_s24, %s10524_s3  ;;  %p10530_p3 = scmp.lt.s32.totalorder %s10524_s3, %s10524_s3 }
  0x60   :  { %p10531_p4 = por %p10530_p3, %p10529_p2 }
  0x62   :  { %p10532_p5 = pnand %p10531_p4, %p10525_p1 }
  0x64   :  { %10535 = shalt.err (!%p10532_p5)
}
  0x65   :  { %74 = dma.hbm_to_vmem [thread:$0]  %s11070_s5, 65536, %s69_s24, [#allocation8], %s10595_s1, %s10595_s1, %s10596_s15  }
  0x66   :  { %s10536_s17 = scalar_lea.hbm %s11072_s7, 8192 }
  0x67   :  { %p10537_p6 = scmp.ne.s32.totalorder %s11072_s7, %s10536_s17  ;;  %p10540_p7 = scmp.lt.u32.totalorder %s10536_s17, %s11072_s7 }
  0x69   :  { %p10542_p8 = pnand %p10540_p7, %p10537_p6 }
  0x6b   :  { %10545 = shalt.err (!%p10542_p8)
}
  0x6c   :  { %s10546_s22 = scalar_lea.vmem %s91_s26, 8192  ;;  %p10551_p10 = scmp.lt.s32.totalorder %s91_s26, %s91_s26 }
  0x6d   :  { %p10547_p9 = scmp.ne.s32.totalorder %s91_s26, %s10546_s22  ;;  %p10552_p11 = scmp.lt.s32.totalorder %s10546_s22, %s10546_s22 }
  0x6f   :  { %p10553_p12 = por %p10552_p11, %p10551_p10 }
  0x71   :  { %p10554_p13 = pnand %p10553_p12, %p10547_p9 }
  0x73   :  { %10557 = shalt.err (!%p10554_p13)
}
  0x74   :  { %s10599_s5 = smov 64   ;;  %s10600_s1 = smov 4  }
  0x75   :  { %96 = dma.hbm_to_vmem [thread:$0]  %s11072_s7, 8192, %s91_s26, [#allocation11], %s10599_s5, %s10599_s5, %s10600_s1  }
  0x76   :  { %s10601_s12 = smov [#allocation13]   ;;  %s10558_s27 = scalar_lea.hbm %s11073_s8, 16 }
  0x77   :  { %s103_s23 = sshll.u32 %s10601_s12, 4  ;;  %p10559_p0 = scmp.ne.s32.totalorder %s11073_s8, %s10558_s27  ;;  %s104_s23 = int_to_ptr.vmem [resolvable:$true] %s103_s23 }
  0x78   :  { %p10562_p1 = scmp.lt.u32.totalorder %s10558_s27, %s11073_s8 }
  0x7a   :  { %p10564_p2 = pnand %p10562_p1, %p10559_p0 }
  0x7c   :  { %10567 = shalt.err (!%p10564_p2)
}
  0x7d   :  { %s10568_s6 = scalar_lea.vmem %s104_s23, 16  ;;  %s10572_s7 = scalar_lea.vmem %s104_s23, 32 }
  0x7e   :  { %p10569_p3 = scmp.ne.s32.totalorder %s104_s23, %s10568_s6  ;;  %p10573_p4 = scmp.lt.s32.totalorder %s104_s23, %s104_s23 }
  0x7f   :  { %p10574_p5 = scmp.lt.s32.totalorder %s10572_s7, %s10568_s6 }
  0x81   :  { %p10575_p6 = por %p10574_p5, %p10573_p4 }
  0x83   :  { %p10576_p7 = pnand %p10575_p6, %p10569_p3 }
  0x85   :  { %10579 = shalt.err (!%p10576_p7)
}
  0x86   :  { %106 = dma.hbm_to_vmem [thread:$0]  %s11073_s8, 16, %s104_s23, [#allocation14]  }
  0x87   :  { %10580 = dma.done.wait [#allocation3], 1024  }
  0x88   :  { %10581 = vsyncadd [#allocation3], 4294966272 }
  0x89   :  { %10582 = dma.done.wait [#allocation5], 65664  }
  0x8a   :  { %10583 = vsyncadd [#allocation5], 4294901632 }
  0x8b   :  { %10584 = dma.done.wait [#allocation8], 65664  }
  0x8c   :  { %10585 = vsyncadd [#allocation8], 4294901632 }
  0x8d   :  { %10586 = dma.done.wait [#allocation11], 8320  }
  0x8e   :  { %10587 = vsyncadd [#allocation11], 4294958976 }
  0x8f   :  { %10588 = dma.done.wait [#allocation14], 16  }
  0x90   :  { %10589 = vsyncadd [#allocation14], 4294967280  ;;  %v10602_v0 = vmov 0.0   ;;  %vm135_vm0 = vcmask 23552   ;;  %v139_v1 = vld [vmem:[#allocation2 + $0x8] sm:$0xff]  ;;  %v138_v2 = vld [vmem:[#allocation2] sm:$0xff] }
  0x91   :  { %259 = vmatprep.mubr.f32.mxu0 %v10602_v0  ;;  %336 = vmatprep.mubr.f32.mxu1 %v10602_v0  ;;  %v133_v3 = vld [vmem:[%s11065_s0] sm:$0xff]  ;;  %vm188_vm1 = vcmask 64512   ;;  %v134_v5 = vld [vmem:[%s11065_s0 + $0x8] sm:$0xff]  ;;  %v141_v6 = vld [vmem:[#allocation2 + $0x18] sm:$0xff] }
  0x92   :  { %195 = vmatprep.subr.mxu0 %v139_v1  ;;  %v136_v4 = vsel %vm135_vm0, %v133_v3, 0.0  ;;  %v140_v7 = vld [vmem:[#allocation2 + $0x10] sm:$0xff]  ;;  %272 = vmatprep.subr.mxu1 %v141_v6  ;;  %v143_v8 = vld [vmem:[#allocation2 + $0x28] sm:$0xff]  ;;  %v142_v9 = vld [vmem:[#allocation2 + $0x20] sm:$0xff]  ;;  %v137_v13 = vsel %vm135_vm0, %v134_v5, 0.0 }
  0x93   :  { %196 = vmatpush1.msra.mxu0 %v138_v2  ;;  %273 = vmatpush1.msra.mxu1 %v140_v7  ;;  %v145_v10 = vld [vmem:[#allocation2 + $0x38] sm:$0xff]  ;;  %v543_v11 = vld [vmem:[#allocation6] sm:$0xff]  ;;  %v144_v14 = vld [vmem:[#allocation2 + $0x30] sm:$0xff] }
  0x94   :  { %9037 = vmatmul.mubr.msk.f32.vlgmr.msra.gmra.mrb[0].mxu0 %vm188_vm1, %v136_v4  ;;  %v547_v12 = vld [vmem:[#allocation6 + $0x20] sm:$0xff]  ;;  %9039 = vmatmul.mubr.msk.f32.vlgmr.msra.gmra.mrb[0].mxu1 %vm188_vm1, %v136_v4  ;;  %v544_v15 = vld [vmem:[#allocation6 + $0x8] sm:$0xff] }
  0x95   :  { %265 = vmatprep.mubr.f32.mxu0 %v10602_v0  ;;  %v548_v16 = vld [vmem:[#allocation6 + $0x28] sm:$0xff]  ;;  %342 = vmatprep.mubr.f32.mxu1 %v10602_v0  ;;  %v9046_v17 = vcombine.high %v543_v11, %v547_v12  ;;  %v551_v19 = vld [vmem:[#allocation6 + $0x40] sm:$0xff]  ;;  %v9045_v23 = vcombine.low %v543_v11, %v547_v12 }
  0x96   :  { %349 = vmatprep.subr.mxu0 %v143_v8  ;;  %426 = vmatprep.subr.mxu1 %v145_v10  ;;  %v9048_v18 = vcombine.high %v544_v15, %v548_v16  ;;  %v555_v20 = vld [vmem:[#allocation6 + $0x60] sm:$0xff]  ;;  %v552_v21 = vld [vmem:[#allocation6 + $0x48] sm:$0xff]  ;;  %v9047_v24 = vcombine.low %v544_v15, %v548_v16 }
  0x97   :  { %350 = vmatpush1.msra.mxu0 %v142_v9  ;;  %427 = vmatpush1.msra.mxu1 %v144_v14  ;;  %v556_v22 = vld [vmem:[#allocation6 + $0x68] sm:$0xff]  ;;  %v9054_v25 = vcombine.high %v551_v19, %v555_v20  ;;  %v559_v27 = vld [vmem:[#allocation6 + $0x80] sm:$0xff]  ;;  %v9053_v31 = vcombine.low %v551_v19, %v555_v20 }
  0x98   :  { %9038 = vmatmul.mubr.msk.f32.gmra.mrb[2].mxu0 %vm188_vm1, %v137_v13  ;;  %9040 = vmatmul.mubr.msk.f32.gmra.mrb[2].mxu1 %vm188_vm1, %v137_v13  ;;  %v9056_v26 = vcombine.high %v552_v21, %v556_v22  ;;  %v563_v28 = vld [vmem:[#allocation6 + $0xa0] sm:$0xff]  ;;  %v560_v29 = vld [vmem:[#allocation6 + $0x88] sm:$0xff]  ;;  %v9055_v32 = vcombine.low %v552_v21, %v556_v22 }
  0x99   :  { %413 = vmatprep.mubr.f32.mxu0 %v10602_v0  ;;  %490 = vmatprep.mubr.f32.mxu1 %v10602_v0  ;;  %v564_v30 = vld [vmem:[#allocation6 + $0xa8] sm:$0xff]  ;;  %v9062_v33 = vcombine.high %v559_v27, %v563_v28  ;;  %v567_v35 = vld [vmem:[#allocation6 + $0xc0] sm:$0xff]  ;;  %v9061_v39 = vcombine.low %v559_v27, %v563_v28 }
  0x9a   :  { %3615 = vmatprep.subr.bf16.mxu0 %v9046_v17  ;;  %3787 = vmatprep.subr.bf16.mxu1 %v9048_v18  ;;  %v9064_v34 = vcombine.high %v560_v29, %v564_v30  ;;  %v571_v36 = vld [vmem:[#allocation6 + $0xe0] sm:$0xff]  ;;  %v568_v37 = vld [vmem:[#allocation6 + $0xc8] sm:$0xff]  ;;  %v9063_v40 = vcombine.low %v560_v29, %v564_v30 }
  0x9b   :  { %v572_v38 = vld [vmem:[#allocation6 + $0xe8] sm:$0xff]  ;;  %v9070_v41 = vcombine.high %v567_v35, %v571_v36  ;;  %v575_v43 = vld [vmem:[#allocation6 + $0x100] sm:$0xff]  ;;  %v9069_v47 = vcombine.low %v567_v35, %v571_v36 }
  0x9c   :  { %9041 = vmatmul.mubr.msk.f32.vlgmr.msra.gmra.mrb[4].mxu0 %vm188_vm1, %v136_v4  ;;  %9043 = vmatmul.mubr.msk.f32.vlgmr.msra.gmra.mrb[4].mxu1 %vm188_vm1, %v136_v4  ;;  %v9072_v42 = vcombine.high %v568_v37, %v572_v38  ;;  %v579_v44 = vld [vmem:[#allocation6 + $0x120] sm:$0xff]  ;;  %v576_v45 = vld [vmem:[#allocation6 + $0x108] sm:$0xff]  ;;  %v9071_v48 = vcombine.low %v568_v37, %v572_v38 }
  0x9d   :  { %419 = vmatprep.mubr.f32.mxu0 %v10602_v0  ;;  %3616 = vmatpush1.bf16.msra.mxu0 %v9045_v23  ;;  %v580_v46 = vld [vmem:[#allocation6 + $0x128] sm:$0xff]  ;;  %v583_v49 = vld [vmem:[#allocation6 + $0x140] sm:$0xff]  ;;  %v9078_v53 = vcombine.high %v575_v43, %v579_v44  ;;  %v9077_v55 = vcombine.low %v575_v43, %v579_v44 }
  0x9e   :  { %3788 = vmatpush1.bf16.msra.mxu1 %v9047_v24  ;;  %3617 = vmatprep.subr.bf16.mxu0 %v9054_v25  ;;  %v587_v50 = vld [vmem:[#allocation6 + $0x160] sm:$0xff]  ;;  %v584_v51 = vld [vmem:[#allocation6 + $0x148] sm:$0xff]  ;;  %v9080_v54 = vcombine.high %v576_v45, %v580_v46  ;;  %v9079_v56 = vcombine.low %v576_v45, %v580_v46 }
  0x9f   :  { %3789 = vmatprep.subr.bf16.mxu1 %v9056_v26  ;;  %496 = vmatprep.mubr.f32.mxu1 %v10602_v0  ;;  %v588_v52 = vld [vmem:[#allocation6 + $0x168] sm:$0xff]  ;;  %v591_v57 = vld [vmem:[#allocation6 + $0x180] sm:$0xff]  ;;  %v9086_v61 = vcombine.high %v583_v49, %v587_v50  ;;  %v9085_v63 = vcombine.low %v583_v49, %v587_v50 }
  0xa0   :  { %9042 = vmatmul.mubr.msk.f32.gmra.mrb[6].mxu0 %vm188_vm1, %v137_v13  ;;  %9044 = vmatmul.mubr.msk.f32.gmra.mrb[6].mxu1 %vm188_vm1, %v137_v13  ;;  %v595_v58 = vld [vmem:[#allocation6 + $0x1a0] sm:$0xff]  ;;  %v592_v59 = vld [vmem:[#allocation6 + $0x188] sm:$0xff]  ;;  %v9088_v62 = vcombine.high %v584_v51, %v588_v52  ;;  %v9087_v0 = vcombine.low %v584_v51, %v588_v52 }
  0xa1   :  { %3618 = vmatpush1.bf16.msra.mxu0 %v9053_v31  ;;  %v596_v60 = vld [vmem:[#allocation6 + $0x1a8] sm:$0xff]  ;;  %v599_v1 = vld [vmem:[#allocation6 + $0x1c0] sm:$0xff]  ;;  %v9094_v5 = vcombine.high %v591_v57, %v595_v58  ;;  %v9093_v7 = vcombine.low %v591_v57, %v595_v58 }
  0xa2   :  { %3790 = vmatpush1.bf16.msra.mxu1 %v9055_v32  ;;  %3619 = vmatprep.subr.bf16.mxu0 %v9062_v33  ;;  %v603_v2 = vld [vmem:[#allocation6 + $0x1e0] sm:$0xff]  ;;  %v600_v3 = vld [vmem:[#allocation6 + $0x1c8] sm:$0xff]  ;;  %v9096_v6 = vcombine.high %v592_v59, %v596_v60  ;;  %v9095_v8 = vcombine.low %v592_v59, %v596_v60 }
  0xa3   :  { %3791 = vmatprep.subr.bf16.mxu1 %v9064_v34  ;;  %v604_v4 = vld [vmem:[#allocation6 + $0x1e8] sm:$0xff]  ;;  %v607_v9 = vld [vmem:[#allocation6 + $0x200] sm:$0xff]  ;;  %v9102_v13 = vcombine.high %v599_v1, %v603_v2  ;;  %v9101_v15 = vcombine.low %v599_v1, %v603_v2 }
  0xa4   :  { %v611_v10 = vld [vmem:[#allocation6 + $0x220] sm:$0xff]  ;;  %v608_v11 = vld [vmem:[#allocation6 + $0x208] sm:$0xff]  ;;  %v9104_v14 = vcombine.high %v600_v3, %v604_v4  ;;  %v9103_v16 = vcombine.low %v600_v3, %v604_v4 }
  0xa5   :  { %3620 = vmatpush1.bf16.msra.mxu0 %v9061_v39  ;;  %v612_v12 = vld [vmem:[#allocation6 + $0x228] sm:$0xff]  ;;  %v615_v17 = vld [vmem:[#allocation6 + $0x240] sm:$0xff]  ;;  %v9110_v21 = vcombine.high %v607_v9, %v611_v10  ;;  %v9109_v23 = vcombine.low %v607_v9, %v611_v10 }
  0xa6   :  { %3792 = vmatpush1.bf16.msra.mxu1 %v9063_v40  ;;  %3621 = vmatprep.subr.bf16.mxu0 %v9070_v41  ;;  %v619_v18 = vld [vmem:[#allocation6 + $0x260] sm:$0xff]  ;;  %v616_v19 = vld [vmem:[#allocation6 + $0x248] sm:$0xff]  ;;  %v9112_v22 = vcombine.high %v608_v11, %v612_v12  ;;  %v9111_v24 = vcombine.low %v608_v11, %v612_v12 }
  0xa7   :  { %3793 = vmatprep.subr.bf16.mxu1 %v9072_v42  ;;  %v620_v20 = vld [vmem:[#allocation6 + $0x268] sm:$0xff]  ;;  %v623_v25 = vld [vmem:[#allocation6 + $0x280] sm:$0xff]  ;;  %v9118_v29 = vcombine.high %v615_v17, %v619_v18  ;;  %v9117_v31 = vcombine.low %v615_v17, %v619_v18 }
  0xa8   :  { %v627_v26 = vld [vmem:[#allocation6 + $0x2a0] sm:$0xff]  ;;  %v624_v27 = vld [vmem:[#allocation6 + $0x288] sm:$0xff]  ;;  %v9120_v30 = vcombine.high %v616_v19, %v620_v20  ;;  %v9119_v32 = vcombine.low %v616_v19, %v620_v20 }
  0xa9   :  { %3622 = vmatpush1.bf16.msra.mxu0 %v9069_v47  ;;  %v628_v28 = vld [vmem:[#allocation6 + $0x2a8] sm:$0xff]  ;;  %v631_v33 = vld [vmem:[#allocation6 + $0x2c0] sm:$0xff]  ;;  %v9126_v37 = vcombine.high %v623_v25, %v627_v26  ;;  %v9125_v39 = vcombine.low %v623_v25, %v627_v26 }
  0xaa   :  { %3794 = vmatpush1.bf16.msra.mxu1 %v9071_v48  ;;  %3623 = vmatprep.subr.bf16.mxu0 %v9078_v53  ;;  %v635_v34 = vld [vmem:[#allocation6 + $0x2e0] sm:$0xff]  ;;  %v632_v35 = vld [vmem:[#allocation6 + $0x2c8] sm:$0xff]  ;;  %v9128_v38 = vcombine.high %v624_v27, %v628_v28  ;;  %v9127_v40 = vcombine.low %v624_v27, %v628_v28 }
  0xab   :  { %3795 = vmatprep.subr.bf16.mxu1 %v9080_v54  ;;  %v636_v36 = vld [vmem:[#allocation6 + $0x2e8] sm:$0xff]  ;;  %v639_v41 = vld [vmem:[#allocation6 + $0x300] sm:$0xff]  ;;  %v9134_v45 = vcombine.high %v631_v33, %v635_v34  ;;  %v9133_v47 = vcombine.low %v631_v33, %v635_v34 }
  0xac   :  { %v643_v42 = vld [vmem:[#allocation6 + $0x320] sm:$0xff]  ;;  %v640_v43 = vld [vmem:[#allocation6 + $0x308] sm:$0xff]  ;;  %v9136_v46 = vcombine.high %v632_v35, %v636_v36  ;;  %v9135_v48 = vcombine.low %v632_v35, %v636_v36 }
  0xad   :  { %3624 = vmatpush1.bf16.msra.mxu0 %v9077_v55  ;;  %v644_v44 = vld [vmem:[#allocation6 + $0x328] sm:$0xff]  ;;  %v9142_v49 = vcombine.high %v639_v41, %v643_v42  ;;  %v9141_v51 = vcombine.low %v639_v41, %v643_v42  ;;  %v647_v53 = vld [vmem:[#allocation6 + $0x340] sm:$0xff] }
  0xae   :  { %3796 = vmatpush1.bf16.msra.mxu1 %v9079_v56  ;;  %3625 = vmatprep.subr.bf16.mxu0 %v9086_v61  ;;  %v9144_v50 = vcombine.high %v640_v43, %v644_v44  ;;  %v9143_v52 = vcombine.low %v640_v43, %v644_v44  ;;  %v651_v54 = vld [vmem:[#allocation6 + $0x360] sm:$0xff]  ;;  %v648_v55 = vld [vmem:[#allocation6 + $0x348] sm:$0xff] }
  0xaf   :  { %3797 = vmatprep.subr.bf16.mxu1 %v9088_v62  ;;  %v9150_v56 = vcombine.high %v647_v53, %v651_v54  ;;  %v652_v57 = vld [vmem:[#allocation6 + $0x368] sm:$0xff]  ;;  %v9149_v58 = vcombine.low %v647_v53, %v651_v54  ;;  %v655_v61 = vld [vmem:[#allocation6 + $0x380] sm:$0xff] }
  0xb0   :  { %v9151_v59 = vcombine.low %v648_v55, %v652_v57  ;;  %v9152_v60 = vcombine.high %v648_v55, %v652_v57  ;;  %v659_v62 = vld [vmem:[#allocation6 + $0x3a0] sm:$0xff]  ;;  %v660_v1 = vld [vmem:[#allocation6 + $0x3a8] sm:$0xff] }
  0xb1   :  { %3626 = vmatpush1.bf16.msra.mxu0 %v9085_v63  ;;  %v656_v63 = vld [vmem:[#allocation6 + $0x388] sm:$0xff]  ;;  %v9157_v2 = vcombine.low %v655_v61, %v659_v62 }
  0xb2   :  { %3798 = vmatpush1.bf16.msra.mxu1 %v9087_v0  ;;  %3627 = vmatprep.subr.bf16.mxu0 %v9094_v5  ;;  %v9158_v0 = vcombine.high %v655_v61, %v659_v62  ;;  %v9159_v3 = vcombine.low %v656_v63, %v660_v1  ;;  %v9160_v4 = vcombine.high %v656_v63, %v660_v1  ;;  %v663_v5 = vld [vmem:[#allocation6 + $0x3c0] sm:$0xff]  ;;  %v668_v9 = vld [vmem:[#allocation6 + $0x3e8] sm:$0xff] }
  0xb3   :  { %3799 = vmatprep.subr.bf16.mxu1 %v9096_v6  ;;  %v667_v6 = vld [vmem:[#allocation6 + $0x3e0] sm:$0xff]  ;;  %v10782_v17 = vld [vmem:[#allocation6 + $0x428] sm:$0xff] }
  0xb4   :  { %v9165_v10 = vcombine.low %v663_v5, %v667_v6  ;;  %v679_v63 = vld [vmem:[#allocation6 + $0x440] sm:$0xff] }
  0xb5   :  { %3628 = vmatpush1.bf16.msra.mxu0 %v9093_v7  ;;  %v664_v7 = vld [vmem:[#allocation6 + $0x3c8] sm:$0xff] }
  0xb6   :  { %3800 = vmatpush1.bf16.msra.mxu1 %v9095_v8  ;;  %3629 = vmatprep.subr.bf16.mxu0 %v9102_v13  ;;  %v9166_v8 = vcombine.high %v663_v5, %v667_v6  ;;  %v9167_v11 = vcombine.low %v664_v7, %v668_v9  ;;  %v9168_v12 = vcombine.high %v664_v7, %v668_v9  ;;  %v10774_v13 = vld [vmem:[#allocation6 + $0x400] sm:$0xff]  ;;  %v680_v7 = vld [vmem:[#allocation6 + $0x448] sm:$0xff] }
  0xb7   :  { %3801 = vmatprep.subr.bf16.mxu1 %v9104_v14  ;;  %v10776_v14 = vld [vmem:[#allocation6 + $0x420] sm:$0xff] }
  0xb8   :  { %v9173_v18 = vcombine.low %v10774_v13, %v10776_v14  ;;  %v683_v6 = vld [vmem:[#allocation6 + $0x460] sm:$0xff] }
  0xb9   :  { %3630 = vmatpush1.bf16.msra.mxu0 %v9101_v15  ;;  %v10778_v15 = vld [vmem:[#allocation6 + $0x408] sm:$0xff] }
  0xba   :  { %3802 = vmatpush1.bf16.msra.mxu1 %v9103_v16  ;;  %3631 = vmatprep.subr.bf16.mxu0 %v9110_v21  ;;  %v9174_v16 = vcombine.high %v10774_v13, %v10776_v14  ;;  %v9175_v19 = vcombine.low %v10778_v15, %v10782_v17  ;;  %v9176_v20 = vcombine.high %v10778_v15, %v10782_v17  ;;  %v148_v21 = vlaneseq }
  0xbb   :  { %3803 = vmatprep.subr.bf16.mxu1 %v9112_v22 }
  0xbc   :  { %v10790_v22 = vshrl.u32 %v148_v21, 7 }
  0xbd   :  { %3632 = vmatpush1.bf16.msra.mxu0 %v9109_v23 }
  0xbe   :  { %3804 = vmatpush1.bf16.msra.mxu1 %v9111_v24  ;;  %3633 = vmatprep.subr.bf16.mxu0 %v9118_v29  ;;  %v10793_v23 = vsub.s32 0, %v10790_v22  ;;  %v10795_v24 = vld [vmem:[#allocation4] sm:$0xff]  ;;  %v154_v25 = vsub.s32 1, %v10790_v22  ;;  %v158_v26 = vsub.s32 2, %v10790_v22  ;;  %v162_v27 = vsub.s32 3, %v10790_v22 }
  0xbf   :  { %3805 = vmatprep.subr.bf16.mxu1 %v9120_v30  ;;  %v166_v36 = vsub.s32 4, %v10790_v22 }
  0xc0   :  { %v151_v28 = vrot.slane %v10795_v24, %v10793_v23  ;;  %v155_v29 = vrot.slane %v10795_v24, %v154_v25  ;;  %v159_v30 = vrot.slane %v10795_v24, %v158_v26 }
  0xc1   :  { %3634 = vmatpush1.bf16.msra.mxu0 %v9117_v31  ;;  %v163_v31 = vrot.slane %v10795_v24, %v162_v27  ;;  %v9182_v27 = vcombine.high %v679_v63, %v683_v6 }
  0xc2   :  { %3806 = vmatpush1.bf16.msra.mxu1 %v9119_v32  ;;  %3635 = vmatprep.subr.bf16.mxu0 %v9126_v37 }
  0xc3   :  { %3807 = vmatprep.subr.bf16.mxu1 %v9128_v38 }
  0xc5   :  { %3636 = vmatpush1.bf16.msra.mxu0 %v9125_v39 }
  0xc6   :  { %3808 = vmatpush1.bf16.msra.mxu1 %v9127_v40  ;;  %3637 = vmatprep.subr.bf16.mxu0 %v9134_v45  ;;  %v170_v40 = vsub.s32 5, %v10790_v22 }
  0xc7   :  { %3809 = vmatprep.subr.bf16.mxu1 %v9136_v46 }
  0xc8   :  { %v171_v54 = vrot.slane %v10795_v24, %v170_v40 }
  0xc9   :  { %3638 = vmatpush1.bf16.msra.mxu0 %v9133_v47 }
  0xca   :  { %3810 = vmatpush1.bf16.msra.mxu1 %v9135_v48  ;;  %3639 = vmatprep.subr.bf16.mxu0 %v9142_v49  ;;  %v167_v49 = vrot.slane %v10795_v24, %v166_v36 }
  0xcb   :  { %3811 = vmatprep.subr.bf16.mxu1 %v9144_v50 }
  0xcd   :  { %3640 = vmatpush1.bf16.msra.mxu0 %v9141_v51 }
  0xce   :  { %3812 = vmatpush1.bf16.msra.mxu1 %v9143_v52  ;;  %3641 = vmatprep.subr.bf16.mxu0 %v9150_v56 }
  0xcf   :  { %3813 = vmatprep.subr.bf16.mxu1 %v9152_v60 }
  0xd1   :  { %3642 = vmatpush1.bf16.msra.mxu0 %v9149_v58 }
  0xd2   :  { %3814 = vmatpush1.bf16.msra.mxu1 %v9151_v59  ;;  %3643 = vmatprep.subr.bf16.mxu0 %v9158_v0 }
  0xd3   :  { %3815 = vmatprep.subr.bf16.mxu1 %v9160_v4 }
  0xd5   :  { %3644 = vmatpush1.bf16.msra.mxu0 %v9157_v2 }
  0xd6   :  { %3816 = vmatpush1.bf16.msra.mxu1 %v9159_v3  ;;  %3645 = vmatprep.subr.bf16.mxu0 %v9166_v8  ;;  %v684_v8 = vld [vmem:[#allocation6 + $0x468] sm:$0xff] }
  0xd7   :  { %3817 = vmatprep.subr.bf16.mxu1 %v9168_v12  ;;  %v9183_v40 = vcombine.low %v680_v7, %v684_v8 }
  0xd9   :  { %3646 = vmatpush1.bf16.msra.mxu0 %v9165_v10 }
  0xda   :  { %3818 = vmatpush1.bf16.msra.mxu1 %v9167_v11  ;;  %3658 = vmatprep.subr.bf16.mxu0 %v9174_v16 }
  0xdb   :  { %3830 = vmatprep.subr.bf16.mxu1 %v9176_v20 }
 0x167   :  { %v261_v32 = vpop.f32.mrb[0].mxu0  ;;  %v338_v35 = vpop.f32.mrb[0].mxu1 }
 0x168   :  { %v262_v33 = vadd.f32 %v261_v32, %v151_v28  ;;  %v263_v34 = vpop.f32.mrb[1].mxu0  ;;  %v339_v38 = vadd.f32 %v338_v35, %v159_v30  ;;  %v340_v39 = vpop.f32.mrb[1].mxu1  ;;  %v692_v35 = vld [vmem:[#allocation6 + $0x4a8] sm:$0xff] }
 0x169   :  { %v264_v37 = vadd.f32 %v263_v34, %v155_v29  ;;  %v341_v41 = vadd.f32 %v340_v39, %v163_v31  ;;  %v688_v34 = vld [vmem:[#allocation6 + $0x488] sm:$0xff]  ;;  %v9181_v39 = vcombine.low %v679_v63, %v683_v6 }
 0x16a   :  { %v503_v42 = vmul.f32 0.01, %v262_v33  ;;  %v505_v44 = vmul.f32 0.01, %v339_v38  ;;  %v9191_v17 = vcombine.low %v688_v34, %v692_v35  ;;  %v724_v6 = vld [vmem:[#allocation6 + $0x5a8] sm:$0xff] }
 0x16b   :  { %v267_v43 = vpop.f32.mrb[2].mxu0  ;;  %v506_v47 = vmul.f32 0.01, %v341_v41  ;;  %v344_v48 = vpop.f32.mrb[2].mxu1  ;;  %v504_v50 = vmul.f32 0.01, %v264_v37 }
 0x16c   :  { %v268_v45 = vadd.f32 %v267_v43, %v151_v28  ;;  %v269_v46 = vpop.f32.mrb[3].mxu0  ;;  %v345_v52 = vadd.f32 %v344_v48, %v159_v30  ;;  %v346_v53 = vpop.f32.mrb[3].mxu1  ;;  %v519_v57 = vmax.f32 %v262_v33, %v503_v42  ;;  %v521_v59 = vmax.f32 %v339_v38, %v505_v44  ;;  %v691_v33 = vld [vmem:[#allocation6 + $0x4a0] sm:$0xff]  ;;  %v696_v48 = vld [vmem:[#allocation6 + $0x4c8] sm:$0xff] }
 0x16d   :  { %v270_v51 = vadd.f32 %v269_v46, %v155_v29  ;;  %v347_v56 = vadd.f32 %v346_v53, %v163_v31  ;;  %v522_v0 = vmax.f32 %v341_v41, %v506_v47  ;;  %v520_v4 = vmax.f32 %v264_v37, %v504_v50  ;;  %v687_v29 = vld [vmem:[#allocation6 + $0x480] sm:$0xff]  ;;  %v704_v53 = vld [vmem:[#allocation6 + $0x508] sm:$0xff] }
 0x16e   :  { %v511_v55 = vmul.f32 0.01, %v268_v45  ;;  %v513_v60 = vmul.f32 0.01, %v345_v52  ;;  %v9184_v28 = vcombine.high %v680_v7, %v684_v8  ;;  %v9190_v43 = vcombine.high %v687_v29, %v691_v33  ;;  %v699_v47 = vld [vmem:[#allocation6 + $0x4e0] sm:$0xff] }
 0x16f   :  { %v512_v58 = vmul.f32 0.01, %v270_v51  ;;  %v415_v61 = vpop.f32.mrb[4].mxu0  ;;  %v514_v1 = vmul.f32 0.01, %v347_v56  ;;  %v9192_v44 = vcombine.high %v688_v34, %v692_v35  ;;  %v9189_v15 = vcombine.low %v687_v29, %v691_v33  ;;  %v739_v33 = vld [vmem:[#allocation6 + $0x620] sm:$0xff] }
 0x170   :  { %v527_v62 = vmax.f32 %v268_v45, %v511_v55  ;;  %v416_v2 = vadd.f32 %v415_v61, %v167_v49  ;;  %v417_v3 = vpop.f32.mrb[5].mxu0  ;;  %v529_v9 = vmax.f32 %v345_v52, %v513_v60  ;;  %v695_v45 = vld [vmem:[#allocation6 + $0x4c0] sm:$0xff]  ;;  %v712_v61 = vld [vmem:[#allocation6 + $0x548] sm:$0xff] }
 0x171   :  { %v528_v5 = vmax.f32 %v270_v51, %v512_v58  ;;  %v418_v10 = vadd.f32 %v417_v3, %v171_v54  ;;  %v530_v12 = vmax.f32 %v347_v56, %v514_v1  ;;  %v703_v51 = vld [vmem:[#allocation6 + $0x500] sm:$0xff]  ;;  %v9197_v55 = vcombine.low %v695_v45, %v699_v47  ;;  %v736_v34 = vld [vmem:[#allocation6 + $0x608] sm:$0xff] }
 0x172   :  { %v10809_v11 = vpack.c.bf16 %v527_v62, %v519_v57  ;;  %v507_v16 = vmul.f32 0.01, %v416_v2  ;;  %v10813_v21 = vpack.c.bf16 %v529_v9, %v521_v59  ;;  %v707_v52 = vld [vmem:[#allocation6 + $0x520] sm:$0xff]  ;;  %v716_v62 = vld [vmem:[#allocation6 + $0x568] sm:$0xff] }
 0x173   :  { %v10811_v20 = vpack.c.bf16 %v528_v5, %v520_v4  ;;  %v508_v25 = vmul.f32 0.01, %v418_v10  ;;  %v421_v26 = vpop.f32.mrb[6].mxu0  ;;  %v10815_v30 = vpack.c.bf16 %v530_v12, %v522_v0  ;;  %v9206_v57 = vcombine.high %v703_v51, %v707_v52  ;;  %v711_v59 = vld [vmem:[#allocation6 + $0x540] sm:$0xff]  ;;  %v720_v5 = vld [vmem:[#allocation6 + $0x588] sm:$0xff] }
 0x174   :  { %v422_v31 = vadd.f32 %v421_v26, %v167_v49  ;;  %v423_v32 = vpop.f32.mrb[7].mxu0  ;;  %v523_v37 = vmax.f32 %v416_v2, %v507_v16  ;;  %v700_v49 = vld [vmem:[#allocation6 + $0x4e8] sm:$0xff]  ;;  %v715_v60 = vld [vmem:[#allocation6 + $0x560] sm:$0xff]  ;;  %v9205_v63 = vcombine.low %v703_v51, %v707_v52  ;;  %v9216_v2 = vcombine.high %v712_v61, %v716_v62 }
 0x175   :  { %3647 = vmatprep.mubr.bf16.mxu0 %v10811_v20  ;;  %3819 = vmatprep.mubr.bf16.mxu1 %v10811_v20  ;;  %v424_v36 = vadd.f32 %v423_v32, %v171_v54  ;;  %v524_v41 = vmax.f32 %v418_v10, %v508_v25  ;;  %v9200_v50 = vcombine.high %v696_v48, %v700_v49  ;;  %v708_v54 = vld [vmem:[#allocation6 + $0x528] sm:$0xff]  ;;  %v719_v3 = vld [vmem:[#allocation6 + $0x580] sm:$0xff] }
 0x176   :  { %3648 = vmatmul.mubr.bf16.vlgmr.msra.gmra.mrb[8].mxu0 %v10809_v11  ;;  %3820 = vmatmul.mubr.bf16.vlgmr.msra.gmra.mrb[8].mxu1 %v10809_v11  ;;  %v515_v38 = vmul.f32 0.01, %v422_v31  ;;  %v9199_v56 = vcombine.low %v696_v48, %v700_v49  ;;  %v9208_v58 = vcombine.high %v704_v53, %v708_v54  ;;  %v9207_v0 = vcombine.low %v704_v53, %v708_v54  ;;  %v723_v4 = vld [vmem:[#allocation6 + $0x5a0] sm:$0xff]  ;;  %v728_v25 = vld [vmem:[#allocation6 + $0x5c8] sm:$0xff] }
 0x177   :  { %3659 = vmatpush1.bf16.msra.mxu0 %v9173_v18  ;;  %3831 = vmatpush1.bf16.msra.mxu1 %v9175_v19  ;;  %v516_v42 = vmul.f32 0.01, %v424_v36  ;;  %v9198_v19 = vcombine.high %v695_v45, %v699_v47  ;;  %v9214_v1 = vcombine.high %v711_v59, %v715_v60  ;;  %v9213_v7 = vcombine.low %v711_v59, %v715_v60  ;;  %v727_v12 = vld [vmem:[#allocation6 + $0x5c0] sm:$0xff]  ;;  %v732_v26 = vld [vmem:[#allocation6 + $0x5e8] sm:$0xff] }
 0x178   :  { %3660 = vmatprep.subr.bf16.mxu0 %v9182_v27  ;;  %3832 = vmatprep.subr.bf16.mxu1 %v9184_v28  ;;  %v531_v46 = vmax.f32 %v422_v31, %v515_v38  ;;  %v9215_v8 = vcombine.low %v712_v61, %v716_v62  ;;  %v9222_v9 = vcombine.high %v719_v3, %v723_v4  ;;  %v731_v16 = vld [vmem:[#allocation6 + $0x5e0] sm:$0xff]  ;;  %v740_v35 = vld [vmem:[#allocation6 + $0x628] sm:$0xff] }
 0x179   :  { %3690 = vmatprep.mubr.bf16.mxu0 %v10815_v30  ;;  %3862 = vmatprep.mubr.bf16.mxu1 %v10815_v30  ;;  %v532_v13 = vmax.f32 %v424_v36, %v516_v42  ;;  %v9224_v10 = vcombine.high %v720_v5, %v724_v6  ;;  %v9221_v27 = vcombine.low %v719_v3, %v723_v4  ;;  %v735_v32 = vld [vmem:[#allocation6 + $0x600] sm:$0xff]  ;;  %v744_v42 = vld [vmem:[#allocation6 + $0x648] sm:$0xff] }
 0x17a   :  { %v10829_v14 = vpack.c.bf16 %v531_v46, %v523_v37  ;;  %v9223_v28 = vcombine.low %v720_v5, %v724_v6  ;;  %v9230_v29 = vcombine.high %v727_v12, %v731_v16  ;;  %v9232_v31 = vcombine.high %v728_v25, %v732_v26  ;;  %v751_v48 = vld [vmem:[#allocation6 + $0x680] sm:$0xff]  ;;  %v760_v54 = vld [vmem:[#allocation6 + $0x6c8] sm:$0xff]  ;;  %v492_v6 = vpop.f32.mrb[4].mxu1 }
 0x17b   :  { %3661 = vmatpush1.bf16.msra.mxu0 %v9181_v39  ;;  %3833 = vmatpush1.bf16.msra.mxu1 %v9183_v40  ;;  %v10831_v18 = vpack.c.bf16 %v532_v13, %v524_v41  ;;  %v9229_v36 = vcombine.low %v727_v12, %v731_v16  ;;  %v9231_v37 = vcombine.low %v728_v25, %v732_v26  ;;  %v743_v40 = vld [vmem:[#allocation6 + $0x640] sm:$0xff]  ;;  %v752_v13 = vld [vmem:[#allocation6 + $0x688] sm:$0xff]  ;;  %v174_v5 = vsub.s32 6, %v10790_v22  ;;  %v494_v26 = vpop.f32.mrb[5].mxu1 }
 0x17c   :  { %3662 = vmatprep.subr.bf16.mxu0 %v9190_v43  ;;  %3834 = vmatprep.subr.bf16.mxu1 %v9192_v44  ;;  %v9238_v38 = vcombine.high %v735_v32, %v739_v33  ;;  %v9240_v39 = vcombine.high %v736_v34, %v740_v35  ;;  %v747_v41 = vld [vmem:[#allocation6 + $0x660] sm:$0xff]  ;;  %v748_v43 = vld [vmem:[#allocation6 + $0x668] sm:$0xff]  ;;  %v9237_v44 = vcombine.low %v735_v32, %v739_v33  ;;  %v178_v25 = vsub.s32 7, %v10790_v22  ;;  %v498_v32 = vpop.f32.mrb[6].mxu1 }
 0x17d   :  { %v9239_v45 = vcombine.low %v736_v34, %v740_v35  ;;  %v9246_v46 = vcombine.high %v743_v40, %v747_v41  ;;  %v9248_v47 = vcombine.high %v744_v42, %v748_v43  ;;  %v755_v49 = vld [vmem:[#allocation6 + $0x6a0] sm:$0xff]  ;;  %v768_v62 = vld [vmem:[#allocation6 + $0x708] sm:$0xff] }
 0x17e   :  { %v759_v52 = vld [vmem:[#allocation6 + $0x6c0] sm:$0xff]  ;;  %v784_v34 = vld [vmem:[#allocation6 + $0x788] sm:$0xff] }
 0x17f   :  { %3663 = vmatpush1.bf16.msra.mxu0 %v9189_v15  ;;  %3835 = vmatpush1.bf16.msra.mxu1 %v9191_v17  ;;  %v756_v15 = vld [vmem:[#allocation6 + $0x6a8] sm:$0xff]  ;;  %v9245_v17 = vcombine.low %v743_v40, %v747_v41  ;;  %v763_v53 = vld [vmem:[#allocation6 + $0x6e0] sm:$0xff] }
 0x180   :  { %3664 = vmatprep.subr.bf16.mxu0 %v9198_v19  ;;  %3836 = vmatprep.subr.bf16.mxu1 %v9200_v50  ;;  %v9247_v19 = vcombine.low %v744_v42, %v748_v43  ;;  %v9254_v50 = vcombine.high %v751_v48, %v755_v49  ;;  %v9256_v51 = vcombine.high %v752_v13, %v756_v15  ;;  %v767_v60 = vld [vmem:[#allocation6 + $0x700] sm:$0xff]  ;;  %v788_v35 = vld [vmem:[#allocation6 + $0x7a8] sm:$0xff] }
 0x181   :  { %v771_v61 = vld [vmem:[#allocation6 + $0x720] sm:$0xff] }
 0x182   :  { %v775_v4 = vld [vmem:[#allocation6 + $0x740] sm:$0xff]  ;;  %v9269_v12 = vcombine.low %v767_v60, %v771_v61 }
 0x183   :  { %3665 = vmatpush1.bf16.msra.mxu0 %v9197_v55  ;;  %3837 = vmatpush1.bf16.msra.mxu1 %v9199_v56  ;;  %v764_v55 = vld [vmem:[#allocation6 + $0x6e8] sm:$0xff]  ;;  %v9253_v56 = vcombine.low %v751_v48, %v755_v49  ;;  %v787_v33 = vld [vmem:[#allocation6 + $0x7a0] sm:$0xff] }
 0x184   :  { %3666 = vmatprep.subr.bf16.mxu0 %v9206_v57  ;;  %3838 = vmatprep.subr.bf16.mxu1 %v9208_v58  ;;  %v9255_v57 = vcombine.low %v752_v13, %v756_v15  ;;  %v9262_v58 = vcombine.high %v759_v52, %v763_v53  ;;  %v9264_v59 = vcombine.high %v760_v54, %v764_v55  ;;  %v795_v48 = vld [vmem:[#allocation6 + $0x7e0] sm:$0xff]  ;;  %v792_v13 = vld [vmem:[#allocation6 + $0x7c8] sm:$0xff] }
 0x185   :  { %v796_v15 = vld [vmem:[#allocation6 + $0x7e8] sm:$0xff] }
 0x187   :  { %3667 = vmatpush1.bf16.msra.mxu0 %v9205_v63  ;;  %3839 = vmatpush1.bf16.msra.mxu1 %v9207_v0  ;;  %v772_v63 = vld [vmem:[#allocation6 + $0x728] sm:$0xff]  ;;  %v9261_v0 = vcombine.low %v759_v52, %v763_v53 }
 0x188   :  { %3668 = vmatprep.subr.bf16.mxu0 %v9214_v1  ;;  %3840 = vmatprep.subr.bf16.mxu1 %v9216_v2  ;;  %v9263_v1 = vcombine.low %v760_v54, %v764_v55  ;;  %v9270_v2 = vcombine.high %v767_v60, %v771_v61  ;;  %v9272_v3 = vcombine.high %v768_v62, %v772_v63  ;;  %v804_v60 = vld [vmem:[#allocation6 + $0x828] sm:$0xff] }
 0x189   :  { %v9271_v16 = vcombine.low %v768_v62, %v772_v63  ;;  %v9295_v63 = vcombine.low %v792_v13, %v796_v15 }
 0x18b   :  { %3669 = vmatpush1.bf16.msra.mxu0 %v9213_v7  ;;  %3841 = vmatpush1.bf16.msra.mxu1 %v9215_v8  ;;  %v779_v7 = vld [vmem:[#allocation6 + $0x760] sm:$0xff]  ;;  %v776_v8 = vld [vmem:[#allocation6 + $0x748] sm:$0xff] }
 0x18c   :  { %3670 = vmatprep.subr.bf16.mxu0 %v9222_v9  ;;  %3842 = vmatprep.subr.bf16.mxu1 %v9224_v10  ;;  %v780_v9 = vld [vmem:[#allocation6 + $0x768] sm:$0xff]  ;;  %v175_v10 = vrot.slane %v10795_v24, %v174_v5 }
 0x18d   :  { %v9279_v41 = vcombine.low %v776_v8, %v780_v9  ;;  %v812_v5 = vld [vmem:[#allocation6 + $0x868] sm:$0xff] }
 0x18f   :  { %3671 = vmatpush1.bf16.msra.mxu0 %v9221_v27  ;;  %3843 = vmatpush1.bf16.msra.mxu1 %v9223_v28  ;;  %v9278_v27 = vcombine.high %v775_v4, %v779_v7  ;;  %v9280_v28 = vcombine.high %v776_v8, %v780_v9 }
 0x190   :  { %3672 = vmatprep.subr.bf16.mxu0 %v9230_v29  ;;  %3844 = vmatprep.subr.bf16.mxu1 %v9232_v31  ;;  %v783_v29 = vld [vmem:[#allocation6 + $0x780] sm:$0xff]  ;;  %v493_v31 = vadd.f32 %v492_v6, %v175_v10 }
 0x192   :  { %v509_v40 = vmul.f32 0.01, %v493_v31 }
 0x193   :  { %3673 = vmatpush1.bf16.msra.mxu0 %v9229_v36  ;;  %3845 = vmatpush1.bf16.msra.mxu1 %v9231_v37  ;;  %v179_v36 = vrot.slane %v10795_v24, %v178_v25  ;;  %v499_v37 = vadd.f32 %v498_v32, %v175_v10  ;;  %v815_v10 = vld [vmem:[#allocation6 + $0x880] sm:$0xff]  ;;  %v820_v25 = vld [vmem:[#allocation6 + $0x8a8] sm:$0xff] }
 0x194   :  { %3674 = vmatprep.subr.bf16.mxu0 %v9238_v38  ;;  %3846 = vmatprep.subr.bf16.mxu1 %v9240_v39  ;;  %v500_v38 = vpop.f32.mrb[7].mxu1  ;;  %v9277_v39 = vcombine.low %v775_v4, %v779_v7  ;;  %v525_v49 = vmax.f32 %v493_v31, %v509_v40  ;;  %v808_v4 = vld [vmem:[#allocation6 + $0x848] sm:$0xff]  ;;  %v823_v31 = vld [vmem:[#allocation6 + $0x8c0] sm:$0xff] }
 0x195   :  { %v495_v42 = vadd.f32 %v494_v26, %v179_v36  ;;  %v517_v43 = vmul.f32 0.01, %v499_v37  ;;  %v9312_v9 = vcombine.high %v808_v4, %v812_v5  ;;  %v827_v32 = vld [vmem:[#allocation6 + $0x8e0] sm:$0xff] }
 0x196   :  { %v835_v40 = vld [vmem:[#allocation6 + $0x920] sm:$0xff] }
 0x197   :  { %3675 = vmatpush1.bf16.msra.mxu0 %v9237_v44  ;;  %3847 = vmatpush1.bf16.msra.mxu1 %v9239_v45  ;;  %v501_v44 = vadd.f32 %v500_v38, %v179_v36  ;;  %v9286_v45 = vcombine.high %v783_v29, %v787_v33  ;;  %v510_v24 = vmul.f32 0.01, %v495_v42 }
 0x198   :  { %3676 = vmatprep.subr.bf16.mxu0 %v9246_v46  ;;  %3848 = vmatprep.subr.bf16.mxu1 %v9248_v47  ;;  %v9288_v46 = vcombine.high %v784_v34, %v788_v35  ;;  %v791_v47 = vld [vmem:[#allocation6 + $0x7c0] sm:$0xff] }
 0x199   :  { %v526_v52 = vmax.f32 %v495_v42, %v510_v24  ;;  %v9294_v55 = vcombine.high %v791_v47, %v795_v48  ;;  %v9293_v62 = vcombine.low %v791_v47, %v795_v48  ;;  %v836_v42 = vld [vmem:[#allocation6 + $0x928] sm:$0xff]  ;;  %v839_v47 = vld [vmem:[#allocation6 + $0x940] sm:$0xff] }
 0x19a   :  { %v843_v48 = vld [vmem:[#allocation6 + $0x960] sm:$0xff] }
 0x19b   :  { %3677 = vmatpush1.bf16.msra.mxu0 %v9245_v17  ;;  %3849 = vmatpush1.bf16.msra.mxu1 %v9247_v19  ;;  %v533_v17 = vmax.f32 %v499_v37, %v517_v43  ;;  %v518_v19 = vmul.f32 0.01, %v501_v44  ;;  %v9326_v37 = vcombine.high %v823_v31, %v827_v32  ;;  %v9325_v43 = vcombine.low %v823_v31, %v827_v32 }
 0x19c   :  { %3678 = vmatprep.subr.bf16.mxu0 %v9254_v50  ;;  %3850 = vmatprep.subr.bf16.mxu1 %v9256_v51  ;;  %v9285_v50 = vcombine.low %v783_v29, %v787_v33  ;;  %v9287_v51 = vcombine.low %v784_v34, %v788_v35  ;;  %v824_v33 = vld [vmem:[#allocation6 + $0x8c8] sm:$0xff] }
 0x19d   :  { %v10837_v53 = vpack.c.bf16 %v533_v17, %v525_v49  ;;  %v534_v54 = vmax.f32 %v501_v44, %v518_v19  ;;  %v828_v34 = vld [vmem:[#allocation6 + $0x8e8] sm:$0xff]  ;;  %v9342_v17 = vcombine.high %v839_v47, %v843_v48 }
 0x19e   :  { %v9328_v38 = vcombine.high %v824_v33, %v828_v34  ;;  %v9327_v44 = vcombine.low %v824_v33, %v828_v34  ;;  %v840_v49 = vld [vmem:[#allocation6 + $0x948] sm:$0xff]  ;;  %v879_v33 = vld [vmem:[#allocation6 + $0xa80] sm:$0xff] }
 0x19f   :  { %3679 = vmatpush1.bf16.msra.mxu0 %v9253_v56  ;;  %3851 = vmatpush1.bf16.msra.mxu1 %v9255_v57  ;;  %v9296_v56 = vcombine.high %v792_v13, %v796_v15  ;;  %v799_v57 = vld [vmem:[#allocation6 + $0x800] sm:$0xff]  ;;  %v10839_v61 = vpack.c.bf16 %v534_v54, %v526_v52  ;;  %v844_v13 = vld [vmem:[#allocation6 + $0x968] sm:$0xff] }
 0x1a0   :  { %3680 = vmatprep.subr.bf16.mxu0 %v9262_v58  ;;  %3852 = vmatprep.subr.bf16.mxu1 %v9264_v59  ;;  %v803_v58 = vld [vmem:[#allocation6 + $0x820] sm:$0xff]  ;;  %v800_v59 = vld [vmem:[#allocation6 + $0x808] sm:$0xff]  ;;  %v9344_v19 = vcombine.high %v840_v49, %v844_v13 }
 0x1a1   :  { %v9301_v6 = vcombine.low %v799_v57, %v803_v58  ;;  %v9303_v7 = vcombine.low %v800_v59, %v804_v60  ;;  %v848_v52 = vld [vmem:[#allocation6 + $0x988] sm:$0xff]  ;;  %v883_v34 = vld [vmem:[#allocation6 + $0xaa0] sm:$0xff] }
 0x1a2   :  { %v852_v54 = vld [vmem:[#allocation6 + $0x9a8] sm:$0xff] }
 0x1a3   :  { %3681 = vmatpush1.bf16.msra.mxu0 %v9261_v0  ;;  %3853 = vmatpush1.bf16.msra.mxu1 %v9263_v1  ;;  %v9302_v0 = vcombine.high %v799_v57, %v803_v58  ;;  %v9304_v1 = vcombine.high %v800_v59, %v804_v60  ;;  %v9352_v58 = vcombine.high %v848_v52, %v852_v54  ;;  %v855_v59 = vld [vmem:[#allocation6 + $0x9c0] sm:$0xff] }
 0x1a4   :  { %3682 = vmatprep.subr.bf16.mxu0 %v9270_v2  ;;  %3854 = vmatprep.subr.bf16.mxu1 %v9272_v3  ;;  %v807_v2 = vld [vmem:[#allocation6 + $0x840] sm:$0xff] }
 0x1a5   :  { %v811_v3 = vld [vmem:[#allocation6 + $0x860] sm:$0xff] }
 0x1a6   :  { %v9310_v8 = vcombine.high %v807_v2, %v811_v3  ;;  %v9309_v26 = vcombine.low %v807_v2, %v811_v3  ;;  %v859_v60 = vld [vmem:[#allocation6 + $0x9e0] sm:$0xff] }
 0x1a7   :  { %3683 = vmatpush1.bf16.msra.mxu0 %v9269_v12  ;;  %3855 = vmatpush1.bf16.msra.mxu1 %v9271_v16  ;;  %v819_v12 = vld [vmem:[#allocation6 + $0x8a0] sm:$0xff]  ;;  %v816_v16 = vld [vmem:[#allocation6 + $0x888] sm:$0xff]  ;;  %v9358_v2 = vcombine.high %v855_v59, %v859_v60 }
 0x1a8   :  { %3684 = vmatprep.subr.bf16.mxu0 %v9278_v27  ;;  %3856 = vmatprep.subr.bf16.mxu1 %v9280_v28  ;;  %v9311_v27 = vcombine.low %v808_v4, %v812_v5  ;;  %v9318_v28 = vcombine.high %v815_v10, %v819_v12  ;;  %v9320_v29 = vcombine.high %v816_v16, %v820_v25  ;;  %v863_v4 = vld [vmem:[#allocation6 + $0xa00] sm:$0xff] }
 0x1a9   :  { %v9317_v35 = vcombine.low %v815_v10, %v819_v12  ;;  %v9319_v36 = vcombine.low %v816_v16, %v820_v25  ;;  %v867_v5 = vld [vmem:[#allocation6 + $0xa20] sm:$0xff] }
 0x1aa   :  { %v9366_v10 = vcombine.high %v863_v4, %v867_v5  ;;  %v871_v16 = vld [vmem:[#allocation6 + $0xa40] sm:$0xff] }
 0x1ab   :  { %3685 = vmatpush1.bf16.msra.mxu0 %v9277_v39  ;;  %3857 = vmatpush1.bf16.msra.mxu1 %v9279_v41  ;;  %v831_v39 = vld [vmem:[#allocation6 + $0x900] sm:$0xff]  ;;  %v832_v41 = vld [vmem:[#allocation6 + $0x908] sm:$0xff] }
 0x1ac   :  { %3686 = vmatprep.subr.bf16.mxu0 %v9286_v45  ;;  %3858 = vmatprep.subr.bf16.mxu1 %v9288_v46  ;;  %v9334_v45 = vcombine.high %v831_v39, %v835_v40  ;;  %v9336_v46 = vcombine.high %v832_v41, %v836_v42  ;;  %v9333_v15 = vcombine.low %v831_v39, %v835_v40  ;;  %v875_v25 = vld [vmem:[#allocation6 + $0xa60] sm:$0xff] }
 0x1ad   :  { %v9335_v24 = vcombine.low %v832_v41, %v836_v42  ;;  %v9374_v31 = vcombine.high %v871_v16, %v875_v25  ;;  %v9382_v39 = vcombine.high %v879_v33, %v883_v34  ;;  %v887_v41 = vld [vmem:[#allocation6 + $0xac0] sm:$0xff] }
 0x1ae   :  { %v891_v42 = vld [vmem:[#allocation6 + $0xae0] sm:$0xff] }
 0x1af   :  { %3687 = vmatpush1.bf16.msra.mxu0 %v9285_v50  ;;  %3859 = vmatpush1.bf16.msra.mxu1 %v9287_v51  ;;  %v847_v50 = vld [vmem:[#allocation6 + $0x980] sm:$0xff] }
 0x1b0   :  { %3688 = vmatprep.subr.bf16.mxu0 %v9294_v55  ;;  %3860 = vmatprep.subr.bf16.mxu1 %v9296_v56  ;;  %v851_v51 = vld [vmem:[#allocation6 + $0x9a0] sm:$0xff]  ;;  %v9341_v55 = vcombine.low %v839_v47, %v843_v48  ;;  %v9343_v56 = vcombine.low %v840_v49, %v844_v13  ;;  %v9390_v47 = vcombine.high %v887_v41, %v891_v42 }
 0x1b1   :  { %v9350_v57 = vcombine.high %v847_v50, %v851_v51  ;;  %v895_v49 = vld [vmem:[#allocation6 + $0xb00] sm:$0xff] }
 0x1b2   :  { %v899_v13 = vld [vmem:[#allocation6 + $0xb20] sm:$0xff] }
 0x1b3   :  { %3689 = vmatpush1.bf16.msra.mxu0 %v9293_v62  ;;  %3861 = vmatpush1.bf16.msra.mxu1 %v9295_v63  ;;  %v856_v62 = vld [vmem:[#allocation6 + $0x9c8] sm:$0xff] }
 0x1b4   :  { %3701 = vmatprep.subr.bf16.mxu0 %v9302_v0  ;;  %3873 = vmatprep.subr.bf16.mxu1 %v9304_v1  ;;  %v860_v63 = vld [vmem:[#allocation6 + $0x9e8] sm:$0xff]  ;;  %v9349_v0 = vcombine.low %v847_v50, %v851_v51  ;;  %v9351_v1 = vcombine.low %v848_v52, %v852_v54  ;;  %v9398_v50 = vcombine.high %v895_v49, %v899_v13  ;;  %v903_v52 = vld [vmem:[#allocation6 + $0xb40] sm:$0xff] }
 0x1b5   :  { %v9360_v3 = vcombine.high %v856_v62, %v860_v63  ;;  %v907_v54 = vld [vmem:[#allocation6 + $0xb60] sm:$0xff] }
 0x1b6   :  { %3691 = vmatmul.mubr.bf16.vlgmr.msra.gmra.mrb[8].mxu0 %v10813_v21  ;;  %3863 = vmatmul.mubr.bf16.vlgmr.msra.gmra.mrb[8].mxu1 %v10813_v21 }
 0x1b7   :  { %3702 = vmatpush1.bf16.msra.mxu0 %v9301_v6  ;;  %3874 = vmatpush1.bf16.msra.mxu1 %v9303_v7  ;;  %v864_v6 = vld [vmem:[#allocation6 + $0xa08] sm:$0xff] }
 0x1b8   :  { %3703 = vmatprep.subr.bf16.mxu0 %v9310_v8  ;;  %3875 = vmatprep.subr.bf16.mxu1 %v9312_v9  ;;  %v868_v7 = vld [vmem:[#allocation6 + $0xa28] sm:$0xff]  ;;  %v9357_v8 = vcombine.low %v855_v59, %v859_v60  ;;  %v9359_v9 = vcombine.low %v856_v62, %v860_v63  ;;  %v9406_v59 = vcombine.high %v903_v52, %v907_v54  ;;  %v911_v62 = vld [vmem:[#allocation6 + $0xb80] sm:$0xff] }
 0x1b9   :  { %3733 = vmatprep.mubr.bf16.mxu0 %v10831_v18  ;;  %3905 = vmatprep.mubr.bf16.mxu1 %v10831_v18  ;;  %v9368_v12 = vcombine.high %v864_v6, %v868_v7  ;;  %v915_v63 = vld [vmem:[#allocation6 + $0xba0] sm:$0xff] }
 0x1bb   :  { %3704 = vmatpush1.bf16.msra.mxu0 %v9309_v26  ;;  %3876 = vmatpush1.bf16.msra.mxu1 %v9311_v27  ;;  %v872_v26 = vld [vmem:[#allocation6 + $0xa48] sm:$0xff] }
 0x1bc   :  { %3705 = vmatprep.subr.bf16.mxu0 %v9318_v28  ;;  %3877 = vmatprep.subr.bf16.mxu1 %v9320_v29  ;;  %v876_v27 = vld [vmem:[#allocation6 + $0xa68] sm:$0xff]  ;;  %v9365_v28 = vcombine.low %v863_v4, %v867_v5  ;;  %v9367_v29 = vcombine.low %v864_v6, %v868_v7  ;;  %v9414_v4 = vcombine.high %v911_v62, %v915_v63  ;;  %v919_v6 = vld [vmem:[#allocation6 + $0xbc0] sm:$0xff] }
 0x1bd   :  { %v9376_v32 = vcombine.high %v872_v26, %v876_v27  ;;  %v923_v7 = vld [vmem:[#allocation6 + $0xbe0] sm:$0xff] }
 0x1bf   :  { %3706 = vmatpush1.bf16.msra.mxu0 %v9317_v35  ;;  %3878 = vmatpush1.bf16.msra.mxu1 %v9319_v36  ;;  %v880_v35 = vld [vmem:[#allocation6 + $0xa88] sm:$0xff] }
 0x1c0   :  { %3707 = vmatprep.subr.bf16.mxu0 %v9326_v37  ;;  %3879 = vmatprep.subr.bf16.mxu1 %v9328_v38  ;;  %v884_v36 = vld [vmem:[#allocation6 + $0xaa8] sm:$0xff]  ;;  %v9373_v37 = vcombine.low %v871_v16, %v875_v25  ;;  %v9375_v38 = vcombine.low %v872_v26, %v876_v27  ;;  %v9422_v16 = vcombine.high %v919_v6, %v923_v7  ;;  %v927_v26 = vld [vmem:[#allocation6 + $0xc00] sm:$0xff] }
 0x1c1   :  { %v9384_v40 = vcombine.high %v880_v35, %v884_v36  ;;  %v931_v27 = vld [vmem:[#allocation6 + $0xc20] sm:$0xff] }
 0x1c3   :  { %3708 = vmatpush1.bf16.msra.mxu0 %v9325_v43  ;;  %3880 = vmatpush1.bf16.msra.mxu1 %v9327_v44  ;;  %v888_v43 = vld [vmem:[#allocation6 + $0xac8] sm:$0xff] }
 0x1c4   :  { %3709 = vmatprep.subr.bf16.mxu0 %v9334_v45  ;;  %3881 = vmatprep.subr.bf16.mxu1 %v9336_v46  ;;  %v892_v44 = vld [vmem:[#allocation6 + $0xae8] sm:$0xff]  ;;  %v9381_v45 = vcombine.low %v879_v33, %v883_v34  ;;  %v9383_v46 = vcombine.low %v880_v35, %v884_v36  ;;  %v9430_v33 = vcombine.high %v927_v26, %v931_v27  ;;  %v935_v35 = vld [vmem:[#allocation6 + $0xc40] sm:$0xff] }
 0x1c5   :  { %v9392_v48 = vcombine.high %v888_v43, %v892_v44  ;;  %v939_v36 = vld [vmem:[#allocation6 + $0xc60] sm:$0xff] }
 0x1c7   :  { %3710 = vmatpush1.bf16.msra.mxu0 %v9333_v15  ;;  %3882 = vmatpush1.bf16.msra.mxu1 %v9335_v24  ;;  %v896_v15 = vld [vmem:[#allocation6 + $0xb08] sm:$0xff] }
 0x1c8   :  { %3711 = vmatprep.subr.bf16.mxu0 %v9342_v17  ;;  %3883 = vmatprep.subr.bf16.mxu1 %v9344_v19  ;;  %v900_v24 = vld [vmem:[#allocation6 + $0xb28] sm:$0xff]  ;;  %v9389_v17 = vcombine.low %v887_v41, %v891_v42  ;;  %v9391_v19 = vcombine.low %v888_v43, %v892_v44  ;;  %v9438_v41 = vcombine.high %v935_v35, %v939_v36  ;;  %v943_v43 = vld [vmem:[#allocation6 + $0xc80] sm:$0xff] }
 0x1c9   :  { %v9400_v51 = vcombine.high %v896_v15, %v900_v24  ;;  %v947_v44 = vld [vmem:[#allocation6 + $0xca0] sm:$0xff] }
 0x1cb   :  { %3712 = vmatpush1.bf16.msra.mxu0 %v9341_v55  ;;  %3884 = vmatpush1.bf16.msra.mxu1 %v9343_v56  ;;  %v904_v55 = vld [vmem:[#allocation6 + $0xb48] sm:$0xff] }
 0x1cc   :  { %3713 = vmatprep.subr.bf16.mxu0 %v9350_v57  ;;  %3885 = vmatprep.subr.bf16.mxu1 %v9352_v58  ;;  %v908_v56 = vld [vmem:[#allocation6 + $0xb68] sm:$0xff]  ;;  %v9397_v57 = vcombine.low %v895_v49, %v899_v13  ;;  %v9399_v58 = vcombine.low %v896_v15, %v900_v24  ;;  %v9446_v49 = vcombine.high %v943_v43, %v947_v44  ;;  %v951_v15 = vld [vmem:[#allocation6 + $0xcc0] sm:$0xff] }
 0x1cd   :  { %v9408_v60 = vcombine.high %v904_v55, %v908_v56  ;;  %v955_v24 = vld [vmem:[#allocation6 + $0xce0] sm:$0xff] }
 0x1cf   :  { %3714 = vmatpush1.bf16.msra.mxu0 %v9349_v0  ;;  %3886 = vmatpush1.bf16.msra.mxu1 %v9351_v1  ;;  %v912_v0 = vld [vmem:[#allocation6 + $0xb88] sm:$0xff] }
 0x1d0   :  { %3715 = vmatprep.subr.bf16.mxu0 %v9358_v2  ;;  %3887 = vmatprep.subr.bf16.mxu1 %v9360_v3  ;;  %v916_v1 = vld [vmem:[#allocation6 + $0xba8] sm:$0xff]  ;;  %v9405_v2 = vcombine.low %v903_v52, %v907_v54  ;;  %v9407_v3 = vcombine.low %v904_v55, %v908_v56  ;;  %v9454_v52 = vcombine.high %v951_v15, %v955_v24  ;;  %v959_v55 = vld [vmem:[#allocation6 + $0xd00] sm:$0xff] }
 0x1d1   :  { %v9416_v5 = vcombine.high %v912_v0, %v916_v1  ;;  %v963_v56 = vld [vmem:[#allocation6 + $0xd20] sm:$0xff] }
 0x1d3   :  { %3716 = vmatpush1.bf16.msra.mxu0 %v9357_v8  ;;  %3888 = vmatpush1.bf16.msra.mxu1 %v9359_v9  ;;  %v920_v8 = vld [vmem:[#allocation6 + $0xbc8] sm:$0xff] }
 0x1d4   :  { %3717 = vmatprep.subr.bf16.mxu0 %v9366_v10  ;;  %3889 = vmatprep.subr.bf16.mxu1 %v9368_v12  ;;  %v924_v9 = vld [vmem:[#allocation6 + $0xbe8] sm:$0xff]  ;;  %v9413_v10 = vcombine.low %v911_v62, %v915_v63  ;;  %v9415_v12 = vcombine.low %v912_v0, %v916_v1  ;;  %v9462_v62 = vcombine.high %v959_v55, %v963_v56  ;;  %v967_v0 = vld [vmem:[#allocation6 + $0xd40] sm:$0xff] }
 0x1d5   :  { %v9424_v25 = vcombine.high %v920_v8, %v924_v9  ;;  %v971_v1 = vld [vmem:[#allocation6 + $0xd60] sm:$0xff] }
 0x1d7   :  { %3718 = vmatpush1.bf16.msra.mxu0 %v9365_v28  ;;  %3890 = vmatpush1.bf16.msra.mxu1 %v9367_v29  ;;  %v928_v28 = vld [vmem:[#allocation6 + $0xc08] sm:$0xff] }
 0x1d8   :  { %3719 = vmatprep.subr.bf16.mxu0 %v9374_v31  ;;  %3891 = vmatprep.subr.bf16.mxu1 %v9376_v32  ;;  %v932_v29 = vld [vmem:[#allocation6 + $0xc28] sm:$0xff]  ;;  %v9421_v31 = vcombine.low %v919_v6, %v923_v7  ;;  %v9423_v32 = vcombine.low %v920_v8, %v924_v9  ;;  %v9470_v6 = vcombine.high %v967_v0, %v971_v1  ;;  %v975_v8 = vld [vmem:[#allocation6 + $0xd80] sm:$0xff] }
 0x1d9   :  { %v9432_v34 = vcombine.high %v928_v28, %v932_v29  ;;  %v979_v9 = vld [vmem:[#allocation6 + $0xda0] sm:$0xff] }
 0x1db   :  { %3720 = vmatpush1.bf16.msra.mxu0 %v9373_v37  ;;  %3892 = vmatpush1.bf16.msra.mxu1 %v9375_v38  ;;  %v936_v37 = vld [vmem:[#allocation6 + $0xc48] sm:$0xff] }
 0x1dc   :  { %3721 = vmatprep.subr.bf16.mxu0 %v9382_v39  ;;  %3893 = vmatprep.subr.bf16.mxu1 %v9384_v40  ;;  %v940_v38 = vld [vmem:[#allocation6 + $0xc68] sm:$0xff]  ;;  %v9429_v39 = vcombine.low %v927_v26, %v931_v27  ;;  %v9431_v40 = vcombine.low %v928_v28, %v932_v29  ;;  %v9478_v26 = vcombine.high %v975_v8, %v979_v9  ;;  %v983_v28 = vld [vmem:[#allocation6 + $0xdc0] sm:$0xff] }
 0x1dd   :  { %v9440_v42 = vcombine.high %v936_v37, %v940_v38  ;;  %v987_v29 = vld [vmem:[#allocation6 + $0xde0] sm:$0xff] }
 0x1df   :  { %3722 = vmatpush1.bf16.msra.mxu0 %v9381_v45  ;;  %3894 = vmatpush1.bf16.msra.mxu1 %v9383_v46  ;;  %v944_v45 = vld [vmem:[#allocation6 + $0xc88] sm:$0xff] }
 0x1e0   :  { %3723 = vmatprep.subr.bf16.mxu0 %v9390_v47  ;;  %3895 = vmatprep.subr.bf16.mxu1 %v9392_v48  ;;  %v948_v46 = vld [vmem:[#allocation6 + $0xca8] sm:$0xff]  ;;  %v9437_v47 = vcombine.low %v935_v35, %v939_v36  ;;  %v9439_v48 = vcombine.low %v936_v37, %v940_v38  ;;  %v9486_v35 = vcombine.high %v983_v28, %v987_v29  ;;  %v991_v37 = vld [vmem:[#allocation6 + $0xe00] sm:$0xff] }
 0x1e1   :  { %v9448_v13 = vcombine.high %v944_v45, %v948_v46  ;;  %v995_v38 = vld [vmem:[#allocation6 + $0xe20] sm:$0xff] }
 0x1e3   :  { %3724 = vmatpush1.bf16.msra.mxu0 %v9389_v17  ;;  %3896 = vmatpush1.bf16.msra.mxu1 %v9391_v19  ;;  %v952_v17 = vld [vmem:[#allocation6 + $0xcc8] sm:$0xff] }
 0x1e4   :  { %3725 = vmatprep.subr.bf16.mxu0 %v9398_v50  ;;  %3897 = vmatprep.subr.bf16.mxu1 %v9400_v51  ;;  %v956_v19 = vld [vmem:[#allocation6 + $0xce8] sm:$0xff]  ;;  %v9445_v50 = vcombine.low %v943_v43, %v947_v44  ;;  %v9447_v51 = vcombine.low %v944_v45, %v948_v46  ;;  %v9494_v43 = vcombine.high %v991_v37, %v995_v38  ;;  %v999_v45 = vld [vmem:[#allocation6 + $0xe40] sm:$0xff] }
 0x1e5   :  { %v9456_v54 = vcombine.high %v952_v17, %v956_v19  ;;  %v1003_v46 = vld [vmem:[#allocation6 + $0xe60] sm:$0xff] }
 0x1e7   :  { %3726 = vmatpush1.bf16.msra.mxu0 %v9397_v57  ;;  %3898 = vmatpush1.bf16.msra.mxu1 %v9399_v58  ;;  %v960_v57 = vld [vmem:[#allocation6 + $0xd08] sm:$0xff] }
 0x1e8   :  { %3727 = vmatprep.subr.bf16.mxu0 %v9406_v59  ;;  %3899 = vmatprep.subr.bf16.mxu1 %v9408_v60  ;;  %v964_v58 = vld [vmem:[#allocation6 + $0xd28] sm:$0xff]  ;;  %v9453_v59 = vcombine.low %v951_v15, %v955_v24  ;;  %v9455_v60 = vcombine.low %v952_v17, %v956_v19  ;;  %v9502_v15 = vcombine.high %v999_v45, %v1003_v46  ;;  %v1007_v17 = vld [vmem:[#allocation6 + $0xe80] sm:$0xff] }
 0x1e9   :  { %v9464_v63 = vcombine.high %v960_v57, %v964_v58  ;;  %v1011_v19 = vld [vmem:[#allocation6 + $0xea0] sm:$0xff] }
 0x1eb   :  { %3728 = vmatpush1.bf16.msra.mxu0 %v9405_v2  ;;  %3900 = vmatpush1.bf16.msra.mxu1 %v9407_v3  ;;  %v968_v2 = vld [vmem:[#allocation6 + $0xd48] sm:$0xff] }
 0x1ec   :  { %3729 = vmatprep.subr.bf16.mxu0 %v9414_v4  ;;  %3901 = vmatprep.subr.bf16.mxu1 %v9416_v5  ;;  %v972_v3 = vld [vmem:[#allocation6 + $0xd68] sm:$0xff]  ;;  %v9461_v4 = vcombine.low %v959_v55, %v963_v56  ;;  %v9463_v5 = vcombine.low %v960_v57, %v964_v58  ;;  %v9510_v55 = vcombine.high %v1007_v17, %v1011_v19  ;;  %v1015_v57 = vld [vmem:[#allocation6 + $0xec0] sm:$0xff] }
 0x1ed   :  { %v9472_v7 = vcombine.high %v968_v2, %v972_v3  ;;  %v1019_v58 = vld [vmem:[#allocation6 + $0xee0] sm:$0xff] }
 0x1ef   :  { %3730 = vmatpush1.bf16.msra.mxu0 %v9413_v10  ;;  %3902 = vmatpush1.bf16.msra.mxu1 %v9415_v12  ;;  %v976_v10 = vld [vmem:[#allocation6 + $0xd88] sm:$0xff] }
 0x1f0   :  { %3731 = vmatprep.subr.bf16.mxu0 %v9422_v16  ;;  %3903 = vmatprep.subr.bf16.mxu1 %v9424_v25  ;;  %v980_v12 = vld [vmem:[#allocation6 + $0xda8] sm:$0xff]  ;;  %v9469_v16 = vcombine.low %v967_v0, %v971_v1  ;;  %v9471_v25 = vcombine.low %v968_v2, %v972_v3  ;;  %v9518_v0 = vcombine.high %v1015_v57, %v1019_v58  ;;  %v1023_v2 = vld [vmem:[#allocation6 + $0xf00] sm:$0xff] }
 0x1f1   :  { %v9480_v27 = vcombine.high %v976_v10, %v980_v12  ;;  %v1027_v3 = vld [vmem:[#allocation6 + $0xf20] sm:$0xff] }
 0x1f3   :  { %3732 = vmatpush1.bf16.msra.mxu0 %v9421_v31  ;;  %3904 = vmatpush1.bf16.msra.mxu1 %v9423_v32  ;;  %v984_v31 = vld [vmem:[#allocation6 + $0xdc8] sm:$0xff] }
 0x1f4   :  { %3744 = vmatprep.subr.bf16.mxu0 %v9430_v33  ;;  %3916 = vmatprep.subr.bf16.mxu1 %v9432_v34  ;;  %v988_v32 = vld [vmem:[#allocation6 + $0xde8] sm:$0xff]  ;;  %v9477_v33 = vcombine.low %v975_v8, %v979_v9  ;;  %v9479_v34 = vcombine.low %v976_v10, %v980_v12  ;;  %v9526_v8 = vcombine.high %v1023_v2, %v1027_v3  ;;  %v1031_v10 = vld [vmem:[#allocation6 + $0xf40] sm:$0xff] }
 0x1f5   :  { %v9488_v36 = vcombine.high %v984_v31, %v988_v32  ;;  %v1035_v12 = vld [vmem:[#allocation6 + $0xf60] sm:$0xff] }
 0x1f6   :  { %3734 = vmatmul.mubr.bf16.vlgmr.msra.gmra.mrb[8].mxu0 %v10829_v14  ;;  %3906 = vmatmul.mubr.bf16.vlgmr.msra.gmra.mrb[8].mxu1 %v10829_v14 }
 0x1f7   :  { %3745 = vmatpush1.bf16.msra.mxu0 %v9429_v39  ;;  %3917 = vmatpush1.bf16.msra.mxu1 %v9431_v40  ;;  %v992_v39 = vld [vmem:[#allocation6 + $0xe08] sm:$0xff] }
 0x1f8   :  { %3746 = vmatprep.subr.bf16.mxu0 %v9438_v41  ;;  %3918 = vmatprep.subr.bf16.mxu1 %v9440_v42  ;;  %v996_v40 = vld [vmem:[#allocation6 + $0xe28] sm:$0xff]  ;;  %v9485_v41 = vcombine.low %v983_v28, %v987_v29  ;;  %v9487_v42 = vcombine.low %v984_v31, %v988_v32  ;;  %v9534_v28 = vcombine.high %v1031_v10, %v1035_v12  ;;  %v1039_v31 = vld [vmem:[#allocation6 + $0xf80] sm:$0xff] }
 0x1f9   :  { %3776 = vmatprep.mubr.bf16.mxu0 %v10839_v61  ;;  %3948 = vmatprep.mubr.bf16.mxu1 %v10839_v61  ;;  %v9496_v44 = vcombine.high %v992_v39, %v996_v40  ;;  %v1043_v32 = vld [vmem:[#allocation6 + $0xfa0] sm:$0xff] }
 0x1fb   :  { %3747 = vmatpush1.bf16.msra.mxu0 %v9437_v47  ;;  %3919 = vmatpush1.bf16.msra.mxu1 %v9439_v48  ;;  %v1000_v47 = vld [vmem:[#allocation6 + $0xe48] sm:$0xff] }
 0x1fc   :  { %3748 = vmatprep.subr.bf16.mxu0 %v9446_v49  ;;  %3920 = vmatprep.subr.bf16.mxu1 %v9448_v13  ;;  %v1004_v48 = vld [vmem:[#allocation6 + $0xe68] sm:$0xff]  ;;  %v9493_v49 = vcombine.low %v991_v37, %v995_v38  ;;  %v9495_v13 = vcombine.low %v992_v39, %v996_v40  ;;  %v9542_v37 = vcombine.high %v1039_v31, %v1043_v32  ;;  %v1047_v39 = vld [vmem:[#allocation6 + $0xfc0] sm:$0xff] }
 0x1fd   :  { %v9504_v24 = vcombine.high %v1000_v47, %v1004_v48  ;;  %v1051_v40 = vld [vmem:[#allocation6 + $0xfe0] sm:$0xff] }
 0x1ff   :  { %3749 = vmatpush1.bf16.msra.mxu0 %v9445_v50  ;;  %3921 = vmatpush1.bf16.msra.mxu1 %v9447_v51  ;;  %v1008_v50 = vld [vmem:[#allocation6 + $0xe88] sm:$0xff] }
 0x200   :  { %3750 = vmatprep.subr.bf16.mxu0 %v9454_v52  ;;  %3922 = vmatprep.subr.bf16.mxu1 %v9456_v54  ;;  %v1012_v51 = vld [vmem:[#allocation6 + $0xea8] sm:$0xff]  ;;  %v9501_v52 = vcombine.low %v999_v45, %v1003_v46  ;;  %v9503_v54 = vcombine.low %v1000_v47, %v1004_v48  ;;  %v9550_v45 = vcombine.high %v1047_v39, %v1051_v40  ;;  %v545_v47 = vld [vmem:[#allocation6 + $0x10] sm:$0xff] }
 0x201   :  { %v9512_v56 = vcombine.high %v1008_v50, %v1012_v51  ;;  %v549_v48 = vld [vmem:[#allocation6 + $0x30] sm:$0xff] }
 0x203   :  { %3751 = vmatpush1.bf16.msra.mxu0 %v9453_v59  ;;  %3923 = vmatpush1.bf16.msra.mxu1 %v9455_v60  ;;  %v1016_v59 = vld [vmem:[#allocation6 + $0xec8] sm:$0xff] }
 0x204   :  { %3752 = vmatprep.subr.bf16.mxu0 %v9462_v62  ;;  %3924 = vmatprep.subr.bf16.mxu1 %v9464_v63  ;;  %v1020_v60 = vld [vmem:[#allocation6 + $0xee8] sm:$0xff]  ;;  %v9509_v62 = vcombine.low %v1007_v17, %v1011_v19  ;;  %v9511_v63 = vcombine.low %v1008_v50, %v1012_v51  ;;  %v9050_v17 = vcombine.high %v545_v47, %v549_v48  ;;  %v553_v50 = vld [vmem:[#allocation6 + $0x50] sm:$0xff] }
 0x205   :  { %v9520_v1 = vcombine.high %v1016_v59, %v1020_v60  ;;  %v557_v51 = vld [vmem:[#allocation6 + $0x70] sm:$0xff] }
 0x207   :  { %3753 = vmatpush1.bf16.msra.mxu0 %v9461_v4  ;;  %3925 = vmatpush1.bf16.msra.mxu1 %v9463_v5  ;;  %v1024_v4 = vld [vmem:[#allocation6 + $0xf08] sm:$0xff] }
 0x208   :  { %3754 = vmatprep.subr.bf16.mxu0 %v9470_v6  ;;  %3926 = vmatprep.subr.bf16.mxu1 %v9472_v7  ;;  %v1028_v5 = vld [vmem:[#allocation6 + $0xf28] sm:$0xff]  ;;  %v9517_v6 = vcombine.low %v1015_v57, %v1019_v58  ;;  %v9519_v7 = vcombine.low %v1016_v59, %v1020_v60  ;;  %v9058_v57 = vcombine.high %v553_v50, %v557_v51  ;;  %v561_v59 = vld [vmem:[#allocation6 + $0x90] sm:$0xff] }
 0x209   :  { %v9528_v9 = vcombine.high %v1024_v4, %v1028_v5  ;;  %v565_v60 = vld [vmem:[#allocation6 + $0xb0] sm:$0xff] }
 0x20b   :  { %3755 = vmatpush1.bf16.msra.mxu0 %v9469_v16  ;;  %3927 = vmatpush1.bf16.msra.mxu1 %v9471_v25  ;;  %v1032_v16 = vld [vmem:[#allocation6 + $0xf48] sm:$0xff] }
 0x20c   :  { %3756 = vmatprep.subr.bf16.mxu0 %v9478_v26  ;;  %3928 = vmatprep.subr.bf16.mxu1 %v9480_v27  ;;  %v1036_v25 = vld [vmem:[#allocation6 + $0xf68] sm:$0xff]  ;;  %v9525_v26 = vcombine.low %v1023_v2, %v1027_v3  ;;  %v9527_v27 = vcombine.low %v1024_v4, %v1028_v5  ;;  %v9066_v2 = vcombine.high %v561_v59, %v565_v60  ;;  %v569_v4 = vld [vmem:[#allocation6 + $0xd0] sm:$0xff] }
 0x20d   :  { %v9536_v29 = vcombine.high %v1032_v16, %v1036_v25  ;;  %v573_v5 = vld [vmem:[#allocation6 + $0xf0] sm:$0xff] }
 0x20f   :  { %3757 = vmatpush1.bf16.msra.mxu0 %v9477_v33  ;;  %3929 = vmatpush1.bf16.msra.mxu1 %v9479_v34  ;;  %v1040_v33 = vld [vmem:[#allocation6 + $0xf88] sm:$0xff] }
 0x210   :  { %3758 = vmatprep.subr.bf16.mxu0 %v9486_v35  ;;  %3930 = vmatprep.subr.bf16.mxu1 %v9488_v36  ;;  %v1044_v34 = vld [vmem:[#allocation6 + $0xfa8] sm:$0xff]  ;;  %v9533_v35 = vcombine.low %v1031_v10, %v1035_v12  ;;  %v9535_v36 = vcombine.low %v1032_v16, %v1036_v25  ;;  %v9074_v10 = vcombine.high %v569_v4, %v573_v5  ;;  %v577_v16 = vld [vmem:[#allocation6 + $0x110] sm:$0xff] }
 0x211   :  { %v9544_v38 = vcombine.high %v1040_v33, %v1044_v34  ;;  %v581_v25 = vld [vmem:[#allocation6 + $0x130] sm:$0xff] }
 0x213   :  { %3759 = vmatpush1.bf16.msra.mxu0 %v9485_v41  ;;  %3931 = vmatpush1.bf16.msra.mxu1 %v9487_v42  ;;  %v1048_v41 = vld [vmem:[#allocation6 + $0xfc8] sm:$0xff] }
 0x214   :  { %3760 = vmatprep.subr.bf16.mxu0 %v9494_v43  ;;  %3932 = vmatprep.subr.bf16.mxu1 %v9496_v44  ;;  %v1052_v42 = vld [vmem:[#allocation6 + $0xfe8] sm:$0xff]  ;;  %v9541_v43 = vcombine.low %v1039_v31, %v1043_v32  ;;  %v9543_v44 = vcombine.low %v1040_v33, %v1044_v34  ;;  %v585_v32 = vld [vmem:[#allocation6 + $0x150] sm:$0xff]  ;;  %v586_v34 = vld [vmem:[#allocation6 + $0x158] sm:$0xff] }
 0x215   :  { %v9552_v46 = vcombine.high %v1048_v41, %v1052_v42  ;;  %v589_v33 = vld [vmem:[#allocation6 + $0x170] sm:$0xff] }
 0x217   :  { %3761 = vmatpush1.bf16.msra.mxu0 %v9493_v49  ;;  %3933 = vmatpush1.bf16.msra.mxu1 %v9495_v13  ;;  %v546_v49 = vld [vmem:[#allocation6 + $0x18] sm:$0xff] }
 0x218   :  { %3762 = vmatprep.subr.bf16.mxu0 %v9502_v15  ;;  %3934 = vmatprep.subr.bf16.mxu1 %v9504_v24  ;;  %v550_v13 = vld [vmem:[#allocation6 + $0x38] sm:$0xff]  ;;  %v9549_v15 = vcombine.low %v1047_v39, %v1051_v40  ;;  %v9551_v24 = vcombine.low %v1048_v41, %v1052_v42  ;;  %v593_v40 = vld [vmem:[#allocation6 + $0x190] sm:$0xff] }
 0x219   :  { %v9052_v19 = vcombine.high %v546_v49, %v550_v13  ;;  %v597_v41 = vld [vmem:[#allocation6 + $0x1b0] sm:$0xff]  ;;  %v594_v42 = vld [vmem:[#allocation6 + $0x198] sm:$0xff] }
 0x21b   :  { %3763 = vmatpush1.bf16.msra.mxu0 %v9501_v52  ;;  %3935 = vmatpush1.bf16.msra.mxu1 %v9503_v54  ;;  %v554_v52 = vld [vmem:[#allocation6 + $0x58] sm:$0xff] }
 0x21c   :  { %3764 = vmatprep.subr.bf16.mxu0 %v9510_v55  ;;  %3936 = vmatprep.subr.bf16.mxu1 %v9512_v56  ;;  %v558_v54 = vld [vmem:[#allocation6 + $0x78] sm:$0xff]  ;;  %v9049_v55 = vcombine.low %v545_v47, %v549_v48  ;;  %v9051_v56 = vcombine.low %v546_v49, %v550_v13  ;;  %v601_v48 = vld [vmem:[#allocation6 + $0x1d0] sm:$0xff] }
 0x21d   :  { %v9060_v58 = vcombine.high %v554_v52, %v558_v54  ;;  %v605_v49 = vld [vmem:[#allocation6 + $0x1f0] sm:$0xff]  ;;  %v602_v13 = vld [vmem:[#allocation6 + $0x1d8] sm:$0xff] }
 0x21f   :  { %3765 = vmatpush1.bf16.msra.mxu0 %v9509_v62  ;;  %3937 = vmatpush1.bf16.msra.mxu1 %v9511_v63  ;;  %v562_v62 = vld [vmem:[#allocation6 + $0x98] sm:$0xff] }
 0x220   :  { %3766 = vmatprep.subr.bf16.mxu0 %v9518_v0  ;;  %3938 = vmatprep.subr.bf16.mxu1 %v9520_v1  ;;  %v566_v63 = vld [vmem:[#allocation6 + $0xb8] sm:$0xff]  ;;  %v9057_v0 = vcombine.low %v553_v50, %v557_v51  ;;  %v9059_v1 = vcombine.low %v554_v52, %v558_v54  ;;  %v609_v51 = vld [vmem:[#allocation6 + $0x210] sm:$0xff] }
 0x221   :  { %v9068_v3 = vcombine.high %v562_v62, %v566_v63  ;;  %v613_v52 = vld [vmem:[#allocation6 + $0x230] sm:$0xff]  ;;  %v610_v54 = vld [vmem:[#allocation6 + $0x218] sm:$0xff] }
 0x223   :  { %3767 = vmatpush1.bf16.msra.mxu0 %v9517_v6  ;;  %3939 = vmatpush1.bf16.msra.mxu1 %v9519_v7  ;;  %v570_v6 = vld [vmem:[#allocation6 + $0xd8] sm:$0xff] }
 0x224   :  { %3768 = vmatprep.subr.bf16.mxu0 %v9526_v8  ;;  %3940 = vmatprep.subr.bf16.mxu1 %v9528_v9  ;;  %v574_v7 = vld [vmem:[#allocation6 + $0xf8] sm:$0xff]  ;;  %v9065_v8 = vcombine.low %v561_v59, %v565_v60  ;;  %v9067_v9 = vcombine.low %v562_v62, %v566_v63  ;;  %v617_v60 = vld [vmem:[#allocation6 + $0x250] sm:$0xff] }
 0x225   :  { %v9076_v12 = vcombine.high %v570_v6, %v574_v7  ;;  %v621_v62 = vld [vmem:[#allocation6 + $0x270] sm:$0xff]  ;;  %v618_v63 = vld [vmem:[#allocation6 + $0x258] sm:$0xff] }
 0x227   :  { %3769 = vmatpush1.bf16.msra.mxu0 %v9525_v26  ;;  %3941 = vmatpush1.bf16.msra.mxu1 %v9527_v27  ;;  %v582_v26 = vld [vmem:[#allocation6 + $0x138] sm:$0xff]  ;;  %v9073_v27 = vcombine.low %v569_v4, %v573_v5  ;;  %v625_v5 = vld [vmem:[#allocation6 + $0x290] sm:$0xff] }
 0x228   :  { %3770 = vmatprep.subr.bf16.mxu0 %v9534_v28  ;;  %3942 = vmatprep.subr.bf16.mxu1 %v9536_v29  ;;  %v9075_v28 = vcombine.low %v570_v6, %v574_v7  ;;  %v9082_v29 = vcombine.high %v577_v16, %v581_v25  ;;  %v629_v6 = vld [vmem:[#allocation6 + $0x2b0] sm:$0xff]  ;;  %v626_v7 = vld [vmem:[#allocation6 + $0x298] sm:$0xff] }
 0x22b   :  { %3771 = vmatpush1.bf16.msra.mxu0 %v9533_v35  ;;  %3943 = vmatpush1.bf16.msra.mxu1 %v9535_v36  ;;  %v590_v35 = vld [vmem:[#allocation6 + $0x178] sm:$0xff]  ;;  %v9081_v36 = vcombine.low %v577_v16, %v581_v25  ;;  %v633_v25 = vld [vmem:[#allocation6 + $0x2d0] sm:$0xff] }
 0x22c   :  { %3772 = vmatprep.subr.bf16.mxu0 %v9542_v37  ;;  %3944 = vmatprep.subr.bf16.mxu1 %v9544_v38  ;;  %v9090_v38 = vcombine.high %v585_v32, %v589_v33  ;;  %v9092_v39 = vcombine.high %v586_v34, %v590_v35 }
 0x22f   :  { %3773 = vmatpush1.bf16.msra.mxu0 %v9541_v43  ;;  %3945 = vmatpush1.bf16.msra.mxu1 %v9543_v44  ;;  %v598_v43 = vld [vmem:[#allocation6 + $0x1b8] sm:$0xff]  ;;  %v9089_v44 = vcombine.low %v585_v32, %v589_v33  ;;  %v641_v33 = vld [vmem:[#allocation6 + $0x310] sm:$0xff] }
 0x230   :  { %3774 = vmatprep.subr.bf16.mxu0 %v9550_v45  ;;  %3946 = vmatprep.subr.bf16.mxu1 %v9552_v46  ;;  %v9091_v45 = vcombine.low %v586_v34, %v590_v35  ;;  %v9098_v46 = vcombine.high %v593_v40, %v597_v41  ;;  %v9100_v47 = vcombine.high %v594_v42, %v598_v43  ;;  %v645_v34 = vld [vmem:[#allocation6 + $0x330] sm:$0xff]  ;;  %v642_v35 = vld [vmem:[#allocation6 + $0x318] sm:$0xff] }
 0x233   :  { %3775 = vmatpush1.bf16.msra.mxu0 %v9549_v15  ;;  %3947 = vmatpush1.bf16.msra.mxu1 %v9551_v24  ;;  %v606_v15 = vld [vmem:[#allocation6 + $0x1f8] sm:$0xff]  ;;  %v9097_v24 = vcombine.low %v593_v40, %v597_v41  ;;  %v649_v41 = vld [vmem:[#allocation6 + $0x350] sm:$0xff] }
 0x234   :  { %3959 = vmatprep.subr.bf16.mxu0 %v9050_v17  ;;  %4131 = vmatprep.subr.bf16.mxu1 %v9052_v19  ;;  %v9099_v17 = vcombine.low %v594_v42, %v598_v43  ;;  %v9106_v19 = vcombine.high %v601_v48, %v605_v49  ;;  %v9108_v50 = vcombine.high %v602_v13, %v606_v15  ;;  %v653_v42 = vld [vmem:[#allocation6 + $0x370] sm:$0xff]  ;;  %v650_v43 = vld [vmem:[#allocation6 + $0x358] sm:$0xff] }
 0x236   :  { %3777 = vmatmul.mubr.bf16.vlgmr.msra.gmra.mrb[8].mxu0 %v10837_v53  ;;  %3949 = vmatmul.mubr.bf16.vlgmr.msra.gmra.mrb[8].mxu1 %v10837_v53 }
 0x237   :  { %3960 = vmatpush1.bf16.msra.mxu0 %v9049_v55  ;;  %3991 = vmatprep.mubr.bf16.mxu0 %v10811_v20  ;;  %v614_v55 = vld [vmem:[#allocation6 + $0x238] sm:$0xff] }
 0x238   :  { %4132 = vmatpush1.bf16.msra.mxu1 %v9051_v56  ;;  %4163 = vmatprep.mubr.bf16.mxu1 %v10811_v20  ;;  %v578_v20 = vld [vmem:[#allocation6 + $0x118] sm:$0xff]  ;;  %v9105_v56 = vcombine.low %v601_v48, %v605_v49  ;;  %v9116_v59 = vcombine.high %v610_v54, %v614_v55  ;;  %v657_v49 = vld [vmem:[#allocation6 + $0x390] sm:$0xff] }
 0x239   :  { %3961 = vmatprep.subr.bf16.mxu0 %v9058_v57  ;;  %4133 = vmatprep.subr.bf16.mxu1 %v9060_v58  ;;  %v9084_v31 = vcombine.high %v578_v20, %v582_v26  ;;  %v9083_v37 = vcombine.low %v578_v20, %v582_v26  ;;  %v9107_v57 = vcombine.low %v602_v13, %v606_v15  ;;  %v637_v20 = vld [vmem:[#allocation6 + $0x2f0] sm:$0xff]  ;;  %v634_v26 = vld [vmem:[#allocation6 + $0x2d8] sm:$0xff] }
 0x23a   :  { %v9114_v58 = vcombine.high %v609_v51, %v613_v52  ;;  %v661_v13 = vld [vmem:[#allocation6 + $0x3b0] sm:$0xff]  ;;  %v658_v15 = vld [vmem:[#allocation6 + $0x398] sm:$0xff] }
 0x23b   :  { %3962 = vmatpush1.bf16.msra.mxu0 %v9057_v0  ;;  %v622_v0 = vld [vmem:[#allocation6 + $0x278] sm:$0xff] }
 0x23c   :  { %4134 = vmatpush1.bf16.msra.mxu1 %v9059_v1  ;;  %3963 = vmatprep.subr.bf16.mxu0 %v9066_v2  ;;  %v9113_v1 = vcombine.low %v609_v51, %v613_v52  ;;  %v9115_v2 = vcombine.low %v610_v54, %v614_v55  ;;  %v9124_v4 = vcombine.high %v618_v63, %v622_v0  ;;  %v665_v52 = vld [vmem:[#allocation6 + $0x3d0] sm:$0xff]  ;;  %v666_v55 = vld [vmem:[#allocation6 + $0x3d8] sm:$0xff] }
 0x23d   :  { %4135 = vmatprep.subr.bf16.mxu1 %v9068_v3  ;;  %v9122_v3 = vcombine.high %v617_v60, %v621_v62  ;;  %v669_v54 = vld [vmem:[#allocation6 + $0x3f0] sm:$0xff] }
 0x23f   :  { %3964 = vmatpush1.bf16.msra.mxu0 %v9065_v8  ;;  %v630_v8 = vld [vmem:[#allocation6 + $0x2b8] sm:$0xff] }
 0x240   :  { %4136 = vmatpush1.bf16.msra.mxu1 %v9067_v9  ;;  %3965 = vmatprep.subr.bf16.mxu0 %v9074_v10  ;;  %v9121_v9 = vcombine.low %v617_v60, %v621_v62  ;;  %v9123_v10 = vcombine.low %v618_v63, %v622_v0  ;;  %v9132_v16 = vcombine.high %v626_v7, %v630_v8  ;;  %v673_v62 = vld [vmem:[#allocation6 + $0x410] sm:$0xff]  ;;  %v674_v0 = vld [vmem:[#allocation6 + $0x418] sm:$0xff] }
 0x241   :  { %4137 = vmatprep.subr.bf16.mxu1 %v9076_v12  ;;  %v9130_v12 = vcombine.high %v625_v5, %v629_v6  ;;  %v677_v63 = vld [vmem:[#allocation6 + $0x430] sm:$0xff] }
 0x243   :  { %3966 = vmatpush1.bf16.msra.mxu0 %v9073_v27  ;;  %v638_v27 = vld [vmem:[#allocation6 + $0x2f8] sm:$0xff] }
 0x244   :  { %4138 = vmatpush1.bf16.msra.mxu1 %v9075_v28  ;;  %3967 = vmatprep.subr.bf16.mxu0 %v9082_v29  ;;  %v9129_v28 = vcombine.low %v625_v5, %v629_v6  ;;  %v9131_v29 = vcombine.low %v626_v7, %v630_v8  ;;  %v9140_v32 = vcombine.high %v634_v26, %v638_v27  ;;  %v681_v6 = vld [vmem:[#allocation6 + $0x450] sm:$0xff] }
 0x245   :  { %4139 = vmatprep.subr.bf16.mxu1 %v9084_v31  ;;  %v9138_v31 = vcombine.high %v633_v25, %v637_v20  ;;  %v685_v7 = vld [vmem:[#allocation6 + $0x470] sm:$0xff]  ;;  %v9177_v8 = vcombine.low %v673_v62, %v677_v63 }
 0x247   :  { %3968 = vmatpush1.bf16.msra.mxu0 %v9081_v36  ;;  %v646_v36 = vld [vmem:[#allocation6 + $0x338] sm:$0xff] }
 0x248   :  { %4140 = vmatpush1.bf16.msra.mxu1 %v9083_v37  ;;  %3969 = vmatprep.subr.bf16.mxu0 %v9090_v38  ;;  %v9137_v37 = vcombine.low %v633_v25, %v637_v20  ;;  %v9139_v38 = vcombine.low %v634_v26, %v638_v27  ;;  %v9148_v40 = vcombine.high %v642_v35, %v646_v36  ;;  %v689_v25 = vld [vmem:[#allocation6 + $0x490] sm:$0xff]  ;;  %v690_v27 = vld [vmem:[#allocation6 + $0x498] sm:$0xff] }
 0x249   :  { %4141 = vmatprep.subr.bf16.mxu1 %v9092_v39  ;;  %v9146_v39 = vcombine.high %v641_v33, %v645_v34  ;;  %v693_v20 = vld [vmem:[#allocation6 + $0x4b0] sm:$0xff] }
 0x24b   :  { %3970 = vmatpush1.bf16.msra.mxu0 %v9089_v44  ;;  %v654_v44 = vld [vmem:[#allocation6 + $0x378] sm:$0xff] }
 0x24c   :  { %4142 = vmatpush1.bf16.msra.mxu1 %v9091_v45  ;;  %3971 = vmatprep.subr.bf16.mxu0 %v9098_v46  ;;  %v9145_v45 = vcombine.low %v641_v33, %v645_v34  ;;  %v9147_v46 = vcombine.low %v642_v35, %v646_v36  ;;  %v9156_v48 = vcombine.high %v650_v43, %v654_v44  ;;  %v697_v34 = vld [vmem:[#allocation6 + $0x4d0] sm:$0xff]  ;;  %v698_v36 = vld [vmem:[#allocation6 + $0x4d8] sm:$0xff] }
 0x24d   :  { %4143 = vmatprep.subr.bf16.mxu1 %v9100_v47  ;;  %v9154_v47 = vcombine.high %v649_v41, %v653_v42  ;;  %v701_v35 = vld [vmem:[#allocation6 + $0x4f0] sm:$0xff] }
 0x24f   :  { %3972 = vmatpush1.bf16.msra.mxu0 %v9097_v24  ;;  %v662_v24 = vld [vmem:[#allocation6 + $0x3b8] sm:$0xff] }
 0x250   :  { %4144 = vmatpush1.bf16.msra.mxu1 %v9099_v17  ;;  %3973 = vmatprep.subr.bf16.mxu0 %v9106_v19  ;;  %v9153_v17 = vcombine.low %v649_v41, %v653_v42  ;;  %v9155_v19 = vcombine.low %v650_v43, %v654_v44  ;;  %v9164_v51 = vcombine.high %v658_v15, %v662_v24  ;;  %v705_v41 = vld [vmem:[#allocation6 + $0x510] sm:$0xff]  ;;  %v706_v43 = vld [vmem:[#allocation6 + $0x518] sm:$0xff] }
 0x251   :  { %4145 = vmatprep.subr.bf16.mxu1 %v9108_v50  ;;  %v9162_v50 = vcombine.high %v657_v49, %v661_v13  ;;  %v709_v42 = vld [vmem:[#allocation6 + $0x530] sm:$0xff]  ;;  %v710_v44 = vld [vmem:[#allocation6 + $0x538] sm:$0xff] }
 0x253   :  { %3974 = vmatpush1.bf16.msra.mxu0 %v9105_v56  ;;  %v670_v56 = vld [vmem:[#allocation6 + $0x3f8] sm:$0xff] }
 0x254   :  { %4146 = vmatpush1.bf16.msra.mxu1 %v9107_v57  ;;  %3975 = vmatprep.subr.bf16.mxu0 %v9114_v58  ;;  %v9161_v57 = vcombine.low %v657_v49, %v661_v13  ;;  %v9163_v58 = vcombine.low %v658_v15, %v662_v24  ;;  %v9172_v60 = vcombine.high %v666_v55, %v670_v56  ;;  %v717_v49 = vld [vmem:[#allocation6 + $0x570] sm:$0xff]  ;;  %v714_v13 = vld [vmem:[#allocation6 + $0x558] sm:$0xff] }
 0x255   :  { %4147 = vmatprep.subr.bf16.mxu1 %v9116_v59  ;;  %v9170_v59 = vcombine.high %v665_v52, %v669_v54  ;;  %v718_v15 = vld [vmem:[#allocation6 + $0x578] sm:$0xff]  ;;  %v9209_v24 = vcombine.low %v705_v41, %v709_v42 }
 0x257   :  { %3976 = vmatpush1.bf16.msra.mxu0 %v9113_v1  ;;  %v678_v1 = vld [vmem:[#allocation6 + $0x438] sm:$0xff] }
 0x258   :  { %4148 = vmatpush1.bf16.msra.mxu1 %v9115_v2  ;;  %3977 = vmatprep.subr.bf16.mxu0 %v9122_v3  ;;  %v9169_v2 = vcombine.low %v665_v52, %v669_v54  ;;  %v9171_v3 = vcombine.low %v666_v55, %v670_v56  ;;  %v9180_v5 = vcombine.high %v674_v0, %v678_v1  ;;  %v725_v52 = vld [vmem:[#allocation6 + $0x5b0] sm:$0xff]  ;;  %v722_v54 = vld [vmem:[#allocation6 + $0x598] sm:$0xff] }
 0x259   :  { %4149 = vmatprep.subr.bf16.mxu1 %v9124_v4  ;;  %v9178_v4 = vcombine.high %v673_v62, %v677_v63  ;;  %v726_v55 = vld [vmem:[#allocation6 + $0x5b8] sm:$0xff]  ;;  %v733_v62 = vld [vmem:[#allocation6 + $0x5f0] sm:$0xff] }
 0x25a   :  { %v730_v63 = vld [vmem:[#allocation6 + $0x5d8] sm:$0xff] }
 0x25b   :  { %3978 = vmatpush1.bf16.msra.mxu0 %v9121_v9  ;;  %v682_v9 = vld [vmem:[#allocation6 + $0x458] sm:$0xff] }
 0x25c   :  { %4150 = vmatpush1.bf16.msra.mxu1 %v9123_v10  ;;  %3979 = vmatprep.subr.bf16.mxu0 %v9130_v12  ;;  %v686_v10 = vld [vmem:[#allocation6 + $0x478] sm:$0xff]  ;;  %v9179_v12 = vcombine.low %v674_v0, %v678_v1 }
 0x25d   :  { %4151 = vmatprep.subr.bf16.mxu1 %v9132_v16  ;;  %v9186_v16 = vcombine.high %v681_v6, %v685_v7  ;;  %v9188_v26 = vcombine.high %v682_v9, %v686_v10  ;;  %v734_v0 = vld [vmem:[#allocation6 + $0x5f8] sm:$0xff] }
 0x25f   :  { %3980 = vmatpush1.bf16.msra.mxu0 %v9129_v28  ;;  %v694_v28 = vld [vmem:[#allocation6 + $0x4b8] sm:$0xff] }
 0x260   :  { %4152 = vmatpush1.bf16.msra.mxu1 %v9131_v29  ;;  %3981 = vmatprep.subr.bf16.mxu0 %v9138_v31  ;;  %v9185_v29 = vcombine.low %v681_v6, %v685_v7  ;;  %v9187_v31 = vcombine.low %v682_v9, %v686_v10  ;;  %v9196_v33 = vcombine.high %v690_v27, %v694_v28  ;;  %v741_v6 = vld [vmem:[#allocation6 + $0x630] sm:$0xff]  ;;  %v738_v7 = vld [vmem:[#allocation6 + $0x618] sm:$0xff] }
 0x261   :  { %4153 = vmatprep.subr.bf16.mxu1 %v9140_v32  ;;  %v9194_v32 = vcombine.high %v689_v25, %v693_v20  ;;  %v9235_v10 = vcombine.low %v730_v63, %v734_v0 }
 0x263   :  { %3982 = vmatpush1.bf16.msra.mxu0 %v9137_v37  ;;  %v702_v37 = vld [vmem:[#allocation6 + $0x4f8] sm:$0xff] }
 0x264   :  { %4154 = vmatpush1.bf16.msra.mxu1 %v9139_v38  ;;  %3983 = vmatprep.subr.bf16.mxu0 %v9146_v39  ;;  %v9193_v38 = vcombine.low %v689_v25, %v693_v20  ;;  %v9202_v39 = vcombine.high %v697_v34, %v701_v35  ;;  %v745_v25 = vld [vmem:[#allocation6 + $0x650] sm:$0xff] }
 0x265   :  { %4155 = vmatprep.subr.bf16.mxu1 %v9148_v40  ;;  %v9204_v40 = vcombine.high %v698_v36, %v702_v37  ;;  %v749_v20 = vld [vmem:[#allocation6 + $0x670] sm:$0xff] }
 0x267   :  { %3984 = vmatpush1.bf16.msra.mxu0 %v9145_v45  ;;  %v9203_v45 = vcombine.low %v698_v36, %v702_v37  ;;  %v758_v36 = vld [vmem:[#allocation6 + $0x6b8] sm:$0xff]  ;;  %v9249_v37 = vcombine.low %v745_v25, %v749_v20 }
 0x268   :  { %4156 = vmatpush1.bf16.msra.mxu1 %v9147_v46  ;;  %3985 = vmatprep.subr.bf16.mxu0 %v9154_v47  ;;  %v9210_v46 = vcombine.high %v705_v41, %v709_v42  ;;  %v9212_v47 = vcombine.high %v706_v43, %v710_v44  ;;  %v765_v41 = vld [vmem:[#allocation6 + $0x6f0] sm:$0xff]  ;;  %v762_v42 = vld [vmem:[#allocation6 + $0x6d8] sm:$0xff] }
 0x269   :  { %4157 = vmatprep.subr.bf16.mxu1 %v9156_v48  ;;  %v713_v48 = vld [vmem:[#allocation6 + $0x550] sm:$0xff] }
 0x26a   :  { %v9217_v56 = vcombine.low %v713_v48, %v717_v49 }
 0x26b   :  { %3986 = vmatpush1.bf16.msra.mxu0 %v9153_v17  ;;  %v9211_v17 = vcombine.low %v706_v43, %v710_v44  ;;  %v766_v43 = vld [vmem:[#allocation6 + $0x6f8] sm:$0xff] }
 0x26c   :  { %4158 = vmatpush1.bf16.msra.mxu1 %v9155_v19  ;;  %3987 = vmatprep.subr.bf16.mxu0 %v9162_v50  ;;  %v9218_v19 = vcombine.high %v713_v48, %v717_v49  ;;  %v9220_v50 = vcombine.high %v714_v13, %v718_v15  ;;  %v773_v48 = vld [vmem:[#allocation6 + $0x730] sm:$0xff]  ;;  %v770_v49 = vld [vmem:[#allocation6 + $0x718] sm:$0xff] }
 0x26d   :  { %4159 = vmatprep.subr.bf16.mxu1 %v9164_v51  ;;  %v721_v51 = vld [vmem:[#allocation6 + $0x590] sm:$0xff] }
 0x26e   :  { %v9225_v1 = vcombine.low %v721_v51, %v725_v52 }
 0x26f   :  { %3988 = vmatpush1.bf16.msra.mxu0 %v9161_v57  ;;  %v9219_v57 = vcombine.low %v714_v13, %v718_v15  ;;  %v774_v13 = vld [vmem:[#allocation6 + $0x738] sm:$0xff] }
 0x270   :  { %4160 = vmatpush1.bf16.msra.mxu1 %v9163_v58  ;;  %3989 = vmatprep.subr.bf16.mxu0 %v9170_v59  ;;  %v9226_v58 = vcombine.high %v721_v51, %v725_v52  ;;  %v9228_v59 = vcombine.high %v722_v54, %v726_v55  ;;  %v781_v51 = vld [vmem:[#allocation6 + $0x770] sm:$0xff]  ;;  %v778_v52 = vld [vmem:[#allocation6 + $0x758] sm:$0xff] }
 0x271   :  { %4161 = vmatprep.subr.bf16.mxu1 %v9172_v60  ;;  %v729_v60 = vld [vmem:[#allocation6 + $0x5d0] sm:$0xff] }
 0x272   :  { %v9233_v9 = vcombine.low %v729_v60, %v733_v62 }
 0x273   :  { %3990 = vmatpush1.bf16.msra.mxu0 %v9169_v2  ;;  %v9227_v2 = vcombine.low %v722_v54, %v726_v55  ;;  %v782_v54 = vld [vmem:[#allocation6 + $0x778] sm:$0xff] }
 0x274   :  { %4162 = vmatpush1.bf16.msra.mxu1 %v9171_v3  ;;  %4002 = vmatprep.subr.bf16.mxu0 %v9178_v4  ;;  %v9234_v3 = vcombine.high %v729_v60, %v733_v62  ;;  %v9236_v4 = vcombine.high %v730_v63, %v734_v0  ;;  %v789_v60 = vld [vmem:[#allocation6 + $0x7b0] sm:$0xff]  ;;  %v786_v62 = vld [vmem:[#allocation6 + $0x798] sm:$0xff] }
 0x275   :  { %4174 = vmatprep.subr.bf16.mxu1 %v9180_v5  ;;  %v737_v5 = vld [vmem:[#allocation6 + $0x610] sm:$0xff]  ;;  %v790_v63 = vld [vmem:[#allocation6 + $0x7b8] sm:$0xff] }
 0x276   :  { %3992 = vmatmul.mubr.bf16.vlgmr.msra.gmra.mrb[12].mxu0 %v10809_v11 }
 0x277   :  { %4164 = vmatmul.mubr.bf16.vlgmr.msra.gmra.mrb[12].mxu1 %v10809_v11  ;;  %4003 = vmatpush1.bf16.msra.mxu0 %v9177_v8  ;;  %v9195_v11 = vcombine.low %v690_v27, %v694_v28  ;;  %v742_v8 = vld [vmem:[#allocation6 + $0x638] sm:$0xff]  ;;  %v9241_v28 = vcombine.low %v737_v5, %v741_v6 }
 0x278   :  { %4034 = vmatprep.mubr.bf16.mxu0 %v10815_v30  ;;  %4175 = vmatpush1.bf16.msra.mxu1 %v9179_v12  ;;  %v9242_v12 = vcombine.high %v737_v5, %v741_v6  ;;  %v750_v27 = vld [vmem:[#allocation6 + $0x678] sm:$0xff]  ;;  %v797_v5 = vld [vmem:[#allocation6 + $0x7f0] sm:$0xff] }
 0x279   :  { %4206 = vmatprep.mubr.bf16.mxu1 %v10815_v30  ;;  %4004 = vmatprep.subr.bf16.mxu0 %v9186_v16  ;;  %v9201_v30 = vcombine.low %v697_v34, %v701_v35  ;;  %v9244_v16 = vcombine.high %v738_v7, %v742_v8  ;;  %v757_v34 = vld [vmem:[#allocation6 + $0x6b0] sm:$0xff]  ;;  %v754_v35 = vld [vmem:[#allocation6 + $0x698] sm:$0xff] }
 0x27a   :  { %4176 = vmatprep.subr.bf16.mxu1 %v9188_v26  ;;  %v746_v26 = vld [vmem:[#allocation6 + $0x658] sm:$0xff] }
 0x27b   :  { %4005 = vmatpush1.bf16.msra.mxu0 %v9185_v29  ;;  %v9243_v29 = vcombine.low %v738_v7, %v742_v8  ;;  %v794_v6 = vld [vmem:[#allocation6 + $0x7d8] sm:$0xff] }
 0x27c   :  { %4177 = vmatpush1.bf16.msra.mxu1 %v9187_v31  ;;  %4006 = vmatprep.subr.bf16.mxu0 %v9194_v32  ;;  %v9250_v31 = vcombine.high %v745_v25, %v749_v20  ;;  %v9252_v32 = vcombine.high %v746_v26, %v750_v27  ;;  %v798_v7 = vld [vmem:[#allocation6 + $0x7f8] sm:$0xff]  ;;  %v805_v25 = vld [vmem:[#allocation6 + $0x830] sm:$0xff] }
 0x27d   :  { %4178 = vmatprep.subr.bf16.mxu1 %v9196_v33  ;;  %v753_v33 = vld [vmem:[#allocation6 + $0x690] sm:$0xff]  ;;  %v802_v20 = vld [vmem:[#allocation6 + $0x818] sm:$0xff] }
 0x27e   :  { %v9257_v44 = vcombine.low %v753_v33, %v757_v34 }
 0x27f   :  { %4007 = vmatpush1.bf16.msra.mxu0 %v9193_v38  ;;  %v9251_v38 = vcombine.low %v746_v26, %v750_v27  ;;  %v806_v26 = vld [vmem:[#allocation6 + $0x838] sm:$0xff] }
 0x280   :  { %4179 = vmatpush1.bf16.msra.mxu1 %v9195_v11  ;;  %4008 = vmatprep.subr.bf16.mxu0 %v9202_v39  ;;  %v9258_v11 = vcombine.high %v753_v33, %v757_v34  ;;  %v9260_v39 = vcombine.high %v754_v35, %v758_v36  ;;  %v813_v33 = vld [vmem:[#allocation6 + $0x870] sm:$0xff] }
 0x281   :  { %4180 = vmatprep.subr.bf16.mxu1 %v9204_v40  ;;  %v761_v40 = vld [vmem:[#allocation6 + $0x6d0] sm:$0xff] }
 0x282   :  { %v9265_v15 = vcombine.low %v761_v40, %v765_v41 }
 0x283   :  { %4009 = vmatpush1.bf16.msra.mxu0 %v9201_v30  ;;  %v9259_v30 = vcombine.low %v754_v35, %v758_v36  ;;  %v810_v35 = vld [vmem:[#allocation6 + $0x858] sm:$0xff] }
 0x284   :  { %4181 = vmatpush1.bf16.msra.mxu1 %v9203_v45  ;;  %4010 = vmatprep.subr.bf16.mxu0 %v9210_v46  ;;  %v9266_v45 = vcombine.high %v761_v40, %v765_v41  ;;  %v9268_v46 = vcombine.high %v762_v42, %v766_v43  ;;  %v814_v36 = vld [vmem:[#allocation6 + $0x878] sm:$0xff] }
 0x285   :  { %4182 = vmatprep.subr.bf16.mxu1 %v9212_v47  ;;  %v769_v47 = vld [vmem:[#allocation6 + $0x710] sm:$0xff]  ;;  %v9316_v40 = vcombine.high %v810_v35, %v814_v36  ;;  %v818_v41 = vld [vmem:[#allocation6 + $0x898] sm:$0xff] }
 0x286   :  { %v9273_v55 = vcombine.low %v769_v47, %v773_v48 }
 0x287   :  { %4011 = vmatpush1.bf16.msra.mxu0 %v9209_v24  ;;  %v9267_v24 = vcombine.low %v762_v42, %v766_v43  ;;  %v822_v42 = vld [vmem:[#allocation6 + $0x8b8] sm:$0xff] }
 0x288   :  { %4183 = vmatpush1.bf16.msra.mxu1 %v9211_v17  ;;  %4012 = vmatprep.subr.bf16.mxu0 %v9218_v19  ;;  %v9274_v17 = vcombine.high %v769_v47, %v773_v48  ;;  %v9276_v19 = vcombine.high %v770_v49, %v774_v13  ;;  %v829_v47 = vld [vmem:[#allocation6 + $0x8f0] sm:$0xff]  ;;  %v826_v48 = vld [vmem:[#allocation6 + $0x8d8] sm:$0xff] }
 0x289   :  { %4184 = vmatprep.subr.bf16.mxu1 %v9220_v50  ;;  %v777_v50 = vld [vmem:[#allocation6 + $0x750] sm:$0xff] }
 0x28a   :  { %v9281_v0 = vcombine.low %v777_v50, %v781_v51 }
 0x28b   :  { %4013 = vmatpush1.bf16.msra.mxu0 %v9217_v56  ;;  %v9275_v56 = vcombine.low %v770_v49, %v774_v13  ;;  %v830_v49 = vld [vmem:[#allocation6 + $0x8f8] sm:$0xff] }
 0x28c   :  { %4185 = vmatpush1.bf16.msra.mxu1 %v9219_v57  ;;  %4014 = vmatprep.subr.bf16.mxu0 %v9226_v58  ;;  %v9282_v57 = vcombine.high %v777_v50, %v781_v51  ;;  %v9284_v58 = vcombine.high %v778_v52, %v782_v54  ;;  %v834_v50 = vld [vmem:[#allocation6 + $0x918] sm:$0xff] }
 0x28d   :  { %4186 = vmatprep.subr.bf16.mxu1 %v9228_v59  ;;  %v785_v59 = vld [vmem:[#allocation6 + $0x790] sm:$0xff]  ;;  %v838_v51 = vld [vmem:[#allocation6 + $0x938] sm:$0xff] }
 0x28e   :  { %v9289_v8 = vcombine.low %v785_v59, %v789_v60 }
 0x28f   :  { %4015 = vmatpush1.bf16.msra.mxu0 %v9225_v1  ;;  %v9283_v1 = vcombine.low %v778_v52, %v782_v54  ;;  %v9331_v52 = vcombine.low %v826_v48, %v830_v49 }
 0x290   :  { %4187 = vmatpush1.bf16.msra.mxu1 %v9227_v2  ;;  %4016 = vmatprep.subr.bf16.mxu0 %v9234_v3  ;;  %v9290_v2 = vcombine.high %v785_v59, %v789_v60  ;;  %v9292_v3 = vcombine.high %v786_v62, %v790_v63  ;;  %v846_v59 = vld [vmem:[#allocation6 + $0x978] sm:$0xff] }
 0x291   :  { %4188 = vmatprep.subr.bf16.mxu1 %v9236_v4  ;;  %v793_v4 = vld [vmem:[#allocation6 + $0x7d0] sm:$0xff] }
 0x292   :  { %v9297_v27 = vcombine.low %v793_v4, %v797_v5 }
 0x293   :  { %4017 = vmatpush1.bf16.msra.mxu0 %v9233_v9  ;;  %v9291_v9 = vcombine.low %v786_v62, %v790_v63  ;;  %v9339_v62 = vcombine.low %v834_v50, %v838_v51 }
 0x294   :  { %4189 = vmatpush1.bf16.msra.mxu1 %v9235_v10  ;;  %4018 = vmatprep.subr.bf16.mxu0 %v9242_v12  ;;  %v9298_v10 = vcombine.high %v793_v4, %v797_v5  ;;  %v9300_v12 = vcombine.high %v794_v6, %v798_v7  ;;  %v854_v4 = vld [vmem:[#allocation6 + $0x9b8] sm:$0xff] }
 0x295   :  { %4190 = vmatprep.subr.bf16.mxu1 %v9244_v16  ;;  %v801_v16 = vld [vmem:[#allocation6 + $0x810] sm:$0xff] }
 0x296   :  { %v9305_v34 = vcombine.low %v801_v16, %v805_v25 }
 0x297   :  { %4019 = vmatpush1.bf16.msra.mxu0 %v9241_v28  ;;  %v9299_v28 = vcombine.low %v794_v6, %v798_v7 }
 0x298   :  { %4191 = vmatpush1.bf16.msra.mxu1 %v9243_v29  ;;  %4020 = vmatprep.subr.bf16.mxu0 %v9250_v31  ;;  %v9306_v29 = vcombine.high %v801_v16, %v805_v25  ;;  %v9308_v31 = vcombine.high %v802_v20, %v806_v26  ;;  %v862_v16 = vld [vmem:[#allocation6 + $0x9f8] sm:$0xff] }
 0x299   :  { %4192 = vmatprep.subr.bf16.mxu1 %v9252_v32  ;;  %v809_v32 = vld [vmem:[#allocation6 + $0x850] sm:$0xff] }
 0x29a   :  { %v9313_v43 = vcombine.low %v809_v32, %v813_v33 }
 0x29b   :  { %4021 = vmatpush1.bf16.msra.mxu0 %v9249_v37  ;;  %v9307_v37 = vcombine.low %v802_v20, %v806_v26 }
 0x29c   :  { %4193 = vmatpush1.bf16.msra.mxu1 %v9251_v38  ;;  %4022 = vmatprep.subr.bf16.mxu0 %v9258_v11  ;;  %v9314_v38 = vcombine.high %v809_v32, %v813_v33  ;;  %v817_v11 = vld [vmem:[#allocation6 + $0x890] sm:$0xff]  ;;  %v870_v32 = vld [vmem:[#allocation6 + $0xa38] sm:$0xff] }
 0x29d   :  { %4194 = vmatprep.subr.bf16.mxu1 %v9260_v39  ;;  %v821_v39 = vld [vmem:[#allocation6 + $0x8b0] sm:$0xff] }
 0x29e   :  { %v9321_v13 = vcombine.low %v817_v11, %v821_v39 }
 0x29f   :  { %4023 = vmatpush1.bf16.msra.mxu0 %v9257_v44  ;;  %v9315_v44 = vcombine.low %v810_v35, %v814_v36 }
 0x2a0   :  { %4195 = vmatpush1.bf16.msra.mxu1 %v9259_v30  ;;  %4024 = vmatprep.subr.bf16.mxu0 %v9266_v45  ;;  %v9322_v30 = vcombine.high %v817_v11, %v821_v39  ;;  %v9324_v45 = vcombine.high %v818_v41, %v822_v42  ;;  %v874_v11 = vld [vmem:[#allocation6 + $0xa58] sm:$0xff] }
 0x2a1   :  { %4196 = vmatprep.subr.bf16.mxu1 %v9268_v46  ;;  %v825_v46 = vld [vmem:[#allocation6 + $0x8d0] sm:$0xff]  ;;  %v878_v39 = vld [vmem:[#allocation6 + $0xa78] sm:$0xff] }
 0x2a3   :  { %4025 = vmatpush1.bf16.msra.mxu0 %v9265_v15  ;;  %v9330_v15 = vcombine.high %v825_v46, %v829_v47 }
 0x2a4   :  { %4197 = vmatpush1.bf16.msra.mxu1 %v9267_v24  ;;  %4026 = vmatprep.subr.bf16.mxu0 %v9274_v17  ;;  %v9332_v24 = vcombine.high %v826_v48, %v830_v49  ;;  %v833_v17 = vld [vmem:[#allocation6 + $0x910] sm:$0xff]  ;;  %v9379_v48 = vcombine.low %v874_v11, %v878_v39 }
 0x2a5   :  { %4198 = vmatprep.subr.bf16.mxu1 %v9276_v19  ;;  %v837_v19 = vld [vmem:[#allocation6 + $0x930] sm:$0xff] }
 0x2a6   :  { %v9338_v54 = vcombine.high %v833_v17, %v837_v19  ;;  %v9337_v60 = vcombine.low %v833_v17, %v837_v19  ;;  %v894_v17 = vld [vmem:[#allocation6 + $0xaf8] sm:$0xff] }
 0x2a7   :  { %4027 = vmatpush1.bf16.msra.mxu0 %v9273_v55  ;;  %v9340_v55 = vcombine.high %v834_v50, %v838_v51 }
 0x2a8   :  { %4199 = vmatpush1.bf16.msra.mxu1 %v9275_v56  ;;  %4028 = vmatprep.subr.bf16.mxu0 %v9282_v57  ;;  %v841_v56 = vld [vmem:[#allocation6 + $0x950] sm:$0xff] }
 0x2a9   :  { %4200 = vmatprep.subr.bf16.mxu1 %v9284_v58  ;;  %v845_v57 = vld [vmem:[#allocation6 + $0x970] sm:$0xff]  ;;  %v842_v58 = vld [vmem:[#allocation6 + $0x958] sm:$0xff] }
 0x2aa   :  { %v9346_v63 = vcombine.high %v841_v56, %v845_v57  ;;  %v9345_v5 = vcombine.low %v841_v56, %v845_v57  ;;  %v9347_v6 = vcombine.low %v842_v58, %v846_v59  ;;  %v902_v56 = vld [vmem:[#allocation6 + $0xb38] sm:$0xff] }
 0x2ab   :  { %4029 = vmatpush1.bf16.msra.mxu0 %v9281_v0  ;;  %v9348_v0 = vcombine.high %v842_v58, %v846_v59 }
 0x2ac   :  { %4201 = vmatpush1.bf16.msra.mxu1 %v9283_v1  ;;  %4030 = vmatprep.subr.bf16.mxu0 %v9290_v2  ;;  %v849_v1 = vld [vmem:[#allocation6 + $0x990] sm:$0xff] }
 0x2ad   :  { %4202 = vmatprep.subr.bf16.mxu1 %v9292_v3  ;;  %v853_v2 = vld [vmem:[#allocation6 + $0x9b0] sm:$0xff]  ;;  %v850_v3 = vld [vmem:[#allocation6 + $0x998] sm:$0xff] }
 0x2ae   :  { %v9354_v7 = vcombine.high %v849_v1, %v853_v2  ;;  %v9353_v25 = vcombine.low %v849_v1, %v853_v2  ;;  %v9355_v20 = vcombine.low %v850_v3, %v854_v4  ;;  %v910_v1 = vld [vmem:[#allocation6 + $0xb78] sm:$0xff] }
 0x2af   :  { %4031 = vmatpush1.bf16.msra.mxu0 %v9289_v8  ;;  %v9356_v8 = vcombine.high %v850_v3, %v854_v4 }
 0x2b0   :  { %4203 = vmatpush1.bf16.msra.mxu1 %v9291_v9  ;;  %4032 = vmatprep.subr.bf16.mxu0 %v9298_v10  ;;  %v857_v9 = vld [vmem:[#allocation6 + $0x9d0] sm:$0xff] }
 0x2b1   :  { %4204 = vmatprep.subr.bf16.mxu1 %v9300_v12  ;;  %v861_v10 = vld [vmem:[#allocation6 + $0x9f0] sm:$0xff]  ;;  %v858_v12 = vld [vmem:[#allocation6 + $0x9d8] sm:$0xff] }
 0x2b2   :  { %v9362_v26 = vcombine.high %v857_v9, %v861_v10  ;;  %v9361_v33 = vcombine.low %v857_v9, %v861_v10  ;;  %v918_v9 = vld [vmem:[#allocation6 + $0xbb8] sm:$0xff] }
 0x2b3   :  { %4033 = vmatpush1.bf16.msra.mxu0 %v9297_v27  ;;  %v9364_v27 = vcombine.high %v858_v12, %v862_v16 }
 0x2b4   :  { %4205 = vmatpush1.bf16.msra.mxu1 %v9299_v28  ;;  %4045 = vmatprep.subr.bf16.mxu0 %v9306_v29  ;;  %v865_v28 = vld [vmem:[#allocation6 + $0xa10] sm:$0xff] }
 0x2b5   :  { %4217 = vmatprep.subr.bf16.mxu1 %v9308_v31  ;;  %v869_v29 = vld [vmem:[#allocation6 + $0xa30] sm:$0xff]  ;;  %v866_v31 = vld [vmem:[#allocation6 + $0xa18] sm:$0xff] }
 0x2b6   :  { %4035 = vmatmul.mubr.bf16.vlgmr.msra.gmra.mrb[12].mxu0 %v10813_v21  ;;  %v9370_v35 = vcombine.high %v865_v28, %v869_v29  ;;  %v9372_v36 = vcombine.high %v866_v31, %v870_v32 }
 0x2b7   :  { %4207 = vmatmul.mubr.bf16.vlgmr.msra.gmra.mrb[12].mxu1 %v10813_v21  ;;  %4046 = vmatpush1.bf16.msra.mxu0 %v9305_v34  ;;  %v9323_v21 = vcombine.low %v818_v41, %v822_v42  ;;  %v9363_v34 = vcombine.low %v858_v12, %v862_v16  ;;  %v9371_v41 = vcombine.low %v866_v31, %v870_v32 }
 0x2b8   :  { %4077 = vmatprep.mubr.bf16.mxu0 %v10831_v18  ;;  %4218 = vmatpush1.bf16.msra.mxu1 %v9307_v37  ;;  %v873_v37 = vld [vmem:[#allocation6 + $0xa50] sm:$0xff] }
 0x2b9   :  { %4249 = vmatprep.mubr.bf16.mxu1 %v10831_v18  ;;  %4047 = vmatprep.subr.bf16.mxu0 %v9314_v38  ;;  %v9329_v18 = vcombine.low %v825_v46, %v829_v47  ;;  %v877_v38 = vld [vmem:[#allocation6 + $0xa70] sm:$0xff]  ;;  %v886_v46 = vld [vmem:[#allocation6 + $0xab8] sm:$0xff] }
 0x2ba   :  { %4219 = vmatprep.subr.bf16.mxu1 %v9316_v40  ;;  %v9369_v40 = vcombine.low %v865_v28, %v869_v29  ;;  %v9378_v42 = vcombine.high %v873_v37, %v877_v38  ;;  %v9377_v47 = vcombine.low %v873_v37, %v877_v38  ;;  %v926_v28 = vld [vmem:[#allocation6 + $0xbf8] sm:$0xff]  ;;  %v10603_v38 = vmov 1966171168  }
 0x2bb   :  { %4048 = vmatpush1.bf16.msra.mxu0 %v9313_v43  ;;  %v9380_v43 = vcombine.high %v874_v11, %v878_v39  ;;  %v934_v37 = vld [vmem:[#allocation6 + $0xc38] sm:$0xff]  ;;  %v4315_v11 = vunpack.c.l.s4 %v10603_v38 }
 0x2bc   :  { %4220 = vmatpush1.bf16.msra.mxu1 %v9315_v44  ;;  %4049 = vmatprep.subr.bf16.mxu0 %v9322_v30  ;;  %v881_v44 = vld [vmem:[#allocation6 + $0xa90] sm:$0xff] }
 0x2bd   :  { %4221 = vmatprep.subr.bf16.mxu1 %v9324_v45  ;;  %v885_v30 = vld [vmem:[#allocation6 + $0xab0] sm:$0xff]  ;;  %v882_v45 = vld [vmem:[#allocation6 + $0xa98] sm:$0xff] }
 0x2be   :  { %v9386_v49 = vcombine.high %v881_v44, %v885_v30  ;;  %v9385_v19 = vcombine.low %v881_v44, %v885_v30  ;;  %v9387_v50 = vcombine.low %v882_v45, %v886_v46  ;;  %v941_v44 = vld [vmem:[#allocation6 + $0xc70] sm:$0xff]  ;;  %v4316_v30 = vunpack.c.0.s8 %v4315_v11 }
 0x2bf   :  { %4050 = vmatpush1.bf16.msra.mxu0 %v9321_v13  ;;  %v9388_v13 = vcombine.high %v882_v45, %v886_v46  ;;  %v938_v46 = vld [vmem:[#allocation6 + $0xc58] sm:$0xff]  ;;  %v985_v11 = vld [vmem:[#allocation6 + $0xdd0] sm:$0xff] }
 0x2c0   :  { %4222 = vmatpush1.bf16.msra.mxu1 %v9323_v21  ;;  %4051 = vmatprep.subr.bf16.mxu0 %v9330_v15  ;;  %v889_v21 = vld [vmem:[#allocation6 + $0xad0] sm:$0xff] }
 0x2c1   :  { %4223 = vmatprep.subr.bf16.mxu1 %v9332_v24  ;;  %v893_v15 = vld [vmem:[#allocation6 + $0xaf0] sm:$0xff]  ;;  %v890_v24 = vld [vmem:[#allocation6 + $0xad8] sm:$0xff] }
 0x2c2   :  { %v9394_v51 = vcombine.high %v889_v21, %v893_v15  ;;  %v9393_v57 = vcombine.low %v889_v21, %v893_v15  ;;  %v9395_v58 = vcombine.low %v890_v24, %v894_v17  ;;  %v949_v21 = vld [vmem:[#allocation6 + $0xcb0] sm:$0xff] }
 0x2c3   :  { %4052 = vmatpush1.bf16.msra.mxu0 %v9329_v18  ;;  %v9396_v18 = vcombine.high %v890_v24, %v894_v17  ;;  %v946_v24 = vld [vmem:[#allocation6 + $0xc98] sm:$0xff] }
 0x2c4   :  { %4224 = vmatpush1.bf16.msra.mxu1 %v9331_v52  ;;  %4053 = vmatprep.subr.bf16.mxu0 %v9338_v54  ;;  %v897_v52 = vld [vmem:[#allocation6 + $0xb10] sm:$0xff]  ;;  %v950_v17 = vld [vmem:[#allocation6 + $0xcb8] sm:$0xff] }
 0x2c5   :  { %4225 = vmatprep.subr.bf16.mxu1 %v9340_v55  ;;  %v901_v54 = vld [vmem:[#allocation6 + $0xb30] sm:$0xff]  ;;  %v898_v55 = vld [vmem:[#allocation6 + $0xb18] sm:$0xff] }
 0x2c6   :  { %v9402_v59 = vcombine.high %v897_v52, %v901_v54  ;;  %v9401_v2 = vcombine.low %v897_v52, %v901_v54  ;;  %v9403_v3 = vcombine.low %v898_v55, %v902_v56  ;;  %v9452_v54 = vcombine.high %v946_v24, %v950_v17 }
 0x2c7   :  { %4054 = vmatpush1.bf16.msra.mxu0 %v9337_v60  ;;  %v9404_v60 = vcombine.high %v898_v55, %v902_v56  ;;  %v953_v55 = vld [vmem:[#allocation6 + $0xcd0] sm:$0xff] }
 0x2c8   :  { %4226 = vmatpush1.bf16.msra.mxu1 %v9339_v62  ;;  %4055 = vmatprep.subr.bf16.mxu0 %v9346_v63  ;;  %v905_v62 = vld [vmem:[#allocation6 + $0xb50] sm:$0xff] }
 0x2c9   :  { %4227 = vmatprep.subr.bf16.mxu1 %v9348_v0  ;;  %v909_v63 = vld [vmem:[#allocation6 + $0xb70] sm:$0xff]  ;;  %v906_v0 = vld [vmem:[#allocation6 + $0xb58] sm:$0xff] }
 0x2ca   :  { %v9410_v4 = vcombine.high %v905_v62, %v909_v63  ;;  %v9409_v10 = vcombine.low %v905_v62, %v909_v63  ;;  %v9411_v12 = vcombine.low %v906_v0, %v910_v1  ;;  %v957_v56 = vld [vmem:[#allocation6 + $0xcf0] sm:$0xff] }
 0x2cb   :  { %4056 = vmatpush1.bf16.msra.mxu0 %v9345_v5  ;;  %v9412_v5 = vcombine.high %v906_v0, %v910_v1  ;;  %v961_v62 = vld [vmem:[#allocation6 + $0xd10] sm:$0xff]  ;;  %v962_v0 = vld [vmem:[#allocation6 + $0xd18] sm:$0xff] }
 0x2cc   :  { %4228 = vmatpush1.bf16.msra.mxu1 %v9347_v6  ;;  %4057 = vmatprep.subr.bf16.mxu0 %v9354_v7  ;;  %v913_v6 = vld [vmem:[#allocation6 + $0xb90] sm:$0xff]  ;;  %v966_v1 = vld [vmem:[#allocation6 + $0xd38] sm:$0xff] }
 0x2cd   :  { %4229 = vmatprep.subr.bf16.mxu1 %v9356_v8  ;;  %v917_v7 = vld [vmem:[#allocation6 + $0xbb0] sm:$0xff]  ;;  %v914_v8 = vld [vmem:[#allocation6 + $0xb98] sm:$0xff] }
 0x2ce   :  { %v9418_v16 = vcombine.high %v913_v6, %v917_v7  ;;  %v9417_v29 = vcombine.low %v913_v6, %v917_v7  ;;  %v9419_v31 = vcombine.low %v914_v8, %v918_v9  ;;  %v965_v63 = vld [vmem:[#allocation6 + $0xd30] sm:$0xff] }
 0x2cf   :  { %4058 = vmatpush1.bf16.msra.mxu0 %v9353_v25  ;;  %v9420_v25 = vcombine.high %v914_v8, %v918_v9  ;;  %v969_v6 = vld [vmem:[#allocation6 + $0xd50] sm:$0xff]  ;;  %v970_v8 = vld [vmem:[#allocation6 + $0xd58] sm:$0xff] }
 0x2d0   :  { %4230 = vmatpush1.bf16.msra.mxu1 %v9355_v20  ;;  %4059 = vmatprep.subr.bf16.mxu0 %v9362_v26  ;;  %v921_v20 = vld [vmem:[#allocation6 + $0xbd0] sm:$0xff]  ;;  %v974_v9 = vld [vmem:[#allocation6 + $0xd78] sm:$0xff] }
 0x2d1   :  { %4231 = vmatprep.subr.bf16.mxu1 %v9364_v27  ;;  %v925_v26 = vld [vmem:[#allocation6 + $0xbf0] sm:$0xff]  ;;  %v922_v27 = vld [vmem:[#allocation6 + $0xbd8] sm:$0xff] }
 0x2d2   :  { %v9426_v32 = vcombine.high %v921_v20, %v925_v26  ;;  %v9425_v39 = vcombine.low %v921_v20, %v925_v26  ;;  %v973_v7 = vld [vmem:[#allocation6 + $0xd70] sm:$0xff]  ;;  %v9476_v20 = vcombine.high %v970_v8, %v974_v9 }
 0x2d3   :  { %4060 = vmatpush1.bf16.msra.mxu0 %v9361_v33  ;;  %v9428_v33 = vcombine.high %v922_v27, %v926_v28  ;;  %v977_v26 = vld [vmem:[#allocation6 + $0xd90] sm:$0xff] }
 0x2d4   :  { %4232 = vmatpush1.bf16.msra.mxu1 %v9363_v34  ;;  %4061 = vmatprep.subr.bf16.mxu0 %v9370_v35  ;;  %v929_v34 = vld [vmem:[#allocation6 + $0xc10] sm:$0xff] }
 0x2d5   :  { %4233 = vmatprep.subr.bf16.mxu1 %v9372_v36  ;;  %v933_v35 = vld [vmem:[#allocation6 + $0xc30] sm:$0xff]  ;;  %v930_v36 = vld [vmem:[#allocation6 + $0xc18] sm:$0xff] }
 0x2d6   :  { %v9433_v45 = vcombine.low %v929_v34, %v933_v35 }
 0x2d7   :  { %4062 = vmatpush1.bf16.msra.mxu0 %v9369_v40  ;;  %v9427_v40 = vcombine.low %v922_v27, %v926_v28  ;;  %v981_v27 = vld [vmem:[#allocation6 + $0xdb0] sm:$0xff] }
 0x2d8   :  { %4234 = vmatpush1.bf16.msra.mxu1 %v9371_v41  ;;  %4063 = vmatprep.subr.bf16.mxu0 %v9378_v42  ;;  %v9434_v41 = vcombine.high %v929_v34, %v933_v35  ;;  %v9436_v42 = vcombine.high %v930_v36, %v934_v37  ;;  %v9475_v34 = vcombine.low %v970_v8, %v974_v9  ;;  %v1014_v8 = vld [vmem:[#allocation6 + $0xeb8] sm:$0xff] }
 0x2d9   :  { %4235 = vmatprep.subr.bf16.mxu1 %v9380_v43  ;;  %v937_v43 = vld [vmem:[#allocation6 + $0xc50] sm:$0xff]  ;;  %v9482_v35 = vcombine.high %v977_v26, %v981_v27 }
 0x2db   :  { %4064 = vmatpush1.bf16.msra.mxu0 %v9377_v47  ;;  %v942_v47 = vld [vmem:[#allocation6 + $0xc78] sm:$0xff] }
 0x2dc   :  { %4236 = vmatpush1.bf16.msra.mxu1 %v9379_v48  ;;  %4065 = vmatprep.subr.bf16.mxu0 %v9386_v49  ;;  %v9435_v48 = vcombine.low %v930_v36, %v934_v37  ;;  %v9442_v49 = vcombine.high %v937_v43, %v941_v44  ;;  %v9444_v15 = vcombine.high %v938_v46, %v942_v47 }
 0x2dd   :  { %4237 = vmatprep.subr.bf16.mxu1 %v9388_v13  ;;  %v945_v13 = vld [vmem:[#allocation6 + $0xc90] sm:$0xff] }
 0x2de   :  { %v9450_v52 = vcombine.high %v945_v13, %v949_v21 }
 0x2df   :  { %4066 = vmatpush1.bf16.msra.mxu0 %v9385_v19  ;;  %v10863_v19 = vsub.s32 %v4316_v30, %v10790_v22  ;;  %v954_v22 = vld [vmem:[#allocation6 + $0xcd8] sm:$0xff] }
 0x2e0   :  { %4238 = vmatpush1.bf16.msra.mxu1 %v9387_v50  ;;  %4067 = vmatprep.subr.bf16.mxu0 %v9394_v51  ;;  %v9441_v50 = vcombine.low %v937_v43, %v941_v44  ;;  %v10866_v51 = vld.sshfl [vmem:[#allocation7] sm:$0xff pattern:$0x75316420]  ;;  %v986_v44 = vld [vmem:[#allocation6 + $0xdd8] sm:$0xff] }
 0x2e1   :  { %4239 = vmatprep.subr.bf16.mxu1 %v9396_v18  ;;  %v9443_v18 = vcombine.low %v938_v46, %v942_v47  ;;  %v990_v30 = vld [vmem:[#allocation6 + $0xdf8] sm:$0xff]  ;;  %v9481_v47 = vcombine.low %v977_v26, %v981_v27 }
 0x2e2   :  { %v1018_v26 = vld [vmem:[#allocation6 + $0xed8] sm:$0xff] }
 0x2e3   :  { %4068 = vmatpush1.bf16.msra.mxu0 %v9393_v57  ;;  %v958_v57 = vld [vmem:[#allocation6 + $0xcf8] sm:$0xff] }
 0x2e4   :  { %4240 = vmatpush1.bf16.msra.mxu1 %v9395_v58  ;;  %4069 = vmatprep.subr.bf16.mxu0 %v9402_v59  ;;  %v9451_v58 = vcombine.low %v946_v24, %v950_v17  ;;  %v9458_v59 = vcombine.high %v953_v55, %v957_v56  ;;  %v1022_v27 = vld [vmem:[#allocation6 + $0xef8] sm:$0xff] }
 0x2e5   :  { %4241 = vmatprep.subr.bf16.mxu1 %v9404_v60  ;;  %v9460_v60 = vcombine.high %v954_v22, %v958_v57 }
 0x2e7   :  { %4070 = vmatpush1.bf16.msra.mxu0 %v9401_v2  ;;  %v9457_v2 = vcombine.low %v953_v55, %v957_v56 }
 0x2e8   :  { %4242 = vmatpush1.bf16.msra.mxu1 %v9403_v3  ;;  %4071 = vmatprep.subr.bf16.mxu0 %v9410_v4  ;;  %v9459_v3 = vcombine.low %v954_v22, %v958_v57  ;;  %v9466_v4 = vcombine.high %v961_v62, %v965_v63  ;;  %v994_v22 = vld [vmem:[#allocation6 + $0xe18] sm:$0xff] }
 0x2e9   :  { %4243 = vmatprep.subr.bf16.mxu1 %v9412_v5  ;;  %v9468_v5 = vcombine.high %v962_v0, %v966_v1  ;;  %v998_v57 = vld [vmem:[#allocation6 + $0xe38] sm:$0xff] }
 0x2eb   :  { %4072 = vmatpush1.bf16.msra.mxu0 %v9409_v10 }
 0x2ec   :  { %4244 = vmatpush1.bf16.msra.mxu1 %v9411_v12  ;;  %4073 = vmatprep.subr.bf16.mxu0 %v9418_v16  ;;  %v9465_v12 = vcombine.low %v961_v62, %v965_v63  ;;  %v9467_v16 = vcombine.low %v962_v0, %v966_v1  ;;  %v1001_v62 = vld [vmem:[#allocation6 + $0xe50] sm:$0xff]  ;;  %v1002_v0 = vld [vmem:[#allocation6 + $0xe58] sm:$0xff] }
 0x2ed   :  { %4245 = vmatprep.subr.bf16.mxu1 %v9420_v25  ;;  %v9474_v25 = vcombine.high %v969_v6, %v973_v7  ;;  %v1005_v63 = vld [vmem:[#allocation6 + $0xe70] sm:$0xff]  ;;  %v1006_v1 = vld [vmem:[#allocation6 + $0xe78] sm:$0xff] }
 0x2ee   :  { %v9505_v9 = vcombine.low %v1001_v62, %v1005_v63 }
 0x2ef   :  { %4074 = vmatpush1.bf16.msra.mxu0 %v9417_v29 }
 0x2f0   :  { %4246 = vmatpush1.bf16.msra.mxu1 %v9419_v31  ;;  %4075 = vmatprep.subr.bf16.mxu0 %v9426_v32  ;;  %v978_v31 = vld [vmem:[#allocation6 + $0xd98] sm:$0xff] }
 0x2f1   :  { %4247 = vmatprep.subr.bf16.mxu1 %v9428_v33  ;;  %v982_v32 = vld [vmem:[#allocation6 + $0xdb8] sm:$0xff]  ;;  %v9473_v33 = vcombine.low %v969_v6, %v973_v7  ;;  %v1013_v6 = vld [vmem:[#allocation6 + $0xeb0] sm:$0xff] }
 0x2f2   :  { %v9484_v38 = vcombine.high %v978_v31, %v982_v32  ;;  %v1010_v7 = vld [vmem:[#allocation6 + $0xe98] sm:$0xff] }
 0x2f3   :  { %4076 = vmatpush1.bf16.msra.mxu0 %v9425_v39  ;;  %v989_v39 = vld [vmem:[#allocation6 + $0xdf0] sm:$0xff] }
 0x2f4   :  { %4248 = vmatpush1.bf16.msra.mxu1 %v9427_v40  ;;  %4088 = vmatprep.subr.bf16.mxu0 %v9434_v41  ;;  %v9490_v24 = vcombine.high %v985_v11, %v989_v39 }
 0x2f5   :  { %4260 = vmatprep.subr.bf16.mxu1 %v9436_v42 }
 0x2f6   :  { %4078 = vmatmul.mubr.bf16.vlgmr.msra.gmra.mrb[12].mxu0 %v10829_v14 }
 0x2f7   :  { %4250 = vmatmul.mubr.bf16.vlgmr.msra.gmra.mrb[12].mxu1 %v10829_v14  ;;  %4089 = vmatpush1.bf16.msra.mxu0 %v9433_v45  ;;  %v9449_v14 = vcombine.low %v945_v13, %v949_v21 }
 0x2f8   :  { %4120 = vmatprep.mubr.bf16.mxu0 %v10839_v61  ;;  %4261 = vmatpush1.bf16.msra.mxu1 %v9435_v48  ;;  %v9483_v48 = vcombine.low %v978_v31, %v982_v32  ;;  %v9524_v32 = vcombine.high %v1018_v26, %v1022_v27 }
 0x2f9   :  { %4292 = vmatprep.mubr.bf16.mxu1 %v10839_v61  ;;  %4090 = vmatprep.subr.bf16.mxu0 %v9442_v49  ;;  %v4336_v61 = vrot.slane %v10866_v51, %v10863_v19 }
 0x2fa   :  { %4262 = vmatprep.subr.bf16.mxu1 %v9444_v15 }
 0x2fb   :  { %4091 = vmatpush1.bf16.msra.mxu0 %v9441_v50  ;;  %v4358_v10 = vcombine.high %v4336_v61, %v4336_v61  ;;  %v4363_v28 = vpack.i.b16 %v4336_v61, %v4336_v61 }
 0x2fc   :  { %4263 = vmatpush1.bf16.msra.mxu1 %v9443_v18  ;;  %4092 = vmatprep.subr.bf16.mxu0 %v9450_v52  ;;  %v9492_v18 = vcombine.high %v986_v44, %v990_v30  ;;  %v993_v52 = vld [vmem:[#allocation6 + $0xe10] sm:$0xff] }
 0x2fd   :  { %4264 = vmatprep.subr.bf16.mxu1 %v9452_v54  ;;  %v4377_v29 = vpack.i.b16 %v4358_v10, %v4358_v10  ;;  %v4368_v42 = vrot.slane %v4363_v28, %v10793_v23  ;;  %v997_v54 = vld [vmem:[#allocation6 + $0xe30] sm:$0xff]  ;;  %v9507_v10 = vcombine.low %v1002_v0, %v1006_v1 }
 0x2fe   :  { %v9497_v61 = vcombine.low %v993_v52, %v997_v54 }
 0x2ff   :  { %4093 = vmatpush1.bf16.msra.mxu0 %v9449_v14  ;;  %v4382_v43 = vrot.slane %v4377_v29, %v10793_v23  ;;  %v9489_v14 = vcombine.low %v985_v11, %v989_v39  ;;  %v9515_v29 = vcombine.low %v1010_v7, %v1014_v8  ;;  %v9523_v11 = vcombine.low %v1018_v26, %v1022_v27  ;;  %v4454_v26 = vld [vmem:[#allocation9 + $0x60] sm:$0xff] }
 0x300   :  { %4265 = vmatpush1.bf16.msra.mxu1 %v9451_v58  ;;  %4094 = vmatprep.subr.bf16.mxu0 %v9458_v59  ;;  %v9491_v58 = vcombine.low %v986_v44, %v990_v30  ;;  %v9498_v59 = vcombine.high %v993_v52, %v997_v54  ;;  %v1037_v44 = vld [vmem:[#allocation6 + $0xf70] sm:$0xff]  ;;  %v1034_v30 = vld [vmem:[#allocation6 + $0xf58] sm:$0xff] }
 0x301   :  { %4266 = vmatprep.subr.bf16.mxu1 %v9460_v60  ;;  %v9500_v60 = vcombine.high %v994_v22, %v998_v57  ;;  %v1042_v52 = vld [vmem:[#allocation6 + $0xf98] sm:$0xff] }
 0x302   :  { %v1046_v54 = vld [vmem:[#allocation6 + $0xfb8] sm:$0xff] }
 0x303   :  { %4095 = vmatpush1.bf16.msra.mxu0 %v9457_v2  ;;  %v9499_v2 = vcombine.low %v994_v22, %v998_v57 }
 0x304   :  { %4267 = vmatpush1.bf16.msra.mxu1 %v9459_v3  ;;  %4096 = vmatprep.subr.bf16.mxu0 %v9466_v4  ;;  %v9506_v3 = vcombine.high %v1001_v62, %v1005_v63  ;;  %v9508_v4 = vcombine.high %v1002_v0, %v1006_v1  ;;  %v1050_v63 = vld [vmem:[#allocation6 + $0xfd8] sm:$0xff] }
 0x305   :  { %4268 = vmatprep.subr.bf16.mxu1 %v9468_v5  ;;  %v1009_v5 = vld [vmem:[#allocation6 + $0xe90] sm:$0xff]  ;;  %v1054_v0 = vld [vmem:[#allocation6 + $0xff8] sm:$0xff] }
 0x306   :  { %v9513_v28 = vcombine.low %v1009_v5, %v1013_v6 }
 0x307   :  { %4097 = vmatpush1.bf16.msra.mxu0 %v9465_v12  ;;  %v9514_v12 = vcombine.high %v1009_v5, %v1013_v6  ;;  %v4446_v5 = vld [vmem:[#allocation9 + $0x20] sm:$0xff] }
 0x308   :  { %4269 = vmatpush1.bf16.msra.mxu1 %v9467_v16  ;;  %4098 = vmatprep.subr.bf16.mxu0 %v9474_v25  ;;  %v9516_v16 = vcombine.high %v1010_v7, %v1014_v8  ;;  %v1017_v25 = vld [vmem:[#allocation6 + $0xed0] sm:$0xff] }
 0x309   :  { %v3778_v36 = vpop.f32.mrb[8].mxu0  ;;  %v3950_v37 = vpop.f32.mrb[8].mxu1  ;;  %4270 = vmatprep.subr.bf16.mxu1 %v9476_v20  ;;  %v1021_v20 = vld [vmem:[#allocation6 + $0xef0] sm:$0xff] }
 0x30a   :  { %v10872_v40 = vpop.f32.mrb[9].mxu0  ;;  %v10874_v41 = vpop.f32.mrb[9].mxu1  ;;  %v9522_v31 = vcombine.high %v1017_v25, %v1021_v20  ;;  %v4443_v7 = vld [vmem:[#allocation9 + $0x8] sm:$0xff] }
 0x30b   :  { %v3782_v45 = vpop.f32.mrb[10].mxu0  ;;  %v3954_v46 = vpop.f32.mrb[10].mxu1  ;;  %4099 = vmatpush1.bf16.msra.mxu0 %v9473_v33  ;;  %v1025_v33 = vld [vmem:[#allocation6 + $0xf10] sm:$0xff] }
 0x30c   :  { %v4303_v49 = vpack.c.bf16 %v3782_v45, %v3778_v36  ;;  %v4305_v13 = vpack.c.bf16 %v3954_v46, %v3950_v37  ;;  %4271 = vmatpush1.bf16.msra.mxu1 %v9475_v34  ;;  %v10878_v21 = vpop.f32.mrb[11].mxu0  ;;  %v10880_v15 = vpop.f32.mrb[11].mxu1  ;;  %4100 = vmatprep.subr.bf16.mxu0 %v9482_v35  ;;  %v1029_v34 = vld [vmem:[#allocation6 + $0xf30] sm:$0xff]  ;;  %v1026_v35 = vld [vmem:[#allocation6 + $0xf18] sm:$0xff]  ;;  %v9521_v37 = vcombine.low %v1017_v25, %v1021_v20  ;;  %v4450_v20 = vld [vmem:[#allocation9 + $0x40] sm:$0xff] }
 0x30d   :  { %v4304_v17 = vpack.c.bf16 %v10878_v21, %v10872_v40  ;;  %v4306_v50 = vpack.c.bf16 %v10880_v15, %v10874_v41  ;;  %4272 = vmatprep.subr.bf16.mxu1 %v9484_v38  ;;  %v1030_v36 = vld [vmem:[#allocation6 + $0xf38] sm:$0xff]  ;;  %v4328_v38 = vcombine.high %v10866_v51, %v10866_v51  ;;  %v9530_v39 = vcombine.high %v1025_v33, %v1029_v34  ;;  %v4447_v8 = vld [vmem:[#allocation9 + $0x28] sm:$0xff] }
 0x30e   :  { %v10886_v55 = vadd.bf16 %v4368_v42, %v4303_v49  ;;  %v10888_v56 = vadd.bf16 %v4382_v43, %v4305_v13  ;;  %v9532_v42 = vcombine.high %v1026_v35, %v1030_v36  ;;  %v1033_v43 = vld [vmem:[#allocation6 + $0xf50] sm:$0xff]  ;;  %v1038_v45 = vld [vmem:[#allocation6 + $0xf78] sm:$0xff]  ;;  %v9529_v46 = vcombine.low %v1025_v33, %v1029_v34 }
 0x30f   :  { %4101 = vmatpush1.bf16.msra.mxu0 %v9481_v47  ;;  %v10893_v47 = vrot.slane %v4328_v38, %v10863_v19  ;;  %v9538_v49 = vcombine.high %v1033_v43, %v1037_v44  ;;  %v9540_v51 = vcombine.high %v1034_v30, %v1038_v45  ;;  %v1041_v13 = vld [vmem:[#allocation6 + $0xf90] sm:$0xff]  ;;  %v9537_v22 = vcombine.low %v1033_v43, %v1037_v44 }
 0x310   :  { %4273 = vmatpush1.bf16.msra.mxu1 %v9483_v48  ;;  %4102 = vmatprep.subr.bf16.mxu0 %v9490_v24  ;;  %v9531_v48 = vcombine.low %v1026_v35, %v1030_v36  ;;  %v1045_v24 = vld [vmem:[#allocation6 + $0xfb0] sm:$0xff]  ;;  %v9539_v57 = vcombine.low %v1034_v30, %v1038_v45  ;;  %v9559_v40 = vcombine.low %v4443_v7, %v4447_v8 }
 0x311   :  { %4274 = vmatprep.subr.bf16.mxu1 %v9492_v18  ;;  %v4370_v18 = vpack.i.b16 %v10893_v47, %v10893_v47  ;;  %v9545_v1 = vcombine.low %v1041_v13, %v1045_v24  ;;  %v9566_v21 = vcombine.high %v4450_v20, %v4454_v26  ;;  %v4459_v34 = vld [vmem:[#allocation9 + $0x88] sm:$0xff]  ;;  %v9565_v36 = vcombine.low %v4450_v20, %v4454_v26  ;;  %v4506_v26 = vld [vmem:[#allocation9 + $0x200] sm:$0xff] }
 0x312   :  { %v4463_v35 = vld [vmem:[#allocation9 + $0xa8] sm:$0xff] }
 0x313   :  { %4103 = vmatpush1.bf16.msra.mxu0 %v9489_v14  ;;  %v9546_v14 = vcombine.high %v1041_v13, %v1045_v24  ;;  %v4375_v62 = vrot.slane %v4370_v18, %v10793_v23  ;;  %v4467_v43 = vld [vmem:[#allocation9 + $0xc8] sm:$0xff] }
 0x314   :  { %4275 = vmatpush1.bf16.msra.mxu1 %v9491_v58  ;;  %4104 = vmatprep.subr.bf16.mxu0 %v9498_v59  ;;  %v9548_v58 = vcombine.high %v1042_v52, %v1046_v54  ;;  %v1049_v59 = vld [vmem:[#allocation6 + $0xfd0] sm:$0xff] }
 0x315   :  { %4276 = vmatprep.subr.bf16.mxu1 %v9500_v60  ;;  %v1053_v60 = vld [vmem:[#allocation6 + $0xff0] sm:$0xff]  ;;  %v4419_v6 = vadd.bf16 %v4375_v62, %v4304_v17  ;;  %v4458_v17 = vld [vmem:[#allocation9 + $0x80] sm:$0xff] }
 0x316   :  { %v4471_v44 = vld [vmem:[#allocation9 + $0xe8] sm:$0xff] }
 0x317   :  { %4105 = vmatpush1.bf16.msra.mxu0 %v9497_v61  ;;  %v9547_v61 = vcombine.low %v1042_v52, %v1046_v54  ;;  %v4427_v25 = vmul.bf16 1009007652, %v4419_v6  ;;  %v4479_v13 = vld [vmem:[#allocation9 + $0x128] sm:$0xff]  ;;  %v9583_v18 = vcombine.low %v4467_v43, %v4471_v44 }
 0x318   :  { %4277 = vmatpush1.bf16.msra.mxu1 %v9499_v2  ;;  %4106 = vmatprep.subr.bf16.mxu0 %v9506_v3  ;;  %v9554_v2 = vcombine.high %v1049_v59, %v1053_v60  ;;  %v9556_v3 = vcombine.high %v1050_v63, %v1054_v0  ;;  %v4583_v41 = vld [vmem:[#allocation9 + $0x468] sm:$0xff] }
 0x319   :  { %4278 = vmatprep.subr.bf16.mxu1 %v9508_v4  ;;  %v4442_v4 = vld [vmem:[#allocation9] sm:$0xff] }
 0x31a   :  { %v9557_v27 = vcombine.low %v4442_v4, %v4446_v5 }
 0x31b   :  { %4107 = vmatpush1.bf16.msra.mxu0 %v9505_v9  ;;  %v9553_v9 = vcombine.low %v1049_v59, %v1053_v60 }
 0x31c   :  { %4279 = vmatpush1.bf16.msra.mxu1 %v9507_v10  ;;  %4108 = vmatprep.subr.bf16.mxu0 %v9514_v12  ;;  %v9555_v10 = vcombine.low %v1050_v63, %v1054_v0  ;;  %v9558_v12 = vcombine.high %v4442_v4, %v4446_v5  ;;  %v4490_v0 = vld [vmem:[#allocation9 + $0x180] sm:$0xff] }
 0x31d   :  { %4280 = vmatprep.subr.bf16.mxu1 %v9516_v16  ;;  %v9560_v16 = vcombine.high %v4443_v7, %v4447_v8  ;;  %v4498_v7 = vld [vmem:[#allocation9 + $0x1c0] sm:$0xff] }
 0x31e   :  { %v4502_v8 = vld [vmem:[#allocation9 + $0x1e0] sm:$0xff] }
 0x31f   :  { %4109 = vmatpush1.bf16.msra.mxu0 %v9513_v28  ;;  %v4451_v28 = vld [vmem:[#allocation9 + $0x48] sm:$0xff] }
 0x320   :  { %4281 = vmatpush1.bf16.msra.mxu1 %v9515_v29  ;;  %4110 = vmatprep.subr.bf16.mxu0 %v9522_v31  ;;  %v4455_v29 = vld [vmem:[#allocation9 + $0x68] sm:$0xff]  ;;  %v4462_v31 = vld [vmem:[#allocation9 + $0xa0] sm:$0xff] }
 0x321   :  { %4282 = vmatprep.subr.bf16.mxu1 %v9524_v32  ;;  %v10901_v32 = vmax.bf16 %v4427_v25, %v4419_v6  ;;  %v9568_v33 = vcombine.high %v4451_v28, %v4455_v29  ;;  %v9574_v38 = vcombine.high %v4458_v17, %v4462_v31  ;;  %v9573_v30 = vcombine.low %v4458_v17, %v4462_v31 }
 0x322   :  { %v9614_v25 = vcombine.high %v4498_v7, %v4502_v8 }
 0x323   :  { %4111 = vmatpush1.bf16.msra.mxu0 %v9521_v37  ;;  %v9567_v37 = vcombine.low %v4451_v28, %v4455_v29  ;;  %v4507_v28 = vld [vmem:[#allocation9 + $0x208] sm:$0xff] }
 0x324   :  { %4283 = vmatpush1.bf16.msra.mxu1 %v9523_v11  ;;  %4112 = vmatprep.subr.bf16.mxu0 %v9530_v39  ;;  %v9576_v11 = vcombine.high %v4459_v34, %v4463_v35  ;;  %v4466_v39 = vld [vmem:[#allocation9 + $0xc0] sm:$0xff]  ;;  %v4511_v29 = vld [vmem:[#allocation9 + $0x228] sm:$0xff] }
 0x325   :  { %4284 = vmatprep.subr.bf16.mxu1 %v9532_v42  ;;  %v4470_v42 = vld [vmem:[#allocation9 + $0xe0] sm:$0xff]  ;;  %v9624_v31 = vcombine.high %v4507_v28, %v4511_v29 }
 0x326   :  { %v9582_v45 = vcombine.high %v4466_v39, %v4470_v42  ;;  %v9581_v24 = vcombine.low %v4466_v39, %v4470_v42  ;;  %v4522_v42 = vld [vmem:[#allocation9 + $0x280] sm:$0xff] }
 0x327   :  { %4113 = vmatpush1.bf16.msra.mxu0 %v9529_v46  ;;  %v9584_v46 = vcombine.high %v4467_v43, %v4471_v44  ;;  %v4526_v43 = vld [vmem:[#allocation9 + $0x2a0] sm:$0xff]  ;;  %v4523_v44 = vld [vmem:[#allocation9 + $0x288] sm:$0xff] }
 0x328   :  { %4285 = vmatpush1.bf16.msra.mxu1 %v9531_v48  ;;  %4114 = vmatprep.subr.bf16.mxu0 %v9538_v49  ;;  %v4474_v48 = vld [vmem:[#allocation9 + $0x100] sm:$0xff] }
 0x329   :  { %4286 = vmatprep.subr.bf16.mxu1 %v9540_v51  ;;  %v4478_v49 = vld [vmem:[#allocation9 + $0x120] sm:$0xff]  ;;  %v4475_v51 = vld [vmem:[#allocation9 + $0x108] sm:$0xff] }
 0x32a   :  { %v9590_v52 = vcombine.high %v4474_v48, %v4478_v49  ;;  %v9592_v54 = vcombine.high %v4475_v51, %v4479_v13  ;;  %v9589_v59 = vcombine.low %v4474_v48, %v4478_v49  ;;  %v9591_v60 = vcombine.low %v4475_v51, %v4479_v13  ;;  %v4530_v49 = vld [vmem:[#allocation9 + $0x2c0] sm:$0xff]  ;;  %v4531_v13 = vld [vmem:[#allocation9 + $0x2c8] sm:$0xff] }
 0x32b   :  { %4115 = vmatpush1.bf16.msra.mxu0 %v9537_v22  ;;  %v4482_v22 = vld [vmem:[#allocation9 + $0x140] sm:$0xff] }
 0x32c   :  { %4287 = vmatpush1.bf16.msra.mxu1 %v9539_v57  ;;  %4116 = vmatprep.subr.bf16.mxu0 %v9546_v14  ;;  %v4486_v57 = vld [vmem:[#allocation9 + $0x160] sm:$0xff]  ;;  %v4483_v14 = vld [vmem:[#allocation9 + $0x148] sm:$0xff] }
 0x32d   :  { %4288 = vmatprep.subr.bf16.mxu1 %v9548_v58  ;;  %v4487_v58 = vld [vmem:[#allocation9 + $0x168] sm:$0xff]  ;;  %v9598_v62 = vcombine.high %v4482_v22, %v4486_v57  ;;  %v4534_v51 = vld [vmem:[#allocation9 + $0x2e0] sm:$0xff] }
 0x32e   :  { %v9600_v63 = vcombine.high %v4483_v14, %v4487_v58  ;;  %v9599_v4 = vcombine.low %v4483_v14, %v4487_v58  ;;  %v4542_v14 = vld [vmem:[#allocation9 + $0x320] sm:$0xff]  ;;  %v4539_v58 = vld [vmem:[#allocation9 + $0x308] sm:$0xff] }
 0x32f   :  { %4117 = vmatpush1.bf16.msra.mxu0 %v9545_v1  ;;  %v4494_v1 = vld [vmem:[#allocation9 + $0x1a0] sm:$0xff] }
 0x330   :  { %4289 = vmatpush1.bf16.msra.mxu1 %v9547_v61  ;;  %4118 = vmatprep.subr.bf16.mxu0 %v9554_v2  ;;  %v4491_v61 = vld [vmem:[#allocation9 + $0x188] sm:$0xff]  ;;  %v9606_v5 = vcombine.high %v4490_v0, %v4494_v1 }
 0x331   :  { %4290 = vmatprep.subr.bf16.mxu1 %v9556_v3  ;;  %v4495_v2 = vld [vmem:[#allocation9 + $0x1a8] sm:$0xff]  ;;  %v9597_v3 = vcombine.low %v4482_v22, %v4486_v57  ;;  %v4538_v57 = vld [vmem:[#allocation9 + $0x300] sm:$0xff] }
 0x332   :  { %v9608_v6 = vcombine.high %v4491_v61, %v4495_v2 }
 0x333   :  { %4119 = vmatpush1.bf16.msra.mxu0 %v9553_v9  ;;  %v4499_v9 = vld [vmem:[#allocation9 + $0x1c8] sm:$0xff] }
 0x334   :  { %4291 = vmatpush1.bf16.msra.mxu1 %v9555_v10  ;;  %7514 = vmatprep.subr.bf16.mxu0 %v9558_v12  ;;  %v4503_v10 = vld [vmem:[#allocation9 + $0x1e8] sm:$0xff]  ;;  %v9605_v12 = vcombine.low %v4490_v0, %v4494_v1  ;;  %v4546_v1 = vld [vmem:[#allocation9 + $0x340] sm:$0xff] }
 0x335   :  { %7686 = vmatprep.subr.bf16.mxu1 %v9560_v16  ;;  %v9607_v16 = vcombine.low %v4491_v61, %v4495_v2  ;;  %v9616_v20 = vcombine.high %v4499_v9, %v4503_v10  ;;  %v4550_v61 = vld [vmem:[#allocation9 + $0x360] sm:$0xff]  ;;  %v4360_v2 = vcombine.high %v10893_v47, %v10893_v47 }
 0x336   :  { %4121 = vmatmul.mubr.bf16.vlgmr.msra.gmra.mrb[12].mxu0 %v10837_v53 }
 0x337   :  { %4293 = vmatmul.mubr.bf16.vlgmr.msra.gmra.mrb[12].mxu1 %v10837_v53  ;;  %7515 = vmatpush1.bf16.msra.mxu0 %v9557_v27  ;;  %v9575_v53 = vcombine.low %v4459_v34, %v4463_v35  ;;  %v4510_v27 = vld [vmem:[#allocation9 + $0x220] sm:$0xff]  ;;  %v4515_v35 = vld [vmem:[#allocation9 + $0x248] sm:$0xff] }
 0x338   :  { %7546 = vmatprep.mubr.bf16.mxu0 %v10901_v32  ;;  %7687 = vmatpush1.bf16.msra.mxu1 %v9559_v40  ;;  %v9613_v40 = vcombine.low %v4498_v7, %v4502_v8  ;;  %v9622_v17 = vcombine.high %v4506_v26, %v4510_v27  ;;  %v4518_v34 = vld [vmem:[#allocation9 + $0x260] sm:$0xff]  ;;  %v9662_v7 = vcombine.high %v4546_v1, %v4550_v61 }
 0x339   :  { %7718 = vmatprep.mubr.bf16.mxu1 %v10901_v32  ;;  %7516 = vmatprep.subr.bf16.mxu0 %v9566_v21  ;;  %v9615_v21 = vcombine.low %v4499_v9, %v4503_v10  ;;  %v4554_v9 = vld [vmem:[#allocation9 + $0x380] sm:$0xff] }
 0x33a   :  { %7688 = vmatprep.subr.bf16.mxu1 %v9568_v33  ;;  %v4514_v33 = vld [vmem:[#allocation9 + $0x240] sm:$0xff] }
 0x33b   :  { %7517 = vmatpush1.bf16.msra.mxu0 %v9565_v36  ;;  %v4519_v36 = vld [vmem:[#allocation9 + $0x268] sm:$0xff]  ;;  %v4558_v10 = vld [vmem:[#allocation9 + $0x3a0] sm:$0xff] }
 0x33c   :  { %7689 = vmatpush1.bf16.msra.mxu1 %v9567_v37  ;;  %7518 = vmatprep.subr.bf16.mxu0 %v9574_v38  ;;  %v9621_v37 = vcombine.low %v4506_v26, %v4510_v27  ;;  %v9623_v38 = vcombine.low %v4507_v28, %v4511_v29  ;;  %v9632_v39 = vcombine.high %v4515_v35, %v4519_v36  ;;  %v4562_v28 = vld [vmem:[#allocation9 + $0x3c0] sm:$0xff] }
 0x33d   :  { %7690 = vmatprep.subr.bf16.mxu1 %v9576_v11  ;;  %v9630_v11 = vcombine.high %v4514_v33, %v4518_v34  ;;  %v9670_v26 = vcombine.high %v4554_v9, %v4558_v10  ;;  %v4566_v29 = vld [vmem:[#allocation9 + $0x3e0] sm:$0xff] }
 0x33f   :  { %7519 = vmatpush1.bf16.msra.mxu0 %v9573_v30  ;;  %v4527_v30 = vld [vmem:[#allocation9 + $0x2a8] sm:$0xff] }
 0x340   :  { %7691 = vmatpush1.bf16.msra.mxu1 %v9575_v53  ;;  %7520 = vmatprep.subr.bf16.mxu0 %v9582_v45  ;;  %v9629_v53 = vcombine.low %v4514_v33, %v4518_v34  ;;  %v9631_v45 = vcombine.low %v4515_v35, %v4519_v36  ;;  %v9640_v48 = vcombine.high %v4523_v44, %v4527_v30  ;;  %v4570_v36 = vld [vmem:[#allocation9 + $0x400] sm:$0xff] }
 0x341   :  { %7692 = vmatprep.subr.bf16.mxu1 %v9584_v46  ;;  %v9638_v46 = vcombine.high %v4522_v42, %v4526_v43  ;;  %v9678_v34 = vcombine.high %v4562_v28, %v4566_v29 }
 0x343   :  { %7521 = vmatpush1.bf16.msra.mxu0 %v9581_v24  ;;  %v4535_v24 = vld [vmem:[#allocation9 + $0x2e8] sm:$0xff] }
 0x344   :  { %7693 = vmatpush1.bf16.msra.mxu1 %v9583_v18  ;;  %7522 = vmatprep.subr.bf16.mxu0 %v9590_v52  ;;  %v9637_v18 = vcombine.low %v4522_v42, %v4526_v43  ;;  %v9639_v52 = vcombine.low %v4523_v44, %v4527_v30  ;;  %v9648_v22 = vcombine.high %v4531_v13, %v4535_v24  ;;  %v4426_v43 = vmul.bf16 1009007652, %v10886_v55 }
 0x345   :  { %7694 = vmatprep.subr.bf16.mxu1 %v9592_v54  ;;  %v9646_v54 = vcombine.high %v4530_v49, %v4534_v51  ;;  %v9677_v42 = vcombine.low %v4562_v28, %v4566_v29 }
 0x346   :  { %v10915_v15 = vmax.bf16 %v4426_v43, %v10886_v55 }
 0x347   :  { %7523 = vmatpush1.bf16.msra.mxu0 %v9589_v59  ;;  %v4543_v59 = vld [vmem:[#allocation9 + $0x328] sm:$0xff] }
 0x348   :  { %7695 = vmatpush1.bf16.msra.mxu1 %v9591_v60  ;;  %7524 = vmatprep.subr.bf16.mxu0 %v9598_v62  ;;  %v9645_v60 = vcombine.low %v4530_v49, %v4534_v51  ;;  %v9647_v62 = vcombine.low %v4531_v13, %v4535_v24  ;;  %v9656_v0 = vcombine.high %v4539_v58, %v4543_v59  ;;  %v4579_v51 = vld [vmem:[#allocation9 + $0x448] sm:$0xff]  ;;  %v4586_v24 = vld [vmem:[#allocation9 + $0x480] sm:$0xff] }
 0x349   :  { %7696 = vmatprep.subr.bf16.mxu1 %v9600_v63  ;;  %v9654_v63 = vcombine.high %v4538_v57, %v4542_v14  ;;  %v9695_v55 = vcombine.low %v4579_v51, %v4583_v41 }
 0x34b   :  { %7525 = vmatpush1.bf16.msra.mxu0 %v9597_v3  ;;  %v4547_v3 = vld [vmem:[#allocation9 + $0x348] sm:$0xff] }
 0x34c   :  { %7697 = vmatpush1.bf16.msra.mxu1 %v9599_v4  ;;  %7526 = vmatprep.subr.bf16.mxu0 %v9606_v5  ;;  %v4551_v4 = vld [vmem:[#allocation9 + $0x368] sm:$0xff]  ;;  %v9653_v5 = vcombine.low %v4538_v57, %v4542_v14 }
 0x34d   :  { %7698 = vmatprep.subr.bf16.mxu1 %v9608_v6  ;;  %v9655_v6 = vcombine.low %v4539_v58, %v4543_v59  ;;  %v9664_v8 = vcombine.high %v4547_v3, %v4551_v4  ;;  %v9663_v47 = vcombine.low %v4547_v3, %v4551_v4  ;;  %v4591_v57 = vld [vmem:[#allocation9 + $0x4a8] sm:$0xff]  ;;  %v4602_v4 = vld [vmem:[#allocation9 + $0x500] sm:$0xff] }
 0x34f   :  { %7527 = vmatpush1.bf16.msra.mxu0 %v9605_v12  ;;  %v4384_v12 = vpack.i.b16 %v4360_v2, %v4360_v2 }
 0x350   :  { %7699 = vmatpush1.bf16.msra.mxu1 %v9607_v16  ;;  %7528 = vmatprep.subr.bf16.mxu0 %v9614_v25  ;;  %v4555_v16 = vld [vmem:[#allocation9 + $0x388] sm:$0xff] }
 0x351   :  { %7700 = vmatprep.subr.bf16.mxu1 %v9616_v20  ;;  %v4559_v25 = vld [vmem:[#allocation9 + $0x3a8] sm:$0xff]  ;;  %v9661_v20 = vcombine.low %v4546_v1, %v4550_v61 }
 0x352   :  { %v9672_v27 = vcombine.high %v4555_v16, %v4559_v25  ;;  %v9671_v33 = vcombine.low %v4555_v16, %v4559_v25  ;;  %v4610_v16 = vld [vmem:[#allocation9 + $0x540] sm:$0xff] }
 0x353   :  { %7529 = vmatpush1.bf16.msra.mxu0 %v9613_v40  ;;  %v4389_v40 = vrot.slane %v4384_v12, %v10793_v23  ;;  %v4614_v25 = vld [vmem:[#allocation9 + $0x560] sm:$0xff] }
 0x354   :  { %7701 = vmatpush1.bf16.msra.mxu1 %v9615_v21  ;;  %7530 = vmatprep.subr.bf16.mxu0 %v9622_v17  ;;  %v4563_v21 = vld [vmem:[#allocation9 + $0x3c8] sm:$0xff]  ;;  %v9726_v28 = vcombine.high %v4610_v16, %v4614_v25 }
 0x355   :  { %7702 = vmatprep.subr.bf16.mxu1 %v9624_v31  ;;  %v4567_v17 = vld [vmem:[#allocation9 + $0x3e8] sm:$0xff]  ;;  %v9669_v31 = vcombine.low %v4554_v9, %v4558_v10 }
 0x356   :  { %v9680_v35 = vcombine.high %v4563_v21, %v4567_v17  ;;  %v9679_v44 = vcombine.low %v4563_v21, %v4567_v17  ;;  %v4622_v21 = vld [vmem:[#allocation9 + $0x5a0] sm:$0xff]  ;;  %v4619_v17 = vld [vmem:[#allocation9 + $0x588] sm:$0xff] }
 0x357   :  { %7531 = vmatpush1.bf16.msra.mxu0 %v9621_v37  ;;  %v4574_v37 = vld [vmem:[#allocation9 + $0x420] sm:$0xff] }
 0x358   :  { %7703 = vmatpush1.bf16.msra.mxu1 %v9623_v38  ;;  %7532 = vmatprep.subr.bf16.mxu0 %v9630_v11  ;;  %v4421_v38 = vadd.bf16 %v4389_v40, %v4306_v50  ;;  %v4571_v11 = vld [vmem:[#allocation9 + $0x408] sm:$0xff]  ;;  %v9686_v30 = vcombine.high %v4570_v36, %v4574_v37  ;;  %v9685_v49 = vcombine.low %v4570_v36, %v4574_v37  ;;  %v4618_v40 = vld [vmem:[#allocation9 + $0x580] sm:$0xff] }
 0x359   :  { %7704 = vmatprep.subr.bf16.mxu1 %v9632_v39  ;;  %v4575_v39 = vld [vmem:[#allocation9 + $0x428] sm:$0xff]  ;;  %v4626_v37 = vld [vmem:[#allocation9 + $0x5c0] sm:$0xff] }
 0x35a   :  { %v9687_v50 = vcombine.low %v4571_v11, %v4575_v39 }
 0x35b   :  { %7533 = vmatpush1.bf16.msra.mxu0 %v9629_v53  ;;  %v9688_v53 = vcombine.high %v4571_v11, %v4575_v39  ;;  %v4627_v11 = vld [vmem:[#allocation9 + $0x5c8] sm:$0xff] }
 0x35c   :  { %7705 = vmatpush1.bf16.msra.mxu1 %v9631_v45  ;;  %7534 = vmatprep.subr.bf16.mxu0 %v9638_v46  ;;  %v4429_v45 = vmul.bf16 1009007652, %v4421_v38  ;;  %v4578_v46 = vld [vmem:[#allocation9 + $0x440] sm:$0xff]  ;;  %v4631_v39 = vld [vmem:[#allocation9 + $0x5e8] sm:$0xff] }
 0x35d   :  { %7706 = vmatprep.subr.bf16.mxu1 %v9640_v48  ;;  %v4582_v48 = vld [vmem:[#allocation9 + $0x460] sm:$0xff] }
 0x35e   :  { %v9694_v13 = vcombine.high %v4578_v46, %v4582_v48  ;;  %v9693_v14 = vcombine.low %v4578_v46, %v4582_v48  ;;  %v4635_v46 = vld [vmem:[#allocation9 + $0x608] sm:$0xff] }
 0x35f   :  { %7535 = vmatpush1.bf16.msra.mxu0 %v9637_v18  ;;  %v4590_v18 = vld [vmem:[#allocation9 + $0x4a0] sm:$0xff]  ;;  %v4639_v48 = vld [vmem:[#allocation9 + $0x628] sm:$0xff] }
 0x360   :  { %7707 = vmatpush1.bf16.msra.mxu1 %v9639_v52  ;;  %7536 = vmatprep.subr.bf16.mxu0 %v9646_v54  ;;  %v10917_v52 = vmax.bf16 %v4429_v45, %v4421_v38  ;;  %v9696_v54 = vcombine.high %v4579_v51, %v4583_v41  ;;  %v9702_v58 = vcombine.high %v4586_v24, %v4590_v18  ;;  %v4630_v38 = vld [vmem:[#allocation9 + $0x5e0] sm:$0xff] }
 0x361   :  { %7708 = vmatprep.subr.bf16.mxu1 %v9648_v22  ;;  %v4587_v22 = vld [vmem:[#allocation9 + $0x488] sm:$0xff]  ;;  %v9701_v1 = vcombine.low %v4586_v24, %v4590_v18  ;;  %v4638_v45 = vld [vmem:[#allocation9 + $0x620] sm:$0xff]  ;;  %v9743_v51 = vcombine.low %v4627_v11, %v4631_v39 }
 0x362   :  { %v9704_v59 = vcombine.high %v4587_v22, %v4591_v57  ;;  %v9703_v61 = vcombine.low %v4587_v22, %v4591_v57  ;;  %v4646_v24 = vld [vmem:[#allocation9 + $0x660] sm:$0xff]  ;;  %v4643_v18 = vld [vmem:[#allocation9 + $0x648] sm:$0xff]  ;;  %v9751_v57 = vcombine.low %v4635_v46, %v4639_v48 }
 0x363   :  { %7537 = vmatpush1.bf16.msra.mxu0 %v9645_v60  ;;  %v4594_v60 = vld [vmem:[#allocation9 + $0x4c0] sm:$0xff] }
 0x364   :  { %7709 = vmatpush1.bf16.msra.mxu1 %v9647_v62  ;;  %7538 = vmatprep.subr.bf16.mxu0 %v9654_v63  ;;  %v4598_v62 = vld [vmem:[#allocation9 + $0x4e0] sm:$0xff]  ;;  %v4595_v63 = vld [vmem:[#allocation9 + $0x4c8] sm:$0xff] }
 0x365   :  { %7710 = vmatprep.subr.bf16.mxu1 %v9656_v0  ;;  %v4599_v0 = vld [vmem:[#allocation9 + $0x4e8] sm:$0xff]  ;;  %v9710_v2 = vcombine.high %v4594_v60, %v4598_v62 }
 0x366   :  { %v9712_v3 = vcombine.high %v4595_v63, %v4599_v0  ;;  %v9711_v9 = vcombine.low %v4595_v63, %v4599_v0 }
 0x367   :  { %7539 = vmatpush1.bf16.msra.mxu0 %v9653_v5  ;;  %v4606_v5 = vld [vmem:[#allocation9 + $0x520] sm:$0xff] }
 0x368   :  { %7711 = vmatpush1.bf16.msra.mxu1 %v9655_v6  ;;  %7540 = vmatprep.subr.bf16.mxu0 %v9662_v7  ;;  %v4603_v6 = vld [vmem:[#allocation9 + $0x508] sm:$0xff]  ;;  %v9718_v10 = vcombine.high %v4602_v4, %v4606_v5 }
 0x369   :  { %7712 = vmatprep.subr.bf16.mxu1 %v9664_v8  ;;  %v4607_v7 = vld [vmem:[#allocation9 + $0x528] sm:$0xff]  ;;  %v9709_v8 = vcombine.low %v4594_v60, %v4598_v62 }
 0x36a   :  { %v9720_v12 = vcombine.high %v4603_v6, %v4607_v7  ;;  %v4651_v60 = vld [vmem:[#allocation9 + $0x688] sm:$0xff] }
 0x36b   :  { %7541 = vmatpush1.bf16.msra.mxu0 %v9661_v20  ;;  %v4611_v20 = vld [vmem:[#allocation9 + $0x548] sm:$0xff] }
 0x36c   :  { %7713 = vmatpush1.bf16.msra.mxu1 %v9663_v47  ;;  %7542 = vmatprep.subr.bf16.mxu0 %v9670_v26  ;;  %v4615_v47 = vld [vmem:[#allocation9 + $0x568] sm:$0xff]  ;;  %v9717_v26 = vcombine.low %v4602_v4, %v4606_v5 }
 0x36d   :  { %7714 = vmatprep.subr.bf16.mxu1 %v9672_v27  ;;  %v9719_v27 = vcombine.low %v4603_v6, %v4607_v7  ;;  %v9728_v29 = vcombine.high %v4611_v20, %v4615_v47  ;;  %v4655_v62 = vld [vmem:[#allocation9 + $0x6a8] sm:$0xff] }
 0x36e   :  { %v4659_v4 = vld [vmem:[#allocation9 + $0x6c8] sm:$0xff]  ;;  %v9767_v7 = vcombine.low %v4651_v60, %v4655_v62 }
 0x36f   :  { %7543 = vmatpush1.bf16.msra.mxu0 %v9669_v31  ;;  %v4623_v31 = vld [vmem:[#allocation9 + $0x5a8] sm:$0xff] }
 0x370   :  { %7715 = vmatpush1.bf16.msra.mxu1 %v9671_v33  ;;  %7544 = vmatprep.subr.bf16.mxu0 %v9678_v34  ;;  %v9725_v33 = vcombine.low %v4610_v16, %v4614_v25  ;;  %v9727_v34 = vcombine.low %v4611_v20, %v4615_v47  ;;  %v9736_v36 = vcombine.high %v4619_v17, %v4623_v31  ;;  %v4663_v5 = vld [vmem:[#allocation9 + $0x6e8] sm:$0xff] }
 0x371   :  { %7716 = vmatprep.subr.bf16.mxu1 %v9680_v35  ;;  %v9734_v35 = vcombine.high %v4618_v40, %v4622_v21  ;;  %v9735_v43 = vcombine.low %v4619_v17, %v4623_v31  ;;  %v4667_v16 = vld [vmem:[#allocation9 + $0x708] sm:$0xff]  ;;  %v9775_v47 = vcombine.low %v4659_v4, %v4663_v5 }
 0x372   :  { %v4671_v25 = vld [vmem:[#allocation9 + $0x728] sm:$0xff] }
 0x373   :  { %7545 = vmatpush1.bf16.msra.mxu0 %v9677_v42  ;;  %v9733_v42 = vcombine.low %v4618_v40, %v4622_v21  ;;  %v4675_v40 = vld [vmem:[#allocation9 + $0x748] sm:$0xff]  ;;  %v9783_v31 = vcombine.low %v4667_v16, %v4671_v25 }
 0x374   :  { %7717 = vmatpush1.bf16.msra.mxu1 %v9679_v44  ;;  %7557 = vmatprep.subr.bf16.mxu0 %v9686_v30  ;;  %v9742_v44 = vcombine.high %v4626_v37, %v4630_v38  ;;  %v9744_v30 = vcombine.high %v4627_v11, %v4631_v39  ;;  %v4679_v21 = vld [vmem:[#allocation9 + $0x768] sm:$0xff] }
 0x375   :  { %7729 = vmatprep.subr.bf16.mxu1 %v9688_v53  ;;  %v4634_v53 = vld [vmem:[#allocation9 + $0x600] sm:$0xff]  ;;  %v9791_v39 = vcombine.low %v4675_v40, %v4679_v21 }
 0x376   :  { %7547 = vmatmul.mubr.bf16.vlgmr.msra.gmra.mrb[16].mxu0 %v10915_v15  ;;  %v9750_v41 = vcombine.high %v4634_v53, %v4638_v45  ;;  %v9749_v22 = vcombine.low %v4634_v53, %v4638_v45  ;;  %v4691_v53 = vld [vmem:[#allocation9 + $0x7c8] sm:$0xff] }
 0x377   :  { %7719 = vmatmul.mubr.bf16.vlgmr.msra.gmra.mrb[16].mxu1 %v10915_v15  ;;  %7558 = vmatpush1.bf16.msra.mxu0 %v9685_v49  ;;  %v9741_v49 = vcombine.low %v4626_v37, %v4630_v38  ;;  %v4683_v37 = vld [vmem:[#allocation9 + $0x788] sm:$0xff] }
 0x378   :  { %7589 = vmatprep.mubr.bf16.mxu0 %v10917_v52  ;;  %7730 = vmatpush1.bf16.msra.mxu1 %v9687_v50  ;;  %v9752_v50 = vcombine.high %v4635_v46, %v4639_v48  ;;  %v4687_v38 = vld [vmem:[#allocation9 + $0x7a8] sm:$0xff] }
 0x379   :  { %7761 = vmatprep.mubr.bf16.mxu1 %v10917_v52  ;;  %7559 = vmatprep.subr.bf16.mxu0 %v9694_v13  ;;  %v4642_v13 = vld [vmem:[#allocation9 + $0x640] sm:$0xff]  ;;  %v4695_v45 = vld [vmem:[#allocation9 + $0x7e8] sm:$0xff]  ;;  %v9799_v48 = vcombine.low %v4683_v37, %v4687_v38 }
 0x37a   :  { %7731 = vmatprep.subr.bf16.mxu1 %v9696_v54  ;;  %v4647_v54 = vld [vmem:[#allocation9 + $0x668] sm:$0xff]  ;;  %v9757_v63 = vcombine.low %v4642_v13, %v4646_v24 }
 0x37b   :  { %7560 = vmatpush1.bf16.msra.mxu0 %v9693_v14  ;;  %v9758_v14 = vcombine.high %v4642_v13, %v4646_v24  ;;  %v9759_v0 = vcombine.low %v4643_v18, %v4647_v54  ;;  %v4699_v13 = vld [vmem:[#allocation9 + $0x808] sm:$0xff] }
 0x37c   :  { %7732 = vmatpush1.bf16.msra.mxu1 %v9695_v55  ;;  %7561 = vmatprep.subr.bf16.mxu0 %v9702_v58  ;;  %v9760_v55 = vcombine.high %v4643_v18, %v4647_v54  ;;  %v4650_v58 = vld [vmem:[#allocation9 + $0x680] sm:$0xff]  ;;  %v4703_v24 = vld [vmem:[#allocation9 + $0x828] sm:$0xff]  ;;  %v4428_v54 = vmul.bf16 1009007652, %v10888_v56 }
 0x37d   :  { %7733 = vmatprep.subr.bf16.mxu1 %v9704_v59  ;;  %v4654_v59 = vld [vmem:[#allocation9 + $0x6a0] sm:$0xff] }
 0x37e   :  { %v9765_v6 = vcombine.low %v4650_v58, %v4654_v59 }
 0x37f   :  { %7562 = vmatpush1.bf16.msra.mxu0 %v9701_v1  ;;  %v9766_v1 = vcombine.high %v4650_v58, %v4654_v59  ;;  %v4710_v58 = vld [vmem:[#allocation9 + $0x860] sm:$0xff]  ;;  %v4707_v59 = vld [vmem:[#allocation9 + $0x848] sm:$0xff] }
 0x380   :  { %7734 = vmatpush1.bf16.msra.mxu1 %v9703_v61  ;;  %7563 = vmatprep.subr.bf16.mxu0 %v9710_v2  ;;  %v9768_v61 = vcombine.high %v4651_v60, %v4655_v62  ;;  %v4658_v2 = vld [vmem:[#allocation9 + $0x6c0] sm:$0xff]  ;;  %v4711_v60 = vld [vmem:[#allocation9 + $0x868] sm:$0xff] }
 0x381   :  { %7735 = vmatprep.subr.bf16.mxu1 %v9712_v3  ;;  %v4662_v3 = vld [vmem:[#allocation9 + $0x6e0] sm:$0xff] }
 0x382   :  { %v9773_v20 = vcombine.low %v4658_v2, %v4662_v3 }
 0x383   :  { %7564 = vmatpush1.bf16.msra.mxu0 %v9709_v8  ;;  %v9774_v8 = vcombine.high %v4658_v2, %v4662_v3  ;;  %v4714_v2 = vld [vmem:[#allocation9 + $0x880] sm:$0xff] }
 0x384   :  { %7736 = vmatpush1.bf16.msra.mxu1 %v9711_v9  ;;  %7565 = vmatprep.subr.bf16.mxu0 %v9718_v10  ;;  %v9776_v9 = vcombine.high %v4659_v4, %v4663_v5  ;;  %v4666_v10 = vld [vmem:[#allocation9 + $0x700] sm:$0xff]  ;;  %v4715_v4 = vld [vmem:[#allocation9 + $0x888] sm:$0xff] }
 0x385   :  { %7737 = vmatprep.subr.bf16.mxu1 %v9720_v12  ;;  %v4670_v12 = vld [vmem:[#allocation9 + $0x720] sm:$0xff]  ;;  %v4719_v5 = vld [vmem:[#allocation9 + $0x8a8] sm:$0xff] }
 0x386   :  { %v9781_v17 = vcombine.low %v4666_v10, %v4670_v12  ;;  %v4718_v3 = vld [vmem:[#allocation9 + $0x8a0] sm:$0xff] }
 0x387   :  { %7566 = vmatpush1.bf16.msra.mxu0 %v9717_v26  ;;  %v9782_v26 = vcombine.high %v4666_v10, %v4670_v12  ;;  %v4726_v10 = vld [vmem:[#allocation9 + $0x8e0] sm:$0xff]  ;;  %v4723_v12 = vld [vmem:[#allocation9 + $0x8c8] sm:$0xff] }
 0x388   :  { %7738 = vmatpush1.bf16.msra.mxu1 %v9719_v27  ;;  %7567 = vmatprep.subr.bf16.mxu0 %v9726_v28  ;;  %v9784_v27 = vcombine.high %v4667_v16, %v4671_v25  ;;  %v4674_v28 = vld [vmem:[#allocation9 + $0x740] sm:$0xff]  ;;  %v4727_v16 = vld [vmem:[#allocation9 + $0x8e8] sm:$0xff]  ;;  %v9829_v25 = vcombine.low %v4714_v2, %v4718_v3 }
 0x389   :  { %7739 = vmatprep.subr.bf16.mxu1 %v9728_v29  ;;  %v4678_v29 = vld [vmem:[#allocation9 + $0x760] sm:$0xff] }
 0x38a   :  { %v9789_v11 = vcombine.low %v4674_v28, %v4678_v29 }
 0x38b   :  { %7568 = vmatpush1.bf16.msra.mxu0 %v9725_v33  ;;  %v9790_v33 = vcombine.high %v4674_v28, %v4678_v29  ;;  %v4734_v28 = vld [vmem:[#allocation9 + $0x920] sm:$0xff]  ;;  %v4731_v29 = vld [vmem:[#allocation9 + $0x908] sm:$0xff] }
 0x38c   :  { %7740 = vmatpush1.bf16.msra.mxu1 %v9727_v34  ;;  %7569 = vmatprep.subr.bf16.mxu0 %v9734_v35  ;;  %v9792_v34 = vcombine.high %v4675_v40, %v4679_v21  ;;  %v4682_v35 = vld [vmem:[#allocation9 + $0x780] sm:$0xff]  ;;  %v4735_v40 = vld [vmem:[#allocation9 + $0x928] sm:$0xff] }
 0x38d   :  { %7741 = vmatprep.subr.bf16.mxu1 %v9736_v36  ;;  %v4686_v36 = vld [vmem:[#allocation9 + $0x7a0] sm:$0xff] }
 0x38e   :  { %v9797_v46 = vcombine.low %v4682_v35, %v4686_v36 }
 0x38f   :  { %7570 = vmatpush1.bf16.msra.mxu0 %v9733_v42  ;;  %v9798_v42 = vcombine.high %v4682_v35, %v4686_v36  ;;  %v4742_v35 = vld [vmem:[#allocation9 + $0x960] sm:$0xff]  ;;  %v4739_v36 = vld [vmem:[#allocation9 + $0x948] sm:$0xff] }
 0x390   :  { %7742 = vmatpush1.bf16.msra.mxu1 %v9735_v43  ;;  %7571 = vmatprep.subr.bf16.mxu0 %v9742_v44  ;;  %v9800_v43 = vcombine.high %v4683_v37, %v4687_v38  ;;  %v4690_v44 = vld [vmem:[#allocation9 + $0x7c0] sm:$0xff]  ;;  %v4743_v37 = vld [vmem:[#allocation9 + $0x968] sm:$0xff] }
 0x391   :  { %7743 = vmatprep.subr.bf16.mxu1 %v9744_v30  ;;  %v4694_v30 = vld [vmem:[#allocation9 + $0x7e0] sm:$0xff] }
 0x392   :  { %v9805_v18 = vcombine.low %v4690_v44, %v4694_v30 }
 0x393   :  { %7572 = vmatpush1.bf16.msra.mxu0 %v9741_v49  ;;  %v9806_v49 = vcombine.high %v4690_v44, %v4694_v30  ;;  %v4750_v44 = vld [vmem:[#allocation9 + $0x9a0] sm:$0xff]  ;;  %v4747_v30 = vld [vmem:[#allocation9 + $0x988] sm:$0xff] }
 0x394   :  { %7744 = vmatpush1.bf16.msra.mxu1 %v9743_v51  ;;  %7573 = vmatprep.subr.bf16.mxu0 %v9750_v41  ;;  %v9808_v51 = vcombine.high %v4691_v53, %v4695_v45  ;;  %v4698_v41 = vld [vmem:[#allocation9 + $0x800] sm:$0xff] }
 0x395   :  { %7745 = vmatprep.subr.bf16.mxu1 %v9752_v50  ;;  %v4702_v50 = vld [vmem:[#allocation9 + $0x820] sm:$0xff] }
 0x396   :  { %v9813_v62 = vcombine.low %v4698_v41, %v4702_v50 }
 0x397   :  { %7574 = vmatpush1.bf16.msra.mxu0 %v9749_v22  ;;  %v9807_v22 = vcombine.low %v4691_v53, %v4695_v45  ;;  %v4751_v53 = vld [vmem:[#allocation9 + $0x9a8] sm:$0xff] }
 0x398   :  { %7746 = vmatpush1.bf16.msra.mxu1 %v9751_v57  ;;  %7575 = vmatprep.subr.bf16.mxu0 %v9758_v14  ;;  %v9814_v57 = vcombine.high %v4698_v41, %v4702_v50  ;;  %v9816_v14 = vcombine.high %v4699_v13, %v4703_v24  ;;  %v4758_v41 = vld [vmem:[#allocation9 + $0x9e0] sm:$0xff]  ;;  %v4755_v50 = vld [vmem:[#allocation9 + $0x9c8] sm:$0xff] }
 0x399   :  { %7747 = vmatprep.subr.bf16.mxu1 %v9760_v55  ;;  %v4706_v55 = vld [vmem:[#allocation9 + $0x840] sm:$0xff] }
 0x39b   :  { %7576 = vmatpush1.bf16.msra.mxu0 %v9757_v63  ;;  %v10925_v63 = vmax.bf16 %v4428_v54, %v10888_v56  ;;  %v9823_v56 = vcombine.low %v4707_v59, %v4711_v60 }
 0x39c   :  { %7748 = vmatpush1.bf16.msra.mxu1 %v9759_v0  ;;  %7577 = vmatprep.subr.bf16.mxu0 %v9766_v1  ;;  %v9815_v0 = vcombine.low %v4699_v13, %v4703_v24  ;;  %v9822_v1 = vcombine.high %v4706_v55, %v4710_v58  ;;  %v4759_v13 = vld [vmem:[#allocation9 + $0x9e8] sm:$0xff] }
 0x39d   :  { %7749 = vmatprep.subr.bf16.mxu1 %v9768_v61  ;;  %v9824_v61 = vcombine.high %v4707_v59, %v4711_v60  ;;  %v9871_v60 = vcombine.low %v4755_v50, %v4759_v13 }
 0x39f   :  { %7578 = vmatpush1.bf16.msra.mxu0 %v9765_v6  ;;  %v9821_v6 = vcombine.low %v4706_v55, %v4710_v58  ;;  %v4763_v55 = vld [vmem:[#allocation9 + $0xa08] sm:$0xff] }
 0x3a0   :  { %7750 = vmatpush1.bf16.msra.mxu1 %v9767_v7  ;;  %7579 = vmatprep.subr.bf16.mxu0 %v9774_v8  ;;  %v9830_v7 = vcombine.high %v4714_v2, %v4718_v3  ;;  %v9832_v8 = vcombine.high %v4715_v4, %v4719_v5  ;;  %v4767_v58 = vld [vmem:[#allocation9 + $0xa28] sm:$0xff] }
 0x3a1   :  { %7751 = vmatprep.subr.bf16.mxu1 %v9776_v9  ;;  %v4722_v9 = vld [vmem:[#allocation9 + $0x8c0] sm:$0xff]  ;;  %v4771_v2 = vld [vmem:[#allocation9 + $0xa48] sm:$0xff] }
 0x3a2   :  { %v9837_v21 = vcombine.low %v4722_v9, %v4726_v10  ;;  %v4775_v3 = vld [vmem:[#allocation9 + $0xa68] sm:$0xff] }
 0x3a3   :  { %7580 = vmatpush1.bf16.msra.mxu0 %v9773_v20  ;;  %v9831_v20 = vcombine.low %v4715_v4, %v4719_v5  ;;  %v9879_v5 = vcombine.low %v4763_v55, %v4767_v58 }
 0x3a4   :  { %7752 = vmatpush1.bf16.msra.mxu1 %v9775_v47  ;;  %7581 = vmatprep.subr.bf16.mxu0 %v9782_v26  ;;  %v9838_v47 = vcombine.high %v4722_v9, %v4726_v10  ;;  %v9840_v26 = vcombine.high %v4723_v12, %v4727_v16  ;;  %v4779_v9 = vld [vmem:[#allocation9 + $0xa88] sm:$0xff] }
 0x3a5   :  { %7753 = vmatprep.subr.bf16.mxu1 %v9784_v27  ;;  %v4730_v27 = vld [vmem:[#allocation9 + $0x900] sm:$0xff]  ;;  %v4783_v10 = vld [vmem:[#allocation9 + $0xaa8] sm:$0xff] }
 0x3a6   :  { %v9845_v38 = vcombine.low %v4730_v27, %v4734_v28 }
 0x3a7   :  { %7582 = vmatpush1.bf16.msra.mxu0 %v9781_v17  ;;  %v9839_v17 = vcombine.low %v4723_v12, %v4727_v16  ;;  %v9887_v16 = vcombine.low %v4771_v2, %v4775_v3 }
 0x3a8   :  { %7754 = vmatpush1.bf16.msra.mxu1 %v9783_v31  ;;  %7583 = vmatprep.subr.bf16.mxu0 %v9790_v33  ;;  %v9846_v31 = vcombine.high %v4730_v27, %v4734_v28  ;;  %v9848_v33 = vcombine.high %v4731_v29, %v4735_v40  ;;  %v4787_v27 = vld [vmem:[#allocation9 + $0xac8] sm:$0xff] }
 0x3a9   :  { %7755 = vmatprep.subr.bf16.mxu1 %v9792_v34  ;;  %v4738_v34 = vld [vmem:[#allocation9 + $0x940] sm:$0xff]  ;;  %v4791_v28 = vld [vmem:[#allocation9 + $0xae8] sm:$0xff] }
 0x3aa   :  { %v9853_v45 = vcombine.low %v4738_v34, %v4742_v35 }
 0x3ab   :  { %7584 = vmatpush1.bf16.msra.mxu0 %v9789_v11  ;;  %v9847_v11 = vcombine.low %v4731_v29, %v4735_v40  ;;  %v9895_v40 = vcombine.low %v4779_v9, %v4783_v10 }
 0x3ac   :  { %7756 = vmatpush1.bf16.msra.mxu1 %v9791_v39  ;;  %7585 = vmatprep.subr.bf16.mxu0 %v9798_v42  ;;  %v9854_v39 = vcombine.high %v4738_v34, %v4742_v35  ;;  %v9856_v42 = vcombine.high %v4739_v36, %v4743_v37  ;;  %v4795_v34 = vld [vmem:[#allocation9 + $0xb08] sm:$0xff] }
 0x3ad   :  { %7757 = vmatprep.subr.bf16.mxu1 %v9800_v43  ;;  %v4746_v43 = vld [vmem:[#allocation9 + $0x980] sm:$0xff]  ;;  %v4799_v35 = vld [vmem:[#allocation9 + $0xb28] sm:$0xff] }
 0x3ae   :  { %v9861_v24 = vcombine.low %v4746_v43, %v4750_v44 }
 0x3af   :  { %7586 = vmatpush1.bf16.msra.mxu0 %v9797_v46  ;;  %v9855_v46 = vcombine.low %v4739_v36, %v4743_v37  ;;  %v9903_v37 = vcombine.low %v4787_v27, %v4791_v28 }
 0x3b0   :  { %7758 = vmatpush1.bf16.msra.mxu1 %v9799_v48  ;;  %7587 = vmatprep.subr.bf16.mxu0 %v9806_v49  ;;  %v9862_v48 = vcombine.high %v4746_v43, %v4750_v44  ;;  %v9864_v49 = vcombine.high %v4747_v30, %v4751_v53  ;;  %v4803_v43 = vld [vmem:[#allocation9 + $0xb48] sm:$0xff] }
 0x3b1   :  { %7759 = vmatprep.subr.bf16.mxu1 %v9808_v51  ;;  %v4754_v51 = vld [vmem:[#allocation9 + $0x9c0] sm:$0xff]  ;;  %v4807_v44 = vld [vmem:[#allocation9 + $0xb68] sm:$0xff] }
 0x3b2   :  { %v9870_v54 = vcombine.high %v4754_v51, %v4758_v41  ;;  %v9869_v59 = vcombine.low %v4754_v51, %v4758_v41  ;;  %v4811_v51 = vld [vmem:[#allocation9 + $0xb88] sm:$0xff] }
 0x3b3   :  { %7588 = vmatpush1.bf16.msra.mxu0 %v9805_v18  ;;  %v9863_v18 = vcombine.low %v4747_v30, %v4751_v53  ;;  %v9911_v53 = vcombine.low %v4795_v34, %v4799_v35  ;;  %v4815_v41 = vld [vmem:[#allocation9 + $0xba8] sm:$0xff] }
 0x3b4   :  { %7760 = vmatpush1.bf16.msra.mxu1 %v9807_v22  ;;  %7600 = vmatprep.subr.bf16.mxu0 %v9814_v57  ;;  %v9872_v22 = vcombine.high %v4755_v50, %v4759_v13  ;;  %v4762_v57 = vld [vmem:[#allocation9 + $0xa00] sm:$0xff]  ;;  %v9919_v13 = vcombine.low %v4803_v43, %v4807_v44 }
 0x3b5   :  { %7772 = vmatprep.subr.bf16.mxu1 %v9816_v14  ;;  %v4766_v14 = vld [vmem:[#allocation9 + $0xa20] sm:$0xff] }
 0x3b6   :  { %7590 = vmatmul.mubr.bf16.vlgmr.msra.gmra.mrb[16].mxu0 %v10925_v63  ;;  %v9877_v4 = vcombine.low %v4762_v57, %v4766_v14 }
 0x3b7   :  { %7762 = vmatmul.mubr.bf16.vlgmr.msra.gmra.mrb[16].mxu1 %v10925_v63  ;;  %7601 = vmatpush1.bf16.msra.mxu0 %v9813_v62  ;;  %v9878_v62 = vcombine.high %v4762_v57, %v4766_v14  ;;  %v4819_v57 = vld [vmem:[#allocation9 + $0xbc8] sm:$0xff] }
 0x3b8   :  { %7773 = vmatpush1.bf16.msra.mxu1 %v9815_v0  ;;  %7602 = vmatprep.subr.bf16.mxu0 %v9822_v1  ;;  %v9880_v0 = vcombine.high %v4763_v55, %v4767_v58  ;;  %v4770_v1 = vld [vmem:[#allocation9 + $0xa40] sm:$0xff]  ;;  %v4823_v14 = vld [vmem:[#allocation9 + $0xbe8] sm:$0xff]  ;;  %v9927_v58 = vcombine.low %v4811_v51, %v4815_v41 }
 0x3b9   :  { %7774 = vmatprep.subr.bf16.mxu1 %v9824_v61  ;;  %v4774_v61 = vld [vmem:[#allocation9 + $0xa60] sm:$0xff] }
 0x3ba   :  { %v9885_v12 = vcombine.low %v4770_v1, %v4774_v61 }
 0x3bb   :  { %7603 = vmatpush1.bf16.msra.mxu0 %v9821_v6  ;;  %v9886_v6 = vcombine.high %v4770_v1, %v4774_v61  ;;  %v10933_v1 = vld [vmem:[#allocation9 + $0xc08] sm:$0xff] }
 0x3bc   :  { %7775 = vmatpush1.bf16.msra.mxu1 %v9823_v56  ;;  %7604 = vmatprep.subr.bf16.mxu0 %v9830_v7  ;;  %v9888_v56 = vcombine.high %v4771_v2, %v4775_v3  ;;  %v4778_v7 = vld [vmem:[#allocation9 + $0xa80] sm:$0xff]  ;;  %v10935_v61 = vld [vmem:[#allocation9 + $0xc28] sm:$0xff]  ;;  %v9935_v3 = vcombine.low %v4819_v57, %v4823_v14 }
 0x3bd   :  { %7776 = vmatprep.subr.bf16.mxu1 %v9832_v8  ;;  %v4782_v8 = vld [vmem:[#allocation9 + $0xaa0] sm:$0xff] }
 0x3be   :  { %v9893_v29 = vcombine.low %v4778_v7, %v4782_v8 }
 0x3bf   :  { %7605 = vmatpush1.bf16.msra.mxu0 %v9829_v25  ;;  %v9894_v25 = vcombine.high %v4778_v7, %v4782_v8 }
 0x3c0   :  { %7777 = vmatpush1.bf16.msra.mxu1 %v9831_v20  ;;  %7606 = vmatprep.subr.bf16.mxu0 %v9838_v47  ;;  %v9896_v20 = vcombine.high %v4779_v9, %v4783_v10  ;;  %v4786_v47 = vld [vmem:[#allocation9 + $0xac0] sm:$0xff] }
 0x3c1   :  { %7778 = vmatprep.subr.bf16.mxu1 %v9840_v26  ;;  %v4790_v26 = vld [vmem:[#allocation9 + $0xae0] sm:$0xff] }
 0x3c2   :  { %v9901_v36 = vcombine.low %v4786_v47, %v4790_v26 }
 0x3c3   :  { %7607 = vmatpush1.bf16.msra.mxu0 %v9837_v21  ;;  %v9902_v21 = vcombine.high %v4786_v47, %v4790_v26 }
 0x3c4   :  { %7779 = vmatpush1.bf16.msra.mxu1 %v9839_v17  ;;  %7608 = vmatprep.subr.bf16.mxu0 %v9846_v31  ;;  %v9904_v17 = vcombine.high %v4787_v27, %v4791_v28  ;;  %v4794_v31 = vld [vmem:[#allocation9 + $0xb00] sm:$0xff] }
 0x3c5   :  { %7780 = vmatprep.subr.bf16.mxu1 %v9848_v33  ;;  %v4798_v33 = vld [vmem:[#allocation9 + $0xb20] sm:$0xff] }
 0x3c6   :  { %v9909_v30 = vcombine.low %v4794_v31, %v4798_v33 }
 0x3c7   :  { %7609 = vmatpush1.bf16.msra.mxu0 %v9845_v38  ;;  %v9910_v38 = vcombine.high %v4794_v31, %v4798_v33 }
 0x3c8   :  { %7781 = vmatpush1.bf16.msra.mxu1 %v9847_v11  ;;  %7610 = vmatprep.subr.bf16.mxu0 %v9854_v39  ;;  %v9912_v11 = vcombine.high %v4795_v34, %v4799_v35  ;;  %v4802_v39 = vld [vmem:[#allocation9 + $0xb40] sm:$0xff] }
 0x3c9   :  { %7782 = vmatprep.subr.bf16.mxu1 %v9856_v42  ;;  %v4806_v42 = vld [vmem:[#allocation9 + $0xb60] sm:$0xff] }
 0x3ca   :  { %v9917_v50 = vcombine.low %v4802_v39, %v4806_v42 }
 0x3cb   :  { %7611 = vmatpush1.bf16.msra.mxu0 %v9853_v45  ;;  %v9918_v45 = vcombine.high %v4802_v39, %v4806_v42 }
 0x3cc   :  { %7783 = vmatpush1.bf16.msra.mxu1 %v9855_v46  ;;  %7612 = vmatprep.subr.bf16.mxu0 %v9862_v48  ;;  %v9920_v46 = vcombine.high %v4803_v43, %v4807_v44  ;;  %v4810_v48 = vld [vmem:[#allocation9 + $0xb80] sm:$0xff] }
 0x3cd   :  { %7784 = vmatprep.subr.bf16.mxu1 %v9864_v49  ;;  %v4814_v49 = vld [vmem:[#allocation9 + $0xba0] sm:$0xff] }
 0x3ce   :  { %v9925_v55 = vcombine.low %v4810_v48, %v4814_v49 }
 0x3cf   :  { %7613 = vmatpush1.bf16.msra.mxu0 %v9861_v24  ;;  %v9926_v24 = vcombine.high %v4810_v48, %v4814_v49  ;;  %v4839_v48 = vld [vmem:[#allocation9 + $0xc68] sm:$0xff] }
 0x3d0   :  { %7785 = vmatpush1.bf16.msra.mxu1 %v9863_v18  ;;  %7614 = vmatprep.subr.bf16.mxu0 %v9870_v54  ;;  %v9928_v18 = vcombine.high %v4811_v51, %v4815_v41  ;;  %v4818_v54 = vld [vmem:[#allocation9 + $0xbc0] sm:$0xff]  ;;  %v9943_v41 = vcombine.low %v10933_v1, %v10935_v61 }
 0x3d1   :  { %7786 = vmatprep.subr.bf16.mxu1 %v9872_v22  ;;  %v4822_v22 = vld [vmem:[#allocation9 + $0xbe0] sm:$0xff] }
 0x3d2   :  { %v9933_v2 = vcombine.low %v4818_v54, %v4822_v22 }
 0x3d3   :  { %7615 = vmatpush1.bf16.msra.mxu0 %v9869_v59  ;;  %v9934_v59 = vcombine.high %v4818_v54, %v4822_v22  ;;  %v4846_v54 = vld [vmem:[#allocation9 + $0xca0] sm:$0xff]  ;;  %v4843_v22 = vld [vmem:[#allocation9 + $0xc88] sm:$0xff] }
 0x3d4   :  { %7787 = vmatpush1.bf16.msra.mxu1 %v9871_v60  ;;  %7616 = vmatprep.subr.bf16.mxu0 %v9878_v62  ;;  %v9936_v60 = vcombine.high %v4819_v57, %v4823_v14  ;;  %v10929_v62 = vld [vmem:[#allocation9 + $0xc00] sm:$0xff]  ;;  %v4847_v57 = vld [vmem:[#allocation9 + $0xca8] sm:$0xff] }
 0x3d5   :  { %7788 = vmatprep.subr.bf16.mxu1 %v9880_v0  ;;  %v10931_v0 = vld [vmem:[#allocation9 + $0xc20] sm:$0xff] }
 0x3d6   :  { %v9941_v51 = vcombine.low %v10929_v62, %v10931_v0 }
 0x3d7   :  { %7617 = vmatpush1.bf16.msra.mxu0 %v9877_v4  ;;  %v9942_v4 = vcombine.high %v10929_v62, %v10931_v0  ;;  %v4850_v62 = vld [vmem:[#allocation9 + $0xcc0] sm:$0xff] }
 0x3d8   :  { %7789 = vmatpush1.bf16.msra.mxu1 %v9879_v5  ;;  %7618 = vmatprep.subr.bf16.mxu0 %v9886_v6  ;;  %v9944_v5 = vcombine.high %v10933_v1, %v10935_v61  ;;  %v10402_v6 = vld [vmem:[#allocation7] sm:$0xff]  ;;  %v4854_v0 = vld [vmem:[#allocation9 + $0xce0] sm:$0xff]  ;;  %v4851_v1 = vld [vmem:[#allocation9 + $0xcc8] sm:$0xff] }
 0x3d9   :  { %7790 = vmatprep.subr.bf16.mxu1 %v9888_v56  ;;  %v4313_v56 = vcombine.high %v10402_v6, %v10402_v6  ;;  %v4855_v61 = vld [vmem:[#allocation9 + $0xce8] sm:$0xff]  ;;  %v4858_v6 = vld [vmem:[#allocation9 + $0xd00] sm:$0xff] }
 0x3db   :  { %7619 = vmatpush1.bf16.msra.mxu0 %v9885_v12  ;;  %v4327_v7 = vrot.slane %v4313_v56, %v10863_v19  ;;  %v4862_v56 = vld [vmem:[#allocation9 + $0xd20] sm:$0xff] }
 0x3dc   :  { %7791 = vmatpush1.bf16.msra.mxu1 %v9887_v16  ;;  %7620 = vmatprep.subr.bf16.mxu0 %v9894_v25 }
 0x3dd   :  { %7792 = vmatprep.subr.bf16.mxu1 %v9896_v20  ;;  %v4329_v8 = vcombine.high %v4327_v7, %v4327_v7  ;;  %v10944_v10 = vrot.slane %v4327_v7, %v10863_v19  ;;  %v4859_v7 = vld [vmem:[#allocation9 + $0xd08] sm:$0xff] }
 0x3df   :  { %7621 = vmatpush1.bf16.msra.mxu0 %v9893_v29  ;;  %v4357_v9 = vrot.slane %v4329_v8, %v10863_v19  ;;  %v4391_v16 = vpack.i.b16 %v10944_v10, %v10944_v10  ;;  %v4863_v8 = vld [vmem:[#allocation9 + $0xd28] sm:$0xff] }
 0x3e0   :  { %7793 = vmatpush1.bf16.msra.mxu1 %v9895_v40  ;;  %7622 = vmatprep.subr.bf16.mxu0 %v9902_v21 }
 0x3e1   :  { %7794 = vmatprep.subr.bf16.mxu1 %v9904_v17  ;;  %v4361_v12 = vcombine.high %v4357_v9, %v4357_v9  ;;  %v4398_v25 = vpack.i.b16 %v4357_v9, %v4357_v9  ;;  %v4396_v28 = vrot.slane %v4391_v16, %v10793_v23  ;;  %v9965_v9 = vcombine.low %v4850_v62, %v4854_v0 }
 0x3e2   :  { %v9974_v16 = vcombine.high %v4858_v6, %v4862_v56 }
 0x3e3   :  { %7623 = vmatpush1.bf16.msra.mxu0 %v9901_v36  ;;  %v4412_v20 = vpack.i.b16 %v4361_v12, %v4361_v12  ;;  %v4403_v21 = vrot.slane %v4398_v25, %v10793_v23  ;;  %v9967_v12 = vcombine.low %v4851_v1, %v4855_v61  ;;  %v9976_v25 = vcombine.high %v4859_v7, %v4863_v8 }
 0x3e4   :  { %7795 = vmatpush1.bf16.msra.mxu1 %v9903_v37  ;;  %7624 = vmatprep.subr.bf16.mxu0 %v9910_v38 }
 0x3e5   :  { %7796 = vmatprep.subr.bf16.mxu1 %v9912_v11  ;;  %v4417_v34 = vrot.slane %v4412_v20, %v10793_v23  ;;  %v4866_v20 = vld [vmem:[#allocation9 + $0xd40] sm:$0xff] }
 0x3e7   :  { %7625 = vmatpush1.bf16.msra.mxu0 %v9909_v30  ;;  %v4834_v30 = vld [vmem:[#allocation9 + $0xc40] sm:$0xff] }
 0x3e8   :  { %7797 = vmatpush1.bf16.msra.mxu1 %v9911_v53  ;;  %7626 = vmatprep.subr.bf16.mxu0 %v9918_v45  ;;  %v4838_v45 = vld [vmem:[#allocation9 + $0xc60] sm:$0xff] }
 0x3e9   :  { %7798 = vmatprep.subr.bf16.mxu1 %v9920_v46  ;;  %v4835_v46 = vld [vmem:[#allocation9 + $0xc48] sm:$0xff] }
 0x3eb   :  { %7627 = vmatpush1.bf16.msra.mxu0 %v9917_v50 }
 0x3ec   :  { %7799 = vmatpush1.bf16.msra.mxu1 %v9919_v13  ;;  %7628 = vmatprep.subr.bf16.mxu0 %v9926_v24  ;;  %v4842_v13 = vld [vmem:[#allocation9 + $0xc80] sm:$0xff]  ;;  %v9950_v24 = vcombine.high %v4834_v30, %v4838_v45 }
 0x3ed   :  { %7800 = vmatprep.subr.bf16.mxu1 %v9928_v18  ;;  %v9952_v18 = vcombine.high %v4835_v46, %v4839_v48 }
 0x3ef   :  { %7629 = vmatpush1.bf16.msra.mxu0 %v9925_v55  ;;  %v9949_v55 = vcombine.low %v4834_v30, %v4838_v45  ;;  %v4883_v30 = vld [vmem:[#allocation9 + $0xdc8] sm:$0xff] }
 0x3f0   :  { %7801 = vmatpush1.bf16.msra.mxu1 %v9927_v58  ;;  %7630 = vmatprep.subr.bf16.mxu0 %v9934_v59  ;;  %v9951_v58 = vcombine.low %v4835_v46, %v4839_v48  ;;  %v9958_v59 = vcombine.high %v4842_v13, %v4846_v54 }
 0x3f1   :  { %7802 = vmatprep.subr.bf16.mxu1 %v9936_v60  ;;  %v9960_v60 = vcombine.high %v4843_v22, %v4847_v57 }
 0x3f3   :  { %7631 = vmatpush1.bf16.msra.mxu0 %v9933_v2  ;;  %v9957_v2 = vcombine.low %v4842_v13, %v4846_v54  ;;  %v4894_v13 = vld [vmem:[#allocation9 + $0xe20] sm:$0xff] }
 0x3f4   :  { %7803 = vmatpush1.bf16.msra.mxu1 %v9935_v3  ;;  %7643 = vmatprep.subr.bf16.mxu0 %v9942_v4  ;;  %v9959_v3 = vcombine.low %v4843_v22, %v4847_v57  ;;  %v9966_v4 = vcombine.high %v4850_v62, %v4854_v0  ;;  %v4903_v62 = vld [vmem:[#allocation9 + $0xe68] sm:$0xff] }
 0x3f5   :  { %7815 = vmatprep.subr.bf16.mxu1 %v9944_v5  ;;  %v9968_v5 = vcombine.high %v4851_v1, %v4855_v61 }
 0x409   :  { %v4122_v47 = vpop.f32.mrb[12].mxu0 }
 0x40a   :  { %v10948_v26 = vpop.f32.mrb[12].mxu1  ;;  %v4124_v27 = vpop.f32.mrb[13].mxu0 }
 0x40b   :  { %v4296_v29 = vpop.f32.mrb[13].mxu1  ;;  %v4126_v40 = vpop.f32.mrb[14].mxu0 }
 0x40c   :  { %v4307_v17 = vpack.c.bf16 %v4126_v40, %v4122_v47  ;;  %v10952_v31 = vpop.f32.mrb[14].mxu1  ;;  %v4128_v33 = vpop.f32.mrb[15].mxu0  ;;  %v4870_v47 = vld [vmem:[#allocation9 + $0xd60] sm:$0xff]  ;;  %v9975_v40 = vcombine.low %v4859_v7, %v4863_v8 }
 0x40d   :  { %v4309_v35 = vpack.c.bf16 %v10952_v31, %v10948_v26  ;;  %v4308_v36 = vpack.c.bf16 %v4128_v33, %v4124_v27  ;;  %v4300_v37 = vpop.f32.mrb[15].mxu1  ;;  %v4867_v27 = vld [vmem:[#allocation9 + $0xd48] sm:$0xff]  ;;  %v4874_v33 = vld [vmem:[#allocation9 + $0xd80] sm:$0xff]  ;;  %v4456_v26 = vld [vmem:[#allocation9 + $0x70] sm:$0xff] }
 0x40e   :  { %v4422_v38 = vadd.bf16 %v4396_v28, %v4307_v17  ;;  %v4310_v11 = vpack.c.bf16 %v4300_v37, %v4296_v29  ;;  %v4871_v28 = vld [vmem:[#allocation9 + $0xd68] sm:$0xff]  ;;  %v9973_v29 = vcombine.low %v4858_v6, %v4862_v56  ;;  %v4453_v31 = vld [vmem:[#allocation9 + $0x58] sm:$0xff] }
 0x40f   :  { %v4423_v39 = vadd.bf16 %v4403_v21, %v4308_v36  ;;  %v9982_v21 = vcombine.high %v4866_v20, %v4870_v47  ;;  %v9984_v17 = vcombine.high %v4867_v27, %v4871_v28  ;;  %v4875_v36 = vld [vmem:[#allocation9 + $0xd88] sm:$0xff] }
 0x410   :  { %v4430_v42 = vmul.bf16 1009007652, %v4422_v38  ;;  %v4425_v43 = vadd.bf16 %v4417_v34, %v4310_v11  ;;  %v4878_v34 = vld [vmem:[#allocation9 + $0xda0] sm:$0xff]  ;;  %v4879_v37 = vld [vmem:[#allocation9 + $0xda8] sm:$0xff]  ;;  %v9983_v11 = vcombine.low %v4867_v27, %v4871_v28 }
 0x411   :  { %v4431_v44 = vmul.bf16 1009007652, %v4423_v39  ;;  %v9989_v45 = vcombine.low %v4874_v33, %v4878_v34  ;;  %v9991_v46 = vcombine.low %v4875_v36, %v4879_v37  ;;  %v4911_v6 = vld [vmem:[#allocation9 + $0xea8] sm:$0xff] }
 0x412   :  { %v4433_v53 = vmul.bf16 1009007652, %v4425_v43  ;;  %v10963_v50 = vmax.bf16 %v4430_v42, %v4422_v38  ;;  %v9981_v38 = vcombine.low %v4866_v20, %v4870_v47  ;;  %v9992_v42 = vcombine.high %v4875_v36, %v4879_v37  ;;  %v4919_v20 = vld [vmem:[#allocation9 + $0xee8] sm:$0xff] }
 0x413   :  { %v10957_v49 = vmax.bf16 %v4431_v44, %v4423_v39  ;;  %v9990_v39 = vcombine.high %v4874_v33, %v4878_v34  ;;  %v4886_v44 = vld [vmem:[#allocation9 + $0xde0] sm:$0xff]  ;;  %v4927_v33 = vld [vmem:[#allocation9 + $0xf28] sm:$0xff]  ;;  %v4359_v37 = vcombine.high %v10944_v10, %v10944_v10 }
 0x414   :  { %v10967_v14 = vmax.bf16 %v4433_v53, %v4425_v43  ;;  %v4882_v43 = vld [vmem:[#allocation9 + $0xdc0] sm:$0xff]  ;;  %v4887_v53 = vld [vmem:[#allocation9 + $0xde8] sm:$0xff] }
 0x415   :  { %7632 = vmatprep.mubr.bf16.mxu0 %v10957_v49  ;;  %7804 = vmatprep.mubr.bf16.mxu1 %v10957_v49  ;;  %v9998_v48 = vcombine.high %v4882_v43, %v4886_v44  ;;  %v9997_v54 = vcombine.low %v4882_v43, %v4886_v44  ;;  %v9999_v22 = vcombine.low %v4883_v30, %v4887_v53  ;;  %v4931_v43 = vld [vmem:[#allocation9 + $0xf48] sm:$0xff] }
 0x416   :  { %7633 = vmatmul.mubr.bf16.vlgmr.msra.gmra.mrb[16].mxu0 %v10963_v50  ;;  %7805 = vmatmul.mubr.bf16.vlgmr.msra.gmra.mrb[16].mxu1 %v10963_v50  ;;  %v4935_v44 = vld [vmem:[#allocation9 + $0xf68] sm:$0xff] }
 0x417   :  { %7644 = vmatpush1.bf16.msra.mxu0 %v9941_v51  ;;  %7816 = vmatpush1.bf16.msra.mxu1 %v9943_v41  ;;  %v10000_v51 = vcombine.high %v4883_v30, %v4887_v53  ;;  %v4890_v41 = vld [vmem:[#allocation9 + $0xe00] sm:$0xff]  ;;  %v4939_v10 = vld [vmem:[#allocation9 + $0xf88] sm:$0xff] }
 0x418   :  { %7675 = vmatprep.mubr.bf16.mxu0 %v10967_v14  ;;  %7847 = vmatprep.mubr.bf16.mxu1 %v10967_v14  ;;  %v10006_v57 = vcombine.high %v4890_v41, %v4894_v13  ;;  %v10005_v0 = vcombine.low %v4890_v41, %v4894_v13  ;;  %v4942_v41 = vld [vmem:[#allocation9 + $0xfa0] sm:$0xff]  ;;  %v4943_v13 = vld [vmem:[#allocation9 + $0xfa8] sm:$0xff] }
 0x419   :  { %7645 = vmatprep.subr.bf16.mxu0 %v9950_v24  ;;  %7817 = vmatprep.subr.bf16.mxu1 %v9952_v18  ;;  %v4891_v24 = vld [vmem:[#allocation9 + $0xe08] sm:$0xff] }
 0x41a   :  { %v4895_v18 = vld [vmem:[#allocation9 + $0xe28] sm:$0xff] }
 0x41b   :  { %7646 = vmatpush1.bf16.msra.mxu0 %v9949_v55  ;;  %7818 = vmatpush1.bf16.msra.mxu1 %v9951_v58  ;;  %v10008_v55 = vcombine.high %v4891_v24, %v4895_v18  ;;  %v4898_v58 = vld [vmem:[#allocation9 + $0xe40] sm:$0xff]  ;;  %v10007_v1 = vcombine.low %v4891_v24, %v4895_v18  ;;  %v10047_v18 = vcombine.low %v4931_v43, %v4935_v44 }
 0x41c   :  { %7647 = vmatprep.subr.bf16.mxu0 %v9958_v59  ;;  %7819 = vmatprep.subr.bf16.mxu1 %v9960_v60  ;;  %v4902_v59 = vld [vmem:[#allocation9 + $0xe60] sm:$0xff]  ;;  %v4899_v60 = vld [vmem:[#allocation9 + $0xe48] sm:$0xff] }
 0x41d   :  { %v10014_v61 = vcombine.high %v4898_v58, %v4902_v59  ;;  %v10013_v56 = vcombine.low %v4898_v58, %v4902_v59  ;;  %v10015_v7 = vcombine.low %v4899_v60, %v4903_v62  ;;  %v4950_v58 = vld [vmem:[#allocation9 + $0xfe0] sm:$0xff]  ;;  %v4947_v59 = vld [vmem:[#allocation9 + $0xfc8] sm:$0xff] }
 0x41f   :  { %7648 = vmatpush1.bf16.msra.mxu0 %v9957_v2  ;;  %7820 = vmatpush1.bf16.msra.mxu1 %v9959_v3  ;;  %v10016_v2 = vcombine.high %v4899_v60, %v4903_v62  ;;  %v4906_v3 = vld [vmem:[#allocation9 + $0xe80] sm:$0xff]  ;;  %v4951_v60 = vld [vmem:[#allocation9 + $0xfe8] sm:$0xff] }
 0x420   :  { %7649 = vmatprep.subr.bf16.mxu0 %v9966_v4  ;;  %7821 = vmatprep.subr.bf16.mxu1 %v9968_v5  ;;  %v4910_v4 = vld [vmem:[#allocation9 + $0xea0] sm:$0xff]  ;;  %v4907_v5 = vld [vmem:[#allocation9 + $0xe88] sm:$0xff] }
 0x421   :  { %v10022_v8 = vcombine.high %v4906_v3, %v4910_v4  ;;  %v10021_v47 = vcombine.low %v4906_v3, %v4910_v4  ;;  %v10023_v27 = vcombine.low %v4907_v5, %v4911_v6  ;;  %v4444_v3 = vld [vmem:[#allocation9 + $0x10] sm:$0xff] }
 0x422   :  { %v4448_v4 = vld [vmem:[#allocation9 + $0x30] sm:$0xff] }
 0x423   :  { %7650 = vmatpush1.bf16.msra.mxu0 %v9965_v9  ;;  %7822 = vmatpush1.bf16.msra.mxu1 %v9967_v12  ;;  %v10024_v9 = vcombine.high %v4907_v5, %v4911_v6  ;;  %v4914_v12 = vld [vmem:[#allocation9 + $0xec0] sm:$0xff]  ;;  %v4445_v5 = vld [vmem:[#allocation9 + $0x18] sm:$0xff] }
 0x424   :  { %7651 = vmatprep.subr.bf16.mxu0 %v9974_v16  ;;  %7823 = vmatprep.subr.bf16.mxu1 %v9976_v25  ;;  %v4918_v16 = vld [vmem:[#allocation9 + $0xee0] sm:$0xff]  ;;  %v4915_v25 = vld [vmem:[#allocation9 + $0xec8] sm:$0xff]  ;;  %v4449_v6 = vld [vmem:[#allocation9 + $0x38] sm:$0xff] }
 0x425   :  { %v10030_v28 = vcombine.high %v4914_v12, %v4918_v16  ;;  %v10029_v34 = vcombine.low %v4914_v12, %v4918_v16  ;;  %v10031_v36 = vcombine.low %v4915_v25, %v4919_v20  ;;  %v9564_v12 = vcombine.high %v4445_v5, %v4449_v6  ;;  %v4452_v16 = vld [vmem:[#allocation9 + $0x50] sm:$0xff] }
 0x427   :  { %7652 = vmatpush1.bf16.msra.mxu0 %v9973_v29  ;;  %7824 = vmatpush1.bf16.msra.mxu1 %v9975_v40  ;;  %v10032_v29 = vcombine.high %v4915_v25, %v4919_v20  ;;  %v4922_v40 = vld [vmem:[#allocation9 + $0xf00] sm:$0xff]  ;;  %v9561_v25 = vcombine.low %v4444_v3, %v4448_v4 }
 0x428   :  { %7653 = vmatprep.subr.bf16.mxu0 %v9982_v21  ;;  %7825 = vmatprep.subr.bf16.mxu1 %v9984_v17  ;;  %v4926_v21 = vld [vmem:[#allocation9 + $0xf20] sm:$0xff]  ;;  %v4923_v17 = vld [vmem:[#allocation9 + $0xf08] sm:$0xff] }
 0x429   :  { %v10037_v30 = vcombine.low %v4922_v40, %v4926_v21  ;;  %v10039_v53 = vcombine.low %v4923_v17, %v4927_v33 }
 0x42b   :  { %7654 = vmatpush1.bf16.msra.mxu0 %v9981_v38  ;;  %7826 = vmatpush1.bf16.msra.mxu1 %v9983_v11  ;;  %v10038_v38 = vcombine.high %v4922_v40, %v4926_v21  ;;  %v10040_v11 = vcombine.high %v4923_v17, %v4927_v33  ;;  %v4464_v40 = vld [vmem:[#allocation9 + $0xb0] sm:$0xff]  ;;  %v4461_v21 = vld [vmem:[#allocation9 + $0x98] sm:$0xff]  ;;  %v9569_v33 = vcombine.low %v4452_v16, %v4456_v26 }
 0x42c   :  { %7655 = vmatprep.subr.bf16.mxu0 %v9990_v39  ;;  %7827 = vmatprep.subr.bf16.mxu1 %v9992_v42  ;;  %v4930_v39 = vld [vmem:[#allocation9 + $0xf40] sm:$0xff]  ;;  %v4465_v17 = vld [vmem:[#allocation9 + $0xb8] sm:$0xff] }
 0x42d   :  { %v4934_v42 = vld [vmem:[#allocation9 + $0xf60] sm:$0xff] }
 0x42e   :  { %v10045_v24 = vcombine.low %v4930_v39, %v4934_v42 }
 0x42f   :  { %7656 = vmatpush1.bf16.msra.mxu0 %v9989_v45  ;;  %7828 = vmatpush1.bf16.msra.mxu1 %v9991_v46  ;;  %v4405_v45 = vpack.i.b16 %v4359_v37, %v4359_v37  ;;  %v10046_v46 = vcombine.high %v4930_v39, %v4934_v42  ;;  %v9580_v37 = vcombine.high %v4461_v21, %v4465_v17  ;;  %v4469_v39 = vld [vmem:[#allocation9 + $0xd8] sm:$0xff] }
 0x430   :  { %7657 = vmatprep.subr.bf16.mxu0 %v9998_v48  ;;  %7829 = vmatprep.subr.bf16.mxu1 %v10000_v51  ;;  %v10048_v48 = vcombine.high %v4931_v43, %v4935_v44  ;;  %v4938_v51 = vld [vmem:[#allocation9 + $0xf80] sm:$0xff]  ;;  %v4473_v42 = vld [vmem:[#allocation9 + $0xf8] sm:$0xff]  ;;  %v9579_v44 = vcombine.low %v4461_v21, %v4465_v17  ;;  %v4520_v21 = vld [vmem:[#allocation9 + $0x270] sm:$0xff] }
 0x431   :  { %v10053_v62 = vcombine.low %v4938_v51, %v4942_v41  ;;  %v4517_v17 = vld [vmem:[#allocation9 + $0x258] sm:$0xff] }
 0x433   :  { %7658 = vmatpush1.bf16.msra.mxu0 %v9997_v54  ;;  %7830 = vmatpush1.bf16.msra.mxu1 %v9999_v22  ;;  %v4410_v54 = vrot.slane %v4405_v45, %v10793_v23  ;;  %v10054_v22 = vcombine.high %v4938_v51, %v4942_v41  ;;  %v4476_v45 = vld [vmem:[#allocation9 + $0x110] sm:$0xff]  ;;  %v9587_v41 = vcombine.low %v4469_v39, %v4473_v42 }
 0x434   :  { %7659 = vmatprep.subr.bf16.mxu0 %v10006_v57  ;;  %7831 = vmatprep.subr.bf16.mxu1 %v10008_v55  ;;  %v10056_v57 = vcombine.high %v4939_v10, %v4943_v13  ;;  %v4946_v55 = vld [vmem:[#allocation9 + $0xfc0] sm:$0xff] }
 0x437   :  { %7660 = vmatpush1.bf16.msra.mxu0 %v10005_v0  ;;  %7832 = vmatpush1.bf16.msra.mxu1 %v10007_v1  ;;  %v10055_v0 = vcombine.low %v4939_v10, %v4943_v13  ;;  %v4424_v1 = vadd.bf16 %v4410_v54, %v4309_v35  ;;  %v4457_v35 = vld [vmem:[#allocation9 + $0x78] sm:$0xff] }
 0x438   :  { %7661 = vmatprep.subr.bf16.mxu0 %v10014_v61  ;;  %7833 = vmatprep.subr.bf16.mxu1 %v10016_v2  ;;  %v10062_v61 = vcombine.high %v4946_v55, %v4950_v58  ;;  %v10064_v2 = vcombine.high %v4947_v59, %v4951_v60  ;;  %v4485_v54 = vld [vmem:[#allocation9 + $0x158] sm:$0xff] }
 0x43b   :  { %7662 = vmatpush1.bf16.msra.mxu0 %v10013_v56  ;;  %7834 = vmatpush1.bf16.msra.mxu1 %v10015_v7  ;;  %v10061_v56 = vcombine.low %v4946_v55, %v4950_v58  ;;  %v10063_v7 = vcombine.low %v4947_v59, %v4951_v60  ;;  %v4492_v60 = vld [vmem:[#allocation9 + $0x190] sm:$0xff] }
 0x43c   :  { %7663 = vmatprep.subr.bf16.mxu0 %v10022_v8  ;;  %7835 = vmatprep.subr.bf16.mxu1 %v10024_v9  ;;  %v4432_v8 = vmul.bf16 1009007652, %v4424_v1  ;;  %v9562_v9 = vcombine.high %v4444_v3, %v4448_v4 }
 0x43e   :  { %v10979_v20 = vmax.bf16 %v4432_v8, %v4424_v1  ;;  %v4497_v1 = vld [vmem:[#allocation9 + $0x1b8] sm:$0xff] }
 0x43f   :  { %7664 = vmatpush1.bf16.msra.mxu0 %v10021_v47  ;;  %7836 = vmatpush1.bf16.msra.mxu1 %v10023_v27  ;;  %v9563_v47 = vcombine.low %v4445_v5, %v4449_v6  ;;  %v9570_v27 = vcombine.high %v4452_v16, %v4456_v26  ;;  %v4500_v5 = vld [vmem:[#allocation9 + $0x1d0] sm:$0xff] }
 0x440   :  { %7665 = vmatprep.subr.bf16.mxu0 %v10030_v28  ;;  %7837 = vmatprep.subr.bf16.mxu1 %v10032_v29  ;;  %v9572_v28 = vcombine.high %v4453_v31, %v4457_v35  ;;  %v4460_v29 = vld [vmem:[#allocation9 + $0x90] sm:$0xff] }
 0x441   :  { %v9577_v43 = vcombine.low %v4460_v29, %v4464_v40  ;;  %v4504_v6 = vld [vmem:[#allocation9 + $0x1f0] sm:$0xff] }
 0x442   :  { %v4508_v26 = vld [vmem:[#allocation9 + $0x210] sm:$0xff] }
 0x443   :  { %7666 = vmatpush1.bf16.msra.mxu0 %v10029_v34  ;;  %7838 = vmatpush1.bf16.msra.mxu1 %v10031_v36  ;;  %v9571_v34 = vcombine.low %v4453_v31, %v4457_v35  ;;  %v9578_v36 = vcombine.high %v4460_v29, %v4464_v40  ;;  %v4512_v31 = vld [vmem:[#allocation9 + $0x230] sm:$0xff]  ;;  %v4509_v35 = vld [vmem:[#allocation9 + $0x218] sm:$0xff] }
 0x444   :  { %7667 = vmatprep.subr.bf16.mxu0 %v10038_v38  ;;  %7839 = vmatprep.subr.bf16.mxu1 %v10040_v11  ;;  %v4468_v38 = vld [vmem:[#allocation9 + $0xd0] sm:$0xff] }
 0x445   :  { %v4472_v11 = vld [vmem:[#allocation9 + $0xf0] sm:$0xff] }
 0x446   :  { %v9585_v51 = vcombine.low %v4468_v38, %v4472_v11  ;;  %v4516_v40 = vld [vmem:[#allocation9 + $0x250] sm:$0xff] }
 0x447   :  { %7668 = vmatpush1.bf16.msra.mxu0 %v10037_v30  ;;  %7840 = vmatpush1.bf16.msra.mxu1 %v10039_v53  ;;  %v9586_v30 = vcombine.high %v4468_v38, %v4472_v11  ;;  %v9588_v53 = vcombine.high %v4469_v39, %v4473_v42  ;;  %v4524_v11 = vld [vmem:[#allocation9 + $0x290] sm:$0xff]  ;;  %v4525_v42 = vld [vmem:[#allocation9 + $0x298] sm:$0xff] }
 0x448   :  { %7669 = vmatprep.subr.bf16.mxu0 %v10046_v46  ;;  %7841 = vmatprep.subr.bf16.mxu1 %v10048_v48  ;;  %v4480_v46 = vld [vmem:[#allocation9 + $0x130] sm:$0xff]  ;;  %v4481_v48 = vld [vmem:[#allocation9 + $0x138] sm:$0xff] }
 0x449   :  { %v9594_v10 = vcombine.high %v4476_v45, %v4480_v46  ;;  %v4528_v39 = vld [vmem:[#allocation9 + $0x2b0] sm:$0xff] }
 0x44b   :  { %7670 = vmatpush1.bf16.msra.mxu0 %v10045_v24  ;;  %7842 = vmatpush1.bf16.msra.mxu1 %v10047_v18  ;;  %v4484_v24 = vld [vmem:[#allocation9 + $0x150] sm:$0xff] }
 0x44c   :  { %7671 = vmatprep.subr.bf16.mxu0 %v10054_v22  ;;  %7843 = vmatprep.subr.bf16.mxu1 %v10056_v57  ;;  %v4488_v18 = vld [vmem:[#allocation9 + $0x170] sm:$0xff]  ;;  %v4489_v22 = vld [vmem:[#allocation9 + $0x178] sm:$0xff]  ;;  %v9593_v57 = vcombine.low %v4476_v45, %v4480_v46 }
 0x44d   :  { %v9602_v58 = vcombine.high %v4484_v24, %v4488_v18  ;;  %v9604_v59 = vcombine.high %v4485_v54, %v4489_v22  ;;  %v4532_v46 = vld [vmem:[#allocation9 + $0x2d0] sm:$0xff] }
 0x44f   :  { %7672 = vmatpush1.bf16.msra.mxu0 %v10053_v62  ;;  %7844 = vmatpush1.bf16.msra.mxu1 %v10055_v0  ;;  %v4496_v62 = vld [vmem:[#allocation9 + $0x1b0] sm:$0xff]  ;;  %v4493_v0 = vld [vmem:[#allocation9 + $0x198] sm:$0xff] }
 0x450   :  { %7673 = vmatprep.subr.bf16.mxu0 %v10062_v61  ;;  %7845 = vmatprep.subr.bf16.mxu1 %v10064_v2  ;;  %v9601_v61 = vcombine.low %v4484_v24, %v4488_v18  ;;  %v9603_v2 = vcombine.low %v4485_v54, %v4489_v22  ;;  %v9610_v3 = vcombine.high %v4492_v60, %v4496_v62  ;;  %v4540_v18 = vld [vmem:[#allocation9 + $0x310] sm:$0xff]  ;;  %v4541_v22 = vld [vmem:[#allocation9 + $0x318] sm:$0xff] }
 0x451   :  { %v9612_v4 = vcombine.high %v4493_v0, %v4497_v1  ;;  %v9609_v8 = vcombine.low %v4492_v60, %v4496_v62  ;;  %v4544_v54 = vld [vmem:[#allocation9 + $0x330] sm:$0xff] }
 0x452   :  { %v4548_v62 = vld [vmem:[#allocation9 + $0x350] sm:$0xff] }
 0x453   :  { %7674 = vmatpush1.bf16.msra.mxu0 %v10061_v56  ;;  %7846 = vmatpush1.bf16.msra.mxu1 %v10063_v7  ;;  %v4501_v56 = vld [vmem:[#allocation9 + $0x1d8] sm:$0xff] }
 0x454   :  { %7858 = vmatprep.subr.bf16.mxu0 %v9562_v9  ;;  %8030 = vmatprep.subr.bf16.mxu1 %v9564_v12  ;;  %v4505_v7 = vld [vmem:[#allocation9 + $0x1f8] sm:$0xff]  ;;  %v9611_v9 = vcombine.low %v4493_v0, %v4497_v1  ;;  %v9618_v12 = vcombine.high %v4500_v5, %v4504_v6  ;;  %v4552_v0 = vld [vmem:[#allocation9 + $0x370] sm:$0xff] }
 0x455   :  { %v9620_v16 = vcombine.high %v4501_v56, %v4505_v7  ;;  %v4549_v1 = vld [vmem:[#allocation9 + $0x358] sm:$0xff] }
 0x456   :  { %7676 = vmatmul.mubr.bf16.vlgmr.msra.gmra.mrb[16].mxu0 %v10979_v20  ;;  %7848 = vmatmul.mubr.bf16.vlgmr.msra.gmra.mrb[16].mxu1 %v10979_v20 }
 0x457   :  { %7859 = vmatpush1.bf16.msra.mxu0 %v9561_v25  ;;  %7890 = vmatprep.mubr.bf16.mxu0 %v10901_v32  ;;  %v4513_v25 = vld [vmem:[#allocation9 + $0x238] sm:$0xff] }
 0x458   :  { %8031 = vmatpush1.bf16.msra.mxu1 %v9563_v47  ;;  %8062 = vmatprep.mubr.bf16.mxu1 %v10901_v32  ;;  %v4477_v32 = vld [vmem:[#allocation9 + $0x118] sm:$0xff]  ;;  %v9617_v47 = vcombine.low %v4500_v5, %v4504_v6  ;;  %v9628_v29 = vcombine.high %v4509_v35, %v4513_v25  ;;  %v4556_v6 = vld [vmem:[#allocation9 + $0x390] sm:$0xff] }
 0x459   :  { %7860 = vmatprep.subr.bf16.mxu0 %v9570_v27  ;;  %8032 = vmatprep.subr.bf16.mxu1 %v9572_v28  ;;  %v9596_v13 = vcombine.high %v4477_v32, %v4481_v48  ;;  %v9595_v55 = vcombine.low %v4477_v32, %v4481_v48  ;;  %v9619_v27 = vcombine.low %v4501_v56, %v4505_v7  ;;  %v4536_v32 = vld [vmem:[#allocation9 + $0x2f0] sm:$0xff]  ;;  %v4533_v48 = vld [vmem:[#allocation9 + $0x2d8] sm:$0xff] }
 0x45a   :  { %v9626_v28 = vcombine.high %v4508_v26, %v4512_v31  ;;  %v4560_v56 = vld [vmem:[#allocation9 + $0x3b0] sm:$0xff]  ;;  %v4557_v7 = vld [vmem:[#allocation9 + $0x398] sm:$0xff] }
 0x45b   :  { %7861 = vmatpush1.bf16.msra.mxu0 %v9569_v33  ;;  %v4521_v33 = vld [vmem:[#allocation9 + $0x278] sm:$0xff] }
 0x45c   :  { %8033 = vmatpush1.bf16.msra.mxu1 %v9571_v34  ;;  %7862 = vmatprep.subr.bf16.mxu0 %v9578_v36  ;;  %v9625_v34 = vcombine.low %v4508_v26, %v4512_v31  ;;  %v9627_v36 = vcombine.low %v4509_v35, %v4513_v25  ;;  %v9636_v38 = vcombine.high %v4517_v17, %v4521_v33  ;;  %v4564_v31 = vld [vmem:[#allocation9 + $0x3d0] sm:$0xff]  ;;  %v4565_v25 = vld [vmem:[#allocation9 + $0x3d8] sm:$0xff] }
 0x45d   :  { %8034 = vmatprep.subr.bf16.mxu1 %v9580_v37  ;;  %v9634_v37 = vcombine.high %v4516_v40, %v4520_v21  ;;  %v4568_v35 = vld [vmem:[#allocation9 + $0x3f0] sm:$0xff] }
 0x45f   :  { %7863 = vmatpush1.bf16.msra.mxu0 %v9577_v43  ;;  %v4529_v43 = vld [vmem:[#allocation9 + $0x2b8] sm:$0xff] }
 0x460   :  { %8035 = vmatpush1.bf16.msra.mxu1 %v9579_v44  ;;  %7864 = vmatprep.subr.bf16.mxu0 %v9586_v30  ;;  %v9633_v44 = vcombine.low %v4516_v40, %v4520_v21  ;;  %v9635_v30 = vcombine.low %v4517_v17, %v4521_v33  ;;  %v9644_v45 = vcombine.high %v4525_v42, %v4529_v43  ;;  %v4572_v21 = vld [vmem:[#allocation9 + $0x410] sm:$0xff]  ;;  %v4573_v33 = vld [vmem:[#allocation9 + $0x418] sm:$0xff] }
 0x461   :  { %8036 = vmatprep.subr.bf16.mxu1 %v9588_v53  ;;  %v9642_v53 = vcombine.high %v4524_v11, %v4528_v39  ;;  %v4576_v17 = vld [vmem:[#allocation9 + $0x430] sm:$0xff] }
 0x463   :  { %7865 = vmatpush1.bf16.msra.mxu0 %v9585_v51  ;;  %v4537_v51 = vld [vmem:[#allocation9 + $0x2f8] sm:$0xff] }
 0x464   :  { %8037 = vmatpush1.bf16.msra.mxu1 %v9587_v41  ;;  %7866 = vmatprep.subr.bf16.mxu0 %v9594_v10  ;;  %v9641_v41 = vcombine.low %v4524_v11, %v4528_v39  ;;  %v9643_v10 = vcombine.low %v4525_v42, %v4529_v43  ;;  %v9652_v24 = vcombine.high %v4533_v48, %v4537_v51  ;;  %v4580_v39 = vld [vmem:[#allocation9 + $0x450] sm:$0xff] }
 0x465   :  { %8038 = vmatprep.subr.bf16.mxu1 %v9596_v13  ;;  %v9650_v13 = vcombine.high %v4532_v46, %v4536_v32  ;;  %v4584_v42 = vld [vmem:[#allocation9 + $0x470] sm:$0xff]  ;;  %v9689_v43 = vcombine.low %v4572_v21, %v4576_v17 }
 0x467   :  { %7867 = vmatpush1.bf16.msra.mxu0 %v9593_v57  ;;  %v4545_v57 = vld [vmem:[#allocation9 + $0x338] sm:$0xff] }
 0x468   :  { %8039 = vmatpush1.bf16.msra.mxu1 %v9595_v55  ;;  %7868 = vmatprep.subr.bf16.mxu0 %v9602_v58  ;;  %v9649_v55 = vcombine.low %v4532_v46, %v4536_v32  ;;  %v9651_v58 = vcombine.low %v4533_v48, %v4537_v51  ;;  %v9660_v60 = vcombine.high %v4541_v22, %v4545_v57  ;;  %v4588_v46 = vld [vmem:[#allocation9 + $0x490] sm:$0xff]  ;;  %v4589_v51 = vld [vmem:[#allocation9 + $0x498] sm:$0xff] }
 0x469   :  { %8040 = vmatprep.subr.bf16.mxu1 %v9604_v59  ;;  %v9658_v59 = vcombine.high %v4540_v18, %v4544_v54  ;;  %v4592_v32 = vld [vmem:[#allocation9 + $0x4b0] sm:$0xff] }
 0x46b   :  { %7869 = vmatpush1.bf16.msra.mxu0 %v9601_v61  ;;  %v4553_v61 = vld [vmem:[#allocation9 + $0x378] sm:$0xff] }
 0x46c   :  { %8041 = vmatpush1.bf16.msra.mxu1 %v9603_v2  ;;  %7870 = vmatprep.subr.bf16.mxu0 %v9610_v3  ;;  %v9657_v2 = vcombine.low %v4540_v18, %v4544_v54  ;;  %v9659_v3 = vcombine.low %v4541_v22, %v4545_v57  ;;  %v9668_v5 = vcombine.high %v4549_v1, %v4553_v61  ;;  %v4596_v54 = vld [vmem:[#allocation9 + $0x4d0] sm:$0xff]  ;;  %v4597_v57 = vld [vmem:[#allocation9 + $0x4d8] sm:$0xff] }
 0x46d   :  { %8042 = vmatprep.subr.bf16.mxu1 %v9612_v4  ;;  %v9666_v4 = vcombine.high %v4548_v62, %v4552_v0  ;;  %v4600_v22 = vld [vmem:[#allocation9 + $0x4f0] sm:$0xff] }
 0x46f   :  { %7871 = vmatpush1.bf16.msra.mxu0 %v9609_v8  ;;  %v4561_v8 = vld [vmem:[#allocation9 + $0x3b8] sm:$0xff] }
 0x470   :  { %8043 = vmatpush1.bf16.msra.mxu1 %v9611_v9  ;;  %7872 = vmatprep.subr.bf16.mxu0 %v9618_v12  ;;  %v9665_v9 = vcombine.low %v4548_v62, %v4552_v0  ;;  %v9667_v12 = vcombine.low %v4549_v1, %v4553_v61  ;;  %v9676_v26 = vcombine.high %v4557_v7, %v4561_v8  ;;  %v4604_v62 = vld [vmem:[#allocation9 + $0x510] sm:$0xff]  ;;  %v4605_v1 = vld [vmem:[#allocation9 + $0x518] sm:$0xff] }
 0x471   :  { %8044 = vmatprep.subr.bf16.mxu1 %v9620_v16  ;;  %v9674_v16 = vcombine.high %v4556_v6, %v4560_v56  ;;  %v4608_v0 = vld [vmem:[#allocation9 + $0x530] sm:$0xff]  ;;  %v4609_v61 = vld [vmem:[#allocation9 + $0x538] sm:$0xff] }
 0x473   :  { %7873 = vmatpush1.bf16.msra.mxu0 %v9617_v47  ;;  %v4569_v47 = vld [vmem:[#allocation9 + $0x3f8] sm:$0xff] }
 0x474   :  { %8045 = vmatpush1.bf16.msra.mxu1 %v9619_v27  ;;  %7874 = vmatprep.subr.bf16.mxu0 %v9626_v28  ;;  %v9673_v27 = vcombine.low %v4556_v6, %v4560_v56  ;;  %v9675_v28 = vcombine.low %v4557_v7, %v4561_v8  ;;  %v9684_v40 = vcombine.high %v4565_v25, %v4569_v47  ;;  %v4616_v6 = vld [vmem:[#allocation9 + $0x570] sm:$0xff]  ;;  %v4613_v56 = vld [vmem:[#allocation9 + $0x558] sm:$0xff] }
 0x475   :  { %8046 = vmatprep.subr.bf16.mxu1 %v9628_v29  ;;  %v9682_v29 = vcombine.high %v4564_v31, %v4568_v35  ;;  %v4617_v7 = vld [vmem:[#allocation9 + $0x578] sm:$0xff]  ;;  %v9721_v8 = vcombine.low %v4604_v62, %v4608_v0 }
 0x477   :  { %7875 = vmatpush1.bf16.msra.mxu0 %v9625_v34  ;;  %v4577_v34 = vld [vmem:[#allocation9 + $0x438] sm:$0xff] }
 0x478   :  { %8047 = vmatpush1.bf16.msra.mxu1 %v9627_v36  ;;  %7876 = vmatprep.subr.bf16.mxu0 %v9634_v37  ;;  %v9681_v36 = vcombine.low %v4564_v31, %v4568_v35  ;;  %v9683_v37 = vcombine.low %v4565_v25, %v4569_v47  ;;  %v9692_v11 = vcombine.high %v4573_v33, %v4577_v34  ;;  %v4624_v31 = vld [vmem:[#allocation9 + $0x5b0] sm:$0xff]  ;;  %v4621_v35 = vld [vmem:[#allocation9 + $0x598] sm:$0xff] }
 0x479   :  { %8048 = vmatprep.subr.bf16.mxu1 %v9636_v38  ;;  %v9690_v38 = vcombine.high %v4572_v21, %v4576_v17  ;;  %v4625_v25 = vld [vmem:[#allocation9 + $0x5b8] sm:$0xff]  ;;  %v4632_v21 = vld [vmem:[#allocation9 + $0x5f0] sm:$0xff] }
 0x47a   :  { %v4629_v17 = vld [vmem:[#allocation9 + $0x5d8] sm:$0xff] }
 0x47b   :  { %7877 = vmatpush1.bf16.msra.mxu0 %v9633_v44  ;;  %v4581_v44 = vld [vmem:[#allocation9 + $0x458] sm:$0xff] }
 0x47c   :  { %8049 = vmatpush1.bf16.msra.mxu1 %v9635_v30  ;;  %7878 = vmatprep.subr.bf16.mxu0 %v9642_v53  ;;  %v4585_v30 = vld [vmem:[#allocation9 + $0x478] sm:$0xff]  ;;  %v9691_v53 = vcombine.low %v4573_v33, %v4577_v34 }
 0x47d   :  { %8050 = vmatprep.subr.bf16.mxu1 %v9644_v45  ;;  %v9698_v45 = vcombine.high %v4580_v39, %v4584_v42  ;;  %v9700_v48 = vcombine.high %v4581_v44, %v4585_v30  ;;  %v4633_v33 = vld [vmem:[#allocation9 + $0x5f8] sm:$0xff] }
 0x47f   :  { %7879 = vmatpush1.bf16.msra.mxu0 %v9641_v41  ;;  %v4593_v41 = vld [vmem:[#allocation9 + $0x4b8] sm:$0xff] }
 0x480   :  { %8051 = vmatpush1.bf16.msra.mxu1 %v9643_v10  ;;  %7880 = vmatprep.subr.bf16.mxu0 %v9650_v13  ;;  %v9697_v10 = vcombine.low %v4580_v39, %v4584_v42  ;;  %v9699_v13 = vcombine.low %v4581_v44, %v4585_v30  ;;  %v9708_v18 = vcombine.high %v4589_v51, %v4593_v41  ;;  %v4640_v39 = vld [vmem:[#allocation9 + $0x630] sm:$0xff]  ;;  %v4637_v42 = vld [vmem:[#allocation9 + $0x618] sm:$0xff] }
 0x481   :  { %8052 = vmatprep.subr.bf16.mxu1 %v9652_v24  ;;  %v9706_v24 = vcombine.high %v4588_v46, %v4592_v32  ;;  %v9747_v30 = vcombine.low %v4629_v17, %v4633_v33 }
 0x483   :  { %7881 = vmatpush1.bf16.msra.mxu0 %v9649_v55  ;;  %v4601_v55 = vld [vmem:[#allocation9 + $0x4f8] sm:$0xff] }
 0x484   :  { %8053 = vmatpush1.bf16.msra.mxu1 %v9651_v58  ;;  %7882 = vmatprep.subr.bf16.mxu0 %v9658_v59  ;;  %v9705_v58 = vcombine.low %v4588_v46, %v4592_v32  ;;  %v9714_v59 = vcombine.high %v4596_v54, %v4600_v22  ;;  %v4644_v46 = vld [vmem:[#allocation9 + $0x650] sm:$0xff] }
 0x485   :  { %8054 = vmatprep.subr.bf16.mxu1 %v9660_v60  ;;  %v9716_v60 = vcombine.high %v4597_v57, %v4601_v55  ;;  %v4648_v32 = vld [vmem:[#allocation9 + $0x670] sm:$0xff] }
 0x487   :  { %7883 = vmatpush1.bf16.msra.mxu0 %v9657_v2  ;;  %v9715_v2 = vcombine.low %v4597_v57, %v4601_v55  ;;  %v4657_v57 = vld [vmem:[#allocation9 + $0x6b8] sm:$0xff]  ;;  %v9761_v55 = vcombine.low %v4644_v46, %v4648_v32 }
 0x488   :  { %8055 = vmatpush1.bf16.msra.mxu1 %v9659_v3  ;;  %7884 = vmatprep.subr.bf16.mxu0 %v9666_v4  ;;  %v9722_v3 = vcombine.high %v4604_v62, %v4608_v0  ;;  %v9724_v4 = vcombine.high %v4605_v1, %v4609_v61  ;;  %v4664_v62 = vld [vmem:[#allocation9 + $0x6f0] sm:$0xff]  ;;  %v4661_v0 = vld [vmem:[#allocation9 + $0x6d8] sm:$0xff] }
 0x489   :  { %8056 = vmatprep.subr.bf16.mxu1 %v9668_v5  ;;  %v4612_v5 = vld [vmem:[#allocation9 + $0x550] sm:$0xff] }
 0x48a   :  { %v9729_v47 = vcombine.low %v4612_v5, %v4616_v6 }
 0x48b   :  { %7885 = vmatpush1.bf16.msra.mxu0 %v9665_v9  ;;  %v9723_v9 = vcombine.low %v4605_v1, %v4609_v61  ;;  %v4665_v1 = vld [vmem:[#allocation9 + $0x6f8] sm:$0xff] }
 0x48c   :  { %8057 = vmatpush1.bf16.msra.mxu1 %v9667_v12  ;;  %7886 = vmatprep.subr.bf16.mxu0 %v9674_v16  ;;  %v9730_v12 = vcombine.high %v4612_v5, %v4616_v6  ;;  %v9732_v16 = vcombine.high %v4613_v56, %v4617_v7  ;;  %v4672_v5 = vld [vmem:[#allocation9 + $0x730] sm:$0xff]  ;;  %v4669_v6 = vld [vmem:[#allocation9 + $0x718] sm:$0xff] }
 0x48d   :  { %8058 = vmatprep.subr.bf16.mxu1 %v9676_v26  ;;  %v4620_v26 = vld [vmem:[#allocation9 + $0x590] sm:$0xff] }
 0x48e   :  { %v9737_v34 = vcombine.low %v4620_v26, %v4624_v31 }
 0x48f   :  { %7887 = vmatpush1.bf16.msra.mxu0 %v9673_v27  ;;  %v9731_v27 = vcombine.low %v4613_v56, %v4617_v7  ;;  %v4673_v56 = vld [vmem:[#allocation9 + $0x738] sm:$0xff] }
 0x490   :  { %8059 = vmatpush1.bf16.msra.mxu1 %v9675_v28  ;;  %7888 = vmatprep.subr.bf16.mxu0 %v9682_v29  ;;  %v9738_v28 = vcombine.high %v4620_v26, %v4624_v31  ;;  %v9740_v29 = vcombine.high %v4621_v35, %v4625_v25  ;;  %v4680_v26 = vld [vmem:[#allocation9 + $0x770] sm:$0xff]  ;;  %v4677_v31 = vld [vmem:[#allocation9 + $0x758] sm:$0xff] }
 0x491   :  { %8060 = vmatprep.subr.bf16.mxu1 %v9684_v40  ;;  %v4628_v40 = vld [vmem:[#allocation9 + $0x5d0] sm:$0xff] }
 0x492   :  { %v9745_v44 = vcombine.low %v4628_v40, %v4632_v21 }
 0x493   :  { %7889 = vmatpush1.bf16.msra.mxu0 %v9681_v36  ;;  %v9739_v36 = vcombine.low %v4621_v35, %v4625_v25  ;;  %v4681_v35 = vld [vmem:[#allocation9 + $0x778] sm:$0xff] }
 0x494   :  { %8061 = vmatpush1.bf16.msra.mxu1 %v9683_v37  ;;  %7901 = vmatprep.subr.bf16.mxu0 %v9690_v38  ;;  %v9746_v37 = vcombine.high %v4628_v40, %v4632_v21  ;;  %v9748_v38 = vcombine.high %v4629_v17, %v4633_v33  ;;  %v4688_v40 = vld [vmem:[#allocation9 + $0x7b0] sm:$0xff]  ;;  %v4685_v21 = vld [vmem:[#allocation9 + $0x798] sm:$0xff] }
 0x495   :  { %8073 = vmatprep.subr.bf16.mxu1 %v9692_v11  ;;  %v4636_v11 = vld [vmem:[#allocation9 + $0x610] sm:$0xff]  ;;  %v4689_v17 = vld [vmem:[#allocation9 + $0x7b8] sm:$0xff] }
 0x496   :  { %7891 = vmatmul.mubr.bf16.vlgmr.msra.gmra.mrb[20].mxu0 %v10915_v15 }
 0x497   :  { %8063 = vmatmul.mubr.bf16.vlgmr.msra.gmra.mrb[20].mxu1 %v10915_v15  ;;  %7902 = vmatpush1.bf16.msra.mxu0 %v9689_v43  ;;  %v9707_v15 = vcombine.low %v4589_v51, %v4593_v41  ;;  %v4641_v43 = vld [vmem:[#allocation9 + $0x638] sm:$0xff]  ;;  %v9753_v41 = vcombine.low %v4636_v11, %v4640_v39 }
 0x498   :  { %7933 = vmatprep.mubr.bf16.mxu0 %v10917_v52  ;;  %8074 = vmatpush1.bf16.msra.mxu1 %v9691_v53  ;;  %v9754_v53 = vcombine.high %v4636_v11, %v4640_v39  ;;  %v4649_v51 = vld [vmem:[#allocation9 + $0x678] sm:$0xff]  ;;  %v4696_v11 = vld [vmem:[#allocation9 + $0x7f0] sm:$0xff] }
 0x499   :  { %8105 = vmatprep.mubr.bf16.mxu1 %v10917_v52  ;;  %7903 = vmatprep.subr.bf16.mxu0 %v9698_v45  ;;  %v9713_v52 = vcombine.low %v4596_v54, %v4600_v22  ;;  %v9756_v45 = vcombine.high %v4637_v42, %v4641_v43  ;;  %v4656_v54 = vld [vmem:[#allocation9 + $0x6b0] sm:$0xff]  ;;  %v4653_v22 = vld [vmem:[#allocation9 + $0x698] sm:$0xff] }
 0x49a   :  { %8075 = vmatprep.subr.bf16.mxu1 %v9700_v48  ;;  %v4645_v48 = vld [vmem:[#allocation9 + $0x658] sm:$0xff] }
 0x49b   :  { %7904 = vmatpush1.bf16.msra.mxu0 %v9697_v10  ;;  %v9755_v10 = vcombine.low %v4637_v42, %v4641_v43  ;;  %v4693_v39 = vld [vmem:[#allocation9 + $0x7d8] sm:$0xff] }
 0x49c   :  { %8076 = vmatpush1.bf16.msra.mxu1 %v9699_v13  ;;  %7905 = vmatprep.subr.bf16.mxu0 %v9706_v24  ;;  %v9762_v13 = vcombine.high %v4644_v46, %v4648_v32  ;;  %v9764_v24 = vcombine.high %v4645_v48, %v4649_v51  ;;  %v4697_v42 = vld [vmem:[#allocation9 + $0x7f8] sm:$0xff]  ;;  %v4704_v46 = vld [vmem:[#allocation9 + $0x830] sm:$0xff] }
 0x49d   :  { %8077 = vmatprep.subr.bf16.mxu1 %v9708_v18  ;;  %v4652_v18 = vld [vmem:[#allocation9 + $0x690] sm:$0xff]  ;;  %v4701_v32 = vld [vmem:[#allocation9 + $0x818] sm:$0xff] }
 0x49e   :  { %v9769_v61 = vcombine.low %v4652_v18, %v4656_v54 }
 0x49f   :  { %7906 = vmatpush1.bf16.msra.mxu0 %v9705_v58  ;;  %v9763_v58 = vcombine.low %v4645_v48, %v4649_v51  ;;  %v4705_v48 = vld [vmem:[#allocation9 + $0x838] sm:$0xff] }
 0x4a0   :  { %8078 = vmatpush1.bf16.msra.mxu1 %v9707_v15  ;;  %7907 = vmatprep.subr.bf16.mxu0 %v9714_v59  ;;  %v9770_v15 = vcombine.high %v4652_v18, %v4656_v54  ;;  %v9772_v59 = vcombine.high %v4653_v22, %v4657_v57  ;;  %v4712_v18 = vld [vmem:[#allocation9 + $0x870] sm:$0xff] }
 0x4a1   :  { %8079 = vmatprep.subr.bf16.mxu1 %v9716_v60  ;;  %v4660_v60 = vld [vmem:[#allocation9 + $0x6d0] sm:$0xff] }
 0x4a2   :  { %v9777_v7 = vcombine.low %v4660_v60, %v4664_v62 }
 0x4a3   :  { %7908 = vmatpush1.bf16.msra.mxu0 %v9713_v52  ;;  %v9771_v52 = vcombine.low %v4653_v22, %v4657_v57  ;;  %v4709_v22 = vld [vmem:[#allocation9 + $0x858] sm:$0xff] }
 0x4a4   :  { %8080 = vmatpush1.bf16.msra.mxu1 %v9715_v2  ;;  %7909 = vmatprep.subr.bf16.mxu0 %v9722_v3  ;;  %v9778_v2 = vcombine.high %v4660_v60, %v4664_v62  ;;  %v9780_v3 = vcombine.high %v4661_v0, %v4665_v1  ;;  %v4713_v57 = vld [vmem:[#allocation9 + $0x878] sm:$0xff] }
 0x4a5   :  { %8081 = vmatprep.subr.bf16.mxu1 %v9724_v4  ;;  %v4668_v4 = vld [vmem:[#allocation9 + $0x710] sm:$0xff]  ;;  %v9828_v60 = vcombine.high %v4709_v22, %v4713_v57  ;;  %v4717_v62 = vld [vmem:[#allocation9 + $0x898] sm:$0xff] }
 0x4a6   :  { %v9785_v25 = vcombine.low %v4668_v4, %v4672_v5 }
 0x4a7   :  { %7910 = vmatpush1.bf16.msra.mxu0 %v9721_v8  ;;  %v9779_v8 = vcombine.low %v4661_v0, %v4665_v1  ;;  %v4721_v0 = vld [vmem:[#allocation9 + $0x8b8] sm:$0xff] }
 0x4a8   :  { %8082 = vmatpush1.bf16.msra.mxu1 %v9723_v9  ;;  %7911 = vmatprep.subr.bf16.mxu0 %v9730_v12  ;;  %v9786_v9 = vcombine.high %v4668_v4, %v4672_v5  ;;  %v9788_v12 = vcombine.high %v4669_v6, %v4673_v56  ;;  %v4728_v4 = vld [vmem:[#allocation9 + $0x8f0] sm:$0xff]  ;;  %v4725_v5 = vld [vmem:[#allocation9 + $0x8d8] sm:$0xff] }
 0x4a9   :  { %8083 = vmatprep.subr.bf16.mxu1 %v9732_v16  ;;  %v4676_v16 = vld [vmem:[#allocation9 + $0x750] sm:$0xff] }
 0x4aa   :  { %v9793_v33 = vcombine.low %v4676_v16, %v4680_v26 }
 0x4ab   :  { %7912 = vmatpush1.bf16.msra.mxu0 %v9729_v47  ;;  %v9787_v47 = vcombine.low %v4669_v6, %v4673_v56  ;;  %v4729_v6 = vld [vmem:[#allocation9 + $0x8f8] sm:$0xff] }
 0x4ac   :  { %8084 = vmatpush1.bf16.msra.mxu1 %v9731_v27  ;;  %7913 = vmatprep.subr.bf16.mxu0 %v9738_v28  ;;  %v9794_v27 = vcombine.high %v4676_v16, %v4680_v26  ;;  %v9796_v28 = vcombine.high %v4677_v31, %v4681_v35  ;;  %v4733_v16 = vld [vmem:[#allocation9 + $0x918] sm:$0xff] }
 0x4ad   :  { %8085 = vmatprep.subr.bf16.mxu1 %v9740_v29  ;;  %v4684_v29 = vld [vmem:[#allocation9 + $0x790] sm:$0xff]  ;;  %v4737_v26 = vld [vmem:[#allocation9 + $0x938] sm:$0xff] }
 0x4ae   :  { %v9801_v43 = vcombine.low %v4684_v29, %v4688_v40 }
 0x4af   :  { %7914 = vmatpush1.bf16.msra.mxu0 %v9737_v34  ;;  %v9795_v34 = vcombine.low %v4677_v31, %v4681_v35  ;;  %v9843_v31 = vcombine.low %v4725_v5, %v4729_v6 }
 0x4b0   :  { %8086 = vmatpush1.bf16.msra.mxu1 %v9739_v36  ;;  %7915 = vmatprep.subr.bf16.mxu0 %v9746_v37  ;;  %v9802_v36 = vcombine.high %v4684_v29, %v4688_v40  ;;  %v9804_v37 = vcombine.high %v4685_v21, %v4689_v17  ;;  %v4745_v29 = vld [vmem:[#allocation9 + $0x978] sm:$0xff] }
 0x4b1   :  { %8087 = vmatprep.subr.bf16.mxu1 %v9748_v38  ;;  %v4692_v38 = vld [vmem:[#allocation9 + $0x7d0] sm:$0xff] }
 0x4b2   :  { %v9809_v51 = vcombine.low %v4692_v38, %v4696_v11 }
 0x4b3   :  { %7916 = vmatpush1.bf16.msra.mxu0 %v9745_v44  ;;  %v9803_v44 = vcombine.low %v4685_v21, %v4689_v17  ;;  %v9851_v21 = vcombine.low %v4733_v16, %v4737_v26 }
 0x4b4   :  { %8088 = vmatpush1.bf16.msra.mxu1 %v9747_v30  ;;  %7917 = vmatprep.subr.bf16.mxu0 %v9754_v53  ;;  %v9810_v30 = vcombine.high %v4692_v38, %v4696_v11  ;;  %v9812_v53 = vcombine.high %v4693_v39, %v4697_v42  ;;  %v4753_v38 = vld [vmem:[#allocation9 + $0x9b8] sm:$0xff] }
 0x4b5   :  { %8089 = vmatprep.subr.bf16.mxu1 %v9756_v45  ;;  %v4700_v45 = vld [vmem:[#allocation9 + $0x810] sm:$0xff] }
 0x4b6   :  { %v9817_v54 = vcombine.low %v4700_v45, %v4704_v46 }
 0x4b7   :  { %7918 = vmatpush1.bf16.msra.mxu0 %v9753_v41  ;;  %v9811_v41 = vcombine.low %v4693_v39, %v4697_v42 }
 0x4b8   :  { %8090 = vmatpush1.bf16.msra.mxu1 %v9755_v10  ;;  %7919 = vmatprep.subr.bf16.mxu0 %v9762_v13  ;;  %v9818_v10 = vcombine.high %v4700_v45, %v4704_v46  ;;  %v9820_v13 = vcombine.high %v4701_v32, %v4705_v48  ;;  %v4761_v45 = vld [vmem:[#allocation9 + $0x9f8] sm:$0xff] }
 0x4b9   :  { %8091 = vmatprep.subr.bf16.mxu1 %v9764_v24  ;;  %v4708_v24 = vld [vmem:[#allocation9 + $0x850] sm:$0xff] }
 0x4ba   :  { %v9825_v1 = vcombine.low %v4708_v24, %v4712_v18 }
 0x4bb   :  { %7920 = vmatpush1.bf16.msra.mxu0 %v9761_v55  ;;  %v9819_v55 = vcombine.low %v4701_v32, %v4705_v48 }
 0x4bc   :  { %8092 = vmatpush1.bf16.msra.mxu1 %v9763_v58  ;;  %7921 = vmatprep.subr.bf16.mxu0 %v9770_v15  ;;  %v9826_v58 = vcombine.high %v4708_v24, %v4712_v18  ;;  %v4716_v15 = vld [vmem:[#allocation9 + $0x890] sm:$0xff]  ;;  %v4769_v24 = vld [vmem:[#allocation9 + $0xa38] sm:$0xff] }
 0x4bd   :  { %8093 = vmatprep.subr.bf16.mxu1 %v9772_v59  ;;  %v4720_v59 = vld [vmem:[#allocation9 + $0x8b0] sm:$0xff] }
 0x4be   :  { %v9833_v56 = vcombine.low %v4716_v15, %v4720_v59 }
 0x4bf   :  { %7922 = vmatpush1.bf16.msra.mxu0 %v9769_v61  ;;  %v9827_v61 = vcombine.low %v4709_v22, %v4713_v57 }
 0x4c0   :  { %8094 = vmatpush1.bf16.msra.mxu1 %v9771_v52  ;;  %7923 = vmatprep.subr.bf16.mxu0 %v9778_v2  ;;  %v9834_v52 = vcombine.high %v4716_v15, %v4720_v59  ;;  %v9836_v2 = vcombine.high %v4717_v62, %v4721_v0  ;;  %v4773_v15 = vld [vmem:[#allocation9 + $0xa58] sm:$0xff] }
 0x4c1   :  { %8095 = vmatprep.subr.bf16.mxu1 %v9780_v3  ;;  %v4724_v3 = vld [vmem:[#allocation9 + $0x8d0] sm:$0xff]  ;;  %v4777_v59 = vld [vmem:[#allocation9 + $0xa78] sm:$0xff] }
 0x4c3   :  { %7924 = vmatpush1.bf16.msra.mxu0 %v9777_v7  ;;  %v9842_v7 = vcombine.high %v4724_v3, %v4728_v4 }
 0x4c4   :  { %8096 = vmatpush1.bf16.msra.mxu1 %v9779_v8  ;;  %7925 = vmatprep.subr.bf16.mxu0 %v9786_v9  ;;  %v9844_v8 = vcombine.high %v4725_v5, %v4729_v6  ;;  %v4732_v9 = vld [vmem:[#allocation9 + $0x910] sm:$0xff]  ;;  %v9891_v5 = vcombine.low %v4773_v15, %v4777_v59 }
 0x4c5   :  { %8097 = vmatprep.subr.bf16.mxu1 %v9788_v12  ;;  %v4736_v12 = vld [vmem:[#allocation9 + $0x930] sm:$0xff] }
 0x4c6   :  { %v9850_v35 = vcombine.high %v4732_v9, %v4736_v12  ;;  %v9849_v40 = vcombine.low %v4732_v9, %v4736_v12  ;;  %v4793_v9 = vld [vmem:[#allocation9 + $0xaf8] sm:$0xff] }
 0x4c7   :  { %7926 = vmatpush1.bf16.msra.mxu0 %v9785_v25  ;;  %v9852_v25 = vcombine.high %v4733_v16, %v4737_v26 }
 0x4c8   :  { %8098 = vmatpush1.bf16.msra.mxu1 %v9787_v47  ;;  %7927 = vmatprep.subr.bf16.mxu0 %v9794_v27  ;;  %v4740_v47 = vld [vmem:[#allocation9 + $0x950] sm:$0xff] }
 0x4c9   :  { %8099 = vmatprep.subr.bf16.mxu1 %v9796_v28  ;;  %v4744_v27 = vld [vmem:[#allocation9 + $0x970] sm:$0xff]  ;;  %v4741_v28 = vld [vmem:[#allocation9 + $0x958] sm:$0xff] }
 0x4ca   :  { %v9858_v17 = vcombine.high %v4740_v47, %v4744_v27  ;;  %v9857_v11 = vcombine.low %v4740_v47, %v4744_v27  ;;  %v9859_v39 = vcombine.low %v4741_v28, %v4745_v29  ;;  %v4801_v47 = vld [vmem:[#allocation9 + $0xb38] sm:$0xff] }
 0x4cb   :  { %7928 = vmatpush1.bf16.msra.mxu0 %v9793_v33  ;;  %v9860_v33 = vcombine.high %v4741_v28, %v4745_v29 }
 0x4cc   :  { %8100 = vmatpush1.bf16.msra.mxu1 %v9795_v34  ;;  %7929 = vmatprep.subr.bf16.mxu0 %v9802_v36  ;;  %v4748_v34 = vld [vmem:[#allocation9 + $0x990] sm:$0xff] }
 0x4cd   :  { %8101 = vmatprep.subr.bf16.mxu1 %v9804_v37  ;;  %v4752_v36 = vld [vmem:[#allocation9 + $0x9b0] sm:$0xff]  ;;  %v4749_v37 = vld [vmem:[#allocation9 + $0x998] sm:$0xff] }
 0x4ce   :  { %v9866_v42 = vcombine.high %v4748_v34, %v4752_v36  ;;  %v9865_v46 = vcombine.low %v4748_v34, %v4752_v36  ;;  %v9867_v32 = vcombine.low %v4749_v37, %v4753_v38  ;;  %v4809_v34 = vld [vmem:[#allocation9 + $0xb78] sm:$0xff] }
 0x4cf   :  { %7930 = vmatpush1.bf16.msra.mxu0 %v9801_v43  ;;  %v9868_v43 = vcombine.high %v4749_v37, %v4753_v38 }
 0x4d0   :  { %8102 = vmatpush1.bf16.msra.mxu1 %v9803_v44  ;;  %7931 = vmatprep.subr.bf16.mxu0 %v9810_v30  ;;  %v4756_v44 = vld [vmem:[#allocation9 + $0x9d0] sm:$0xff] }
 0x4d1   :  { %8103 = vmatprep.subr.bf16.mxu1 %v9812_v53  ;;  %v4760_v30 = vld [vmem:[#allocation9 + $0x9f0] sm:$0xff]  ;;  %v4757_v53 = vld [vmem:[#allocation9 + $0x9d8] sm:$0xff] }
 0x4d2   :  { %v9874_v48 = vcombine.high %v4756_v44, %v4760_v30  ;;  %v9873_v18 = vcombine.low %v4756_v44, %v4760_v30  ;;  %v4817_v44 = vld [vmem:[#allocation9 + $0xbb8] sm:$0xff] }
 0x4d3   :  { %7932 = vmatpush1.bf16.msra.mxu0 %v9809_v51  ;;  %v9876_v51 = vcombine.high %v4757_v53, %v4761_v45 }
 0x4d4   :  { %8104 = vmatpush1.bf16.msra.mxu1 %v9811_v41  ;;  %7944 = vmatprep.subr.bf16.mxu0 %v9818_v10  ;;  %v4764_v41 = vld [vmem:[#allocation9 + $0xa10] sm:$0xff] }
 0x4d5   :  { %8116 = vmatprep.subr.bf16.mxu1 %v9820_v13  ;;  %v4768_v10 = vld [vmem:[#allocation9 + $0xa30] sm:$0xff]  ;;  %v4765_v13 = vld [vmem:[#allocation9 + $0xa18] sm:$0xff] }
 0x4d6   :  { %7934 = vmatmul.mubr.bf16.vlgmr.msra.gmra.mrb[20].mxu0 %v10925_v63  ;;  %v9882_v22 = vcombine.high %v4764_v41, %v4768_v10  ;;  %v9884_v57 = vcombine.high %v4765_v13, %v4769_v24 }
 0x4d7   :  { %8106 = vmatmul.mubr.bf16.vlgmr.msra.gmra.mrb[20].mxu1 %v10925_v63  ;;  %7945 = vmatpush1.bf16.msra.mxu0 %v9817_v54  ;;  %v9835_v63 = vcombine.low %v4717_v62, %v4721_v0  ;;  %v9875_v54 = vcombine.low %v4757_v53, %v4761_v45  ;;  %v9883_v62 = vcombine.low %v4765_v13, %v4769_v24 }
 0x4d8   :  { %7976 = vmatprep.mubr.bf16.mxu0 %v10957_v49  ;;  %8117 = vmatpush1.bf16.msra.mxu1 %v9819_v55  ;;  %v4772_v55 = vld [vmem:[#allocation9 + $0xa50] sm:$0xff] }
 0x4d9   :  { %8148 = vmatprep.mubr.bf16.mxu1 %v10957_v49  ;;  %7946 = vmatprep.subr.bf16.mxu0 %v9826_v58  ;;  %v9841_v49 = vcombine.low %v4724_v3, %v4728_v4  ;;  %v4776_v58 = vld [vmem:[#allocation9 + $0xa70] sm:$0xff]  ;;  %v4785_v3 = vld [vmem:[#allocation9 + $0xab8] sm:$0xff] }
 0x4da   :  { %8118 = vmatprep.subr.bf16.mxu1 %v9828_v60  ;;  %v9881_v60 = vcombine.low %v4764_v41, %v4768_v10  ;;  %v9890_v0 = vcombine.high %v4772_v55, %v4776_v58  ;;  %v9889_v4 = vcombine.low %v4772_v55, %v4776_v58  ;;  %v4825_v41 = vld [vmem:[#allocation9 + $0xbf8] sm:$0xff] }
 0x4db   :  { %7947 = vmatpush1.bf16.msra.mxu0 %v9825_v1  ;;  %v9892_v1 = vcombine.high %v4773_v15, %v4777_v59  ;;  %v4833_v55 = vld [vmem:[#allocation9 + $0xc38] sm:$0xff] }
 0x4dc   :  { %8119 = vmatpush1.bf16.msra.mxu1 %v9827_v61  ;;  %7948 = vmatprep.subr.bf16.mxu0 %v9834_v52  ;;  %v4780_v61 = vld [vmem:[#allocation9 + $0xa90] sm:$0xff] }
 0x4dd   :  { %8120 = vmatprep.subr.bf16.mxu1 %v9836_v2  ;;  %v4784_v52 = vld [vmem:[#allocation9 + $0xab0] sm:$0xff]  ;;  %v4781_v2 = vld [vmem:[#allocation9 + $0xa98] sm:$0xff] }
 0x4de   :  { %v9898_v6 = vcombine.high %v4780_v61, %v4784_v52  ;;  %v9897_v12 = vcombine.low %v4780_v61, %v4784_v52  ;;  %v9899_v16 = vcombine.low %v4781_v2, %v4785_v3  ;;  %v4837_v61 = vld [vmem:[#allocation9 + $0xc58] sm:$0xff] }
 0x4df   :  { %7949 = vmatpush1.bf16.msra.mxu0 %v9833_v56  ;;  %v9900_v56 = vcombine.high %v4781_v2, %v4785_v3  ;;  %v4841_v52 = vld [vmem:[#allocation9 + $0xc78] sm:$0xff] }
 0x4e0   :  { %8121 = vmatpush1.bf16.msra.mxu1 %v9835_v63  ;;  %7950 = vmatprep.subr.bf16.mxu0 %v9842_v7  ;;  %v4788_v63 = vld [vmem:[#allocation9 + $0xad0] sm:$0xff] }
 0x4e1   :  { %8122 = vmatprep.subr.bf16.mxu1 %v9844_v8  ;;  %v4792_v7 = vld [vmem:[#allocation9 + $0xaf0] sm:$0xff]  ;;  %v4789_v8 = vld [vmem:[#allocation9 + $0xad8] sm:$0xff] }
 0x4e2   :  { %v9906_v26 = vcombine.high %v4788_v63, %v4792_v7  ;;  %v9905_v27 = vcombine.low %v4788_v63, %v4792_v7  ;;  %v9907_v28 = vcombine.low %v4789_v8, %v4793_v9  ;;  %v4849_v63 = vld [vmem:[#allocation9 + $0xcb8] sm:$0xff] }
 0x4e3   :  { %7951 = vmatpush1.bf16.msra.mxu0 %v9841_v49  ;;  %v9908_v49 = vcombine.high %v4789_v8, %v4793_v9  ;;  %v9955_v8 = vcombine.low %v4837_v61, %v4841_v52 }
 0x4e4   :  { %8123 = vmatpush1.bf16.msra.mxu1 %v9843_v31  ;;  %7952 = vmatprep.subr.bf16.mxu0 %v9850_v35  ;;  %v4796_v31 = vld [vmem:[#allocation9 + $0xb10] sm:$0xff] }
 0x4e5   :  { %8124 = vmatprep.subr.bf16.mxu1 %v9852_v25  ;;  %v4800_v35 = vld [vmem:[#allocation9 + $0xb30] sm:$0xff]  ;;  %v4797_v25 = vld [vmem:[#allocation9 + $0xb18] sm:$0xff] }
 0x4e6   :  { %v9914_v29 = vcombine.high %v4796_v31, %v4800_v35  ;;  %v9913_v36 = vcombine.low %v4796_v31, %v4800_v35  ;;  %v9915_v37 = vcombine.low %v4797_v25, %v4801_v47  ;;  %v4857_v31 = vld [vmem:[#allocation9 + $0xcf8] sm:$0xff] }
 0x4e7   :  { %7953 = vmatpush1.bf16.msra.mxu0 %v9849_v40  ;;  %v9916_v40 = vcombine.high %v4797_v25, %v4801_v47 }
 0x4e8   :  { %8125 = vmatpush1.bf16.msra.mxu1 %v9851_v21  ;;  %7954 = vmatprep.subr.bf16.mxu0 %v9858_v17  ;;  %v4804_v21 = vld [vmem:[#allocation9 + $0xb50] sm:$0xff] }
 0x4e9   :  { %8126 = vmatprep.subr.bf16.mxu1 %v9860_v33  ;;  %v4808_v17 = vld [vmem:[#allocation9 + $0xb70] sm:$0xff]  ;;  %v4805_v33 = vld [vmem:[#allocation9 + $0xb58] sm:$0xff] }
 0x4ea   :  { %v9922_v38 = vcombine.high %v4804_v21, %v4808_v17  ;;  %v9921_v30 = vcombine.low %v4804_v21, %v4808_v17  ;;  %v9923_v53 = vcombine.low %v4805_v33, %v4809_v34 }
 0x4eb   :  { %7955 = vmatpush1.bf16.msra.mxu0 %v9857_v11  ;;  %v9924_v11 = vcombine.high %v4805_v33, %v4809_v34  ;;  %v4868_v34 = vld [vmem:[#allocation9 + $0xd50] sm:$0xff] }
 0x4ec   :  { %8127 = vmatpush1.bf16.msra.mxu1 %v9859_v39  ;;  %7956 = vmatprep.subr.bf16.mxu0 %v9866_v42  ;;  %v4812_v39 = vld [vmem:[#allocation9 + $0xb90] sm:$0xff] }
 0x4ed   :  { %8128 = vmatprep.subr.bf16.mxu1 %v9868_v43  ;;  %v4816_v42 = vld [vmem:[#allocation9 + $0xbb0] sm:$0xff]  ;;  %v4813_v43 = vld [vmem:[#allocation9 + $0xb98] sm:$0xff] }
 0x4ee   :  { %v9930_v45 = vcombine.high %v4812_v39, %v4816_v42  ;;  %v9929_v10 = vcombine.low %v4812_v39, %v4816_v42  ;;  %v9931_v13 = vcombine.low %v4813_v43, %v4817_v44 }
 0x4ef   :  { %7957 = vmatpush1.bf16.msra.mxu0 %v9865_v46  ;;  %v9932_v46 = vcombine.high %v4813_v43, %v4817_v44  ;;  %v4876_v44 = vld [vmem:[#allocation9 + $0xd90] sm:$0xff] }
 0x4f0   :  { %8129 = vmatpush1.bf16.msra.mxu1 %v9867_v32  ;;  %7958 = vmatprep.subr.bf16.mxu0 %v9874_v48  ;;  %v4820_v32 = vld [vmem:[#allocation9 + $0xbd0] sm:$0xff] }
 0x4f1   :  { %8130 = vmatprep.subr.bf16.mxu1 %v9876_v51  ;;  %v4824_v48 = vld [vmem:[#allocation9 + $0xbf0] sm:$0xff]  ;;  %v4821_v51 = vld [vmem:[#allocation9 + $0xbd8] sm:$0xff] }
 0x4f2   :  { %v9938_v24 = vcombine.high %v4820_v32, %v4824_v48  ;;  %v9937_v58 = vcombine.low %v4820_v32, %v4824_v48  ;;  %v9939_v15 = vcombine.low %v4821_v51, %v4825_v41 }
 0x4f3   :  { %7959 = vmatpush1.bf16.msra.mxu0 %v9873_v18  ;;  %v9940_v18 = vcombine.high %v4821_v51, %v4825_v41 }
 0x4f4   :  { %8131 = vmatpush1.bf16.msra.mxu1 %v9875_v54  ;;  %7960 = vmatprep.subr.bf16.mxu0 %v9882_v22  ;;  %v4828_v54 = vld [vmem:[#allocation9 + $0xc10] sm:$0xff] }
 0x4f5   :  { %8132 = vmatprep.subr.bf16.mxu1 %v9884_v57  ;;  %v4832_v22 = vld [vmem:[#allocation9 + $0xc30] sm:$0xff]  ;;  %v4829_v57 = vld [vmem:[#allocation9 + $0xc18] sm:$0xff] }
 0x4f6   :  { %v9946_v59 = vcombine.high %v4828_v54, %v4832_v22  ;;  %v9947_v2 = vcombine.low %v4829_v57, %v4833_v55 }
 0x4f7   :  { %7961 = vmatpush1.bf16.msra.mxu0 %v9881_v60  ;;  %v9948_v60 = vcombine.high %v4829_v57, %v4833_v55  ;;  %v4889_v57 = vld [vmem:[#allocation9 + $0xdf8] sm:$0xff] }
 0x4f8   :  { %8133 = vmatpush1.bf16.msra.mxu1 %v9883_v62  ;;  %7962 = vmatprep.subr.bf16.mxu0 %v9890_v0  ;;  %v4836_v62 = vld [vmem:[#allocation9 + $0xc50] sm:$0xff] }
 0x4f9   :  { %8134 = vmatprep.subr.bf16.mxu1 %v9892_v1  ;;  %v4840_v0 = vld [vmem:[#allocation9 + $0xc70] sm:$0xff]  ;;  %v9945_v1 = vcombine.low %v4828_v54, %v4832_v22  ;;  %v4885_v22 = vld [vmem:[#allocation9 + $0xdd8] sm:$0xff] }
 0x4fa   :  { %v9954_v3 = vcombine.high %v4836_v62, %v4840_v0  ;;  %v9953_v7 = vcombine.low %v4836_v62, %v4840_v0 }
 0x4fb   :  { %7963 = vmatpush1.bf16.msra.mxu0 %v9889_v4  ;;  %v4844_v4 = vld [vmem:[#allocation9 + $0xc90] sm:$0xff] }
 0x4fc   :  { %8135 = vmatpush1.bf16.msra.mxu1 %v9891_v5  ;;  %7964 = vmatprep.subr.bf16.mxu0 %v9898_v6  ;;  %v4848_v5 = vld [vmem:[#allocation9 + $0xcb0] sm:$0xff]  ;;  %v9956_v6 = vcombine.high %v4837_v61, %v4841_v52 }
 0x4fd   :  { %8136 = vmatprep.subr.bf16.mxu1 %v9900_v56  ;;  %v4845_v56 = vld [vmem:[#allocation9 + $0xc98] sm:$0xff]  ;;  %v9962_v9 = vcombine.high %v4844_v4, %v4848_v5  ;;  %v9961_v35 = vcombine.low %v4844_v4, %v4848_v5  ;;  %v4892_v4 = vld [vmem:[#allocation9 + $0xe10] sm:$0xff] }
 0x4fe   :  { %v4896_v5 = vld [vmem:[#allocation9 + $0xe30] sm:$0xff] }
 0x4ff   :  { %7965 = vmatpush1.bf16.msra.mxu0 %v9897_v12  ;;  %v9964_v12 = vcombine.high %v4845_v56, %v4849_v63 }
 0x500   :  { %8137 = vmatpush1.bf16.msra.mxu1 %v9899_v16  ;;  %7966 = vmatprep.subr.bf16.mxu0 %v9906_v26  ;;  %v4852_v16 = vld [vmem:[#allocation9 + $0xcd0] sm:$0xff] }
 0x501   :  { %8138 = vmatprep.subr.bf16.mxu1 %v9908_v49  ;;  %v4856_v26 = vld [vmem:[#allocation9 + $0xcf0] sm:$0xff]  ;;  %v4853_v49 = vld [vmem:[#allocation9 + $0xcd8] sm:$0xff] }
 0x502   :  { %v9970_v25 = vcombine.high %v4852_v16, %v4856_v26  ;;  %v9972_v47 = vcombine.high %v4853_v49, %v4857_v31  ;;  %v9971_v21 = vcombine.low %v4853_v49, %v4857_v31  ;;  %v4905_v49 = vld [vmem:[#allocation9 + $0xe78] sm:$0xff]  ;;  %v10009_v31 = vcombine.low %v4892_v4, %v4896_v5 }
 0x503   :  { %7967 = vmatpush1.bf16.msra.mxu0 %v9905_v27  ;;  %v4860_v27 = vld [vmem:[#allocation9 + $0xd10] sm:$0xff] }
 0x504   :  { %8139 = vmatpush1.bf16.msra.mxu1 %v9907_v28  ;;  %7968 = vmatprep.subr.bf16.mxu0 %v9914_v29  ;;  %v4864_v28 = vld [vmem:[#allocation9 + $0xd30] sm:$0xff]  ;;  %v4861_v29 = vld [vmem:[#allocation9 + $0xd18] sm:$0xff] }
 0x505   :  { %8140 = vmatprep.subr.bf16.mxu1 %v9916_v40  ;;  %v4865_v40 = vld [vmem:[#allocation9 + $0xd38] sm:$0xff]  ;;  %v9978_v17 = vcombine.high %v4860_v27, %v4864_v28 }
 0x506   :  { %v9980_v33 = vcombine.high %v4861_v29, %v4865_v40  ;;  %v9979_v39 = vcombine.low %v4861_v29, %v4865_v40  ;;  %v4909_v29 = vld [vmem:[#allocation9 + $0xe98] sm:$0xff] }
 0x507   :  { %7969 = vmatpush1.bf16.msra.mxu0 %v9913_v36  ;;  %v4872_v36 = vld [vmem:[#allocation9 + $0xd70] sm:$0xff]  ;;  %v4913_v40 = vld [vmem:[#allocation9 + $0xeb8] sm:$0xff] }
 0x508   :  { %8141 = vmatpush1.bf16.msra.mxu1 %v9915_v37  ;;  %7970 = vmatprep.subr.bf16.mxu0 %v9922_v38  ;;  %v4869_v37 = vld [vmem:[#allocation9 + $0xd58] sm:$0xff]  ;;  %v9986_v42 = vcombine.high %v4868_v34, %v4872_v36 }
 0x509   :  { %8142 = vmatprep.subr.bf16.mxu1 %v9924_v11  ;;  %v4873_v38 = vld [vmem:[#allocation9 + $0xd78] sm:$0xff]  ;;  %v9977_v11 = vcombine.low %v4860_v27, %v4864_v28  ;;  %v4908_v27 = vld [vmem:[#allocation9 + $0xe90] sm:$0xff] }
 0x50a   :  { %v9988_v43 = vcombine.high %v4869_v37, %v4873_v38  ;;  %v9987_v32 = vcombine.low %v4869_v37, %v4873_v38  ;;  %v4912_v28 = vld [vmem:[#allocation9 + $0xeb0] sm:$0xff]  ;;  %v4917_v38 = vld [vmem:[#allocation9 + $0xed8] sm:$0xff] }
 0x50b   :  { %7971 = vmatpush1.bf16.msra.mxu0 %v9921_v30  ;;  %v4880_v30 = vld [vmem:[#allocation9 + $0xdb0] sm:$0xff] }
 0x50c   :  { %8143 = vmatpush1.bf16.msra.mxu1 %v9923_v53  ;;  %7972 = vmatprep.subr.bf16.mxu0 %v9930_v45  ;;  %v4877_v53 = vld [vmem:[#allocation9 + $0xd98] sm:$0xff]  ;;  %v9994_v48 = vcombine.high %v4876_v44, %v4880_v30  ;;  %v4920_v37 = vld [vmem:[#allocation9 + $0xef0] sm:$0xff] }
 0x50d   :  { %8144 = vmatprep.subr.bf16.mxu1 %v9932_v46  ;;  %v4881_v45 = vld [vmem:[#allocation9 + $0xdb8] sm:$0xff]  ;;  %v9985_v46 = vcombine.low %v4868_v34, %v4872_v36  ;;  %v10028_v34 = vcombine.high %v4909_v29, %v4913_v40  ;;  %v4916_v36 = vld [vmem:[#allocation9 + $0xed0] sm:$0xff] }
 0x50f   :  { %7973 = vmatpush1.bf16.msra.mxu0 %v9929_v10  ;;  %v9996_v10 = vcombine.high %v4877_v53, %v4881_v45 }
 0x510   :  { %8145 = vmatpush1.bf16.msra.mxu1 %v9931_v13  ;;  %7974 = vmatprep.subr.bf16.mxu0 %v9938_v24  ;;  %v4884_v13 = vld [vmem:[#allocation9 + $0xdd0] sm:$0xff] }
 0x511   :  { %8146 = vmatprep.subr.bf16.mxu1 %v9940_v18  ;;  %v4888_v24 = vld [vmem:[#allocation9 + $0xdf0] sm:$0xff] }
 0x512   :  { %v10002_v61 = vcombine.high %v4884_v13, %v4888_v24 }
 0x513   :  { %7975 = vmatpush1.bf16.msra.mxu0 %v9937_v58 }
 0x514   :  { %8147 = vmatpush1.bf16.msra.mxu1 %v9939_v15  ;;  %7987 = vmatprep.subr.bf16.mxu0 %v9946_v59  ;;  %v9993_v15 = vcombine.low %v4876_v44, %v4880_v30  ;;  %v9995_v59 = vcombine.low %v4877_v53, %v4881_v45  ;;  %v10034_v44 = vcombine.high %v4916_v36, %v4920_v37  ;;  %v4924_v53 = vld [vmem:[#allocation9 + $0xf10] sm:$0xff] }
 0x515   :  { %8159 = vmatprep.subr.bf16.mxu1 %v9948_v60  ;;  %v4928_v45 = vld [vmem:[#allocation9 + $0xf30] sm:$0xff] }
 0x516   :  { %7977 = vmatmul.mubr.bf16.vlgmr.msra.gmra.mrb[20].mxu0 %v10963_v50 }
 0x517   :  { %8149 = vmatmul.mubr.bf16.vlgmr.msra.gmra.mrb[20].mxu1 %v10963_v50  ;;  %7988 = vmatpush1.bf16.msra.mxu0 %v9945_v1  ;;  %v9963_v50 = vcombine.low %v4845_v56, %v4849_v63  ;;  %v4897_v56 = vld [vmem:[#allocation9 + $0xe38] sm:$0xff]  ;;  %v10001_v63 = vcombine.low %v4884_v13, %v4888_v24  ;;  %v10042_v24 = vcombine.high %v4924_v53, %v4928_v45 }
 0x518   :  { %8019 = vmatprep.mubr.bf16.mxu0 %v10967_v14  ;;  %8160 = vmatpush1.bf16.msra.mxu1 %v9947_v2 }
 0x519   :  { %8191 = vmatprep.mubr.bf16.mxu1 %v10967_v14  ;;  %7989 = vmatprep.subr.bf16.mxu0 %v9954_v3  ;;  %v9969_v14 = vcombine.low %v4852_v16, %v4856_v26  ;;  %v10004_v3 = vcombine.high %v4885_v22, %v4889_v57  ;;  %v4904_v16 = vld [vmem:[#allocation9 + $0xe70] sm:$0xff]  ;;  %v4901_v26 = vld [vmem:[#allocation9 + $0xe58] sm:$0xff] }
 0x51a   :  { %8161 = vmatprep.subr.bf16.mxu1 %v9956_v6  ;;  %v4893_v6 = vld [vmem:[#allocation9 + $0xe18] sm:$0xff] }
 0x51b   :  { %7990 = vmatpush1.bf16.msra.mxu0 %v9953_v7  ;;  %v10003_v7 = vcombine.low %v4885_v22, %v4889_v57  ;;  %v4932_v57 = vld [vmem:[#allocation9 + $0xf50] sm:$0xff] }
 0x51c   :  { %8162 = vmatpush1.bf16.msra.mxu1 %v9955_v8  ;;  %7991 = vmatprep.subr.bf16.mxu0 %v9962_v9  ;;  %v10010_v8 = vcombine.high %v4892_v4, %v4896_v5  ;;  %v10012_v9 = vcombine.high %v4893_v6, %v4897_v56  ;;  %v10041_v4 = vcombine.low %v4924_v53, %v4928_v45  ;;  %v10340_v53 = vld [vmem:[#allocation12 + $0x88] sm:$0xff]   ;;  %v10341_v45 = vld [vmem:[#allocation12 + $0x50] sm:$0xff]  }
 0x51d   :  { %8163 = vmatprep.subr.bf16.mxu1 %v9964_v12  ;;  %v4900_v12 = vld [vmem:[#allocation9 + $0xe50] sm:$0xff] }
 0x51f   :  { %7992 = vmatpush1.bf16.msra.mxu0 %v9961_v35  ;;  %v11021_v35 = vld [vmem:[#allocation10] sm:$0xff] }
 0x520   :  { %8164 = vmatpush1.bf16.msra.mxu1 %v9963_v50  ;;  %7993 = vmatprep.subr.bf16.mxu0 %v9970_v25  ;;  %v10011_v50 = vcombine.low %v4893_v6, %v4897_v56  ;;  %v10018_v25 = vcombine.high %v4900_v12, %v4904_v16 }
 0x521   :  { %8165 = vmatprep.subr.bf16.mxu1 %v9972_v47  ;;  %v10020_v47 = vcombine.high %v4901_v26, %v4905_v49 }
 0x523   :  { %7994 = vmatpush1.bf16.msra.mxu0 %v9969_v14  ;;  %v11025_v14 = vrot.slane %v11021_v35, %v10863_v19 }
 0x524   :  { %8166 = vmatpush1.bf16.msra.mxu1 %v9971_v21  ;;  %7995 = vmatprep.subr.bf16.mxu0 %v9978_v17  ;;  %v10017_v21 = vcombine.low %v4900_v12, %v4904_v16  ;;  %v10019_v17 = vcombine.low %v4901_v26, %v4905_v49  ;;  %v4945_v12 = vld [vmem:[#allocation9 + $0xfb8] sm:$0xff] }
 0x525   :  { %8167 = vmatprep.subr.bf16.mxu1 %v9980_v33  ;;  %v10026_v33 = vcombine.high %v4908_v27, %v4912_v28 }
 0x527   :  { %7996 = vmatpush1.bf16.msra.mxu0 %v9977_v11  ;;  %v4921_v11 = vld [vmem:[#allocation9 + $0xef8] sm:$0xff] }
 0x528   :  { %8168 = vmatpush1.bf16.msra.mxu1 %v9979_v39  ;;  %7997 = vmatprep.subr.bf16.mxu0 %v9986_v42  ;;  %v8227_v39 = vcombine.high %v11025_v14, %v11025_v14  ;;  %v10025_v42 = vcombine.low %v4908_v27, %v4912_v28  ;;  %v10036_v30 = vcombine.high %v4917_v38, %v4921_v11  ;;  %v4949_v28 = vld [vmem:[#allocation9 + $0xfd8] sm:$0xff] }
 0x529   :  { %v10997_v51 = vpop.f32.mrb[16].mxu0  ;;  %v10999_v41 = vpop.f32.mrb[16].mxu1  ;;  %8169 = vmatprep.subr.bf16.mxu1 %v9988_v43  ;;  %v10027_v43 = vcombine.low %v4909_v29, %v4913_v40  ;;  %v10035_v13 = vcombine.low %v4917_v38, %v4921_v11  ;;  %v4953_v29 = vld [vmem:[#allocation9 + $0xff8] sm:$0xff] }
 0x52a   :  { %v11001_v18 = vpop.f32.mrb[17].mxu0  ;;  %v11003_v54 = vpop.f32.mrb[17].mxu1  ;;  %v10067_v11 = vcombine.low %v4949_v28, %v4953_v29 }
 0x52b   :  { %v11005_v55 = vpop.f32.mrb[18].mxu0  ;;  %v11007_v58 = vpop.f32.mrb[18].mxu1  ;;  %7998 = vmatpush1.bf16.msra.mxu0 %v9985_v46  ;;  %v4925_v46 = vld [vmem:[#allocation9 + $0xf18] sm:$0xff] }
 0x52c   :  { %v8202_v60 = vpack.c.bf16 %v11005_v55, %v10997_v51  ;;  %v8204_v62 = vpack.c.bf16 %v11007_v58, %v10999_v41  ;;  %8170 = vmatpush1.bf16.msra.mxu1 %v9987_v32  ;;  %v11013_v0 = vpop.f32.mrb[19].mxu0  ;;  %v11015_v1 = vpop.f32.mrb[19].mxu1  ;;  %7999 = vmatprep.subr.bf16.mxu0 %v9994_v48  ;;  %v4929_v32 = vld [vmem:[#allocation9 + $0xf38] sm:$0xff]  ;;  %v8249_v48 = vrot.slane %v8227_v39, %v10863_v19  ;;  %v10333_v39 = vld [vmem:[#allocation12 + $0x40] sm:$0xff]   ;;  %v10369_v41 = vld [vmem:[#allocation12 + $0x148] sm:$0xff]  }
 0x52d   :  { %v8203_v52 = vpack.c.bf16 %v11013_v0, %v11001_v18  ;;  %v8205_v2 = vpack.c.bf16 %v11015_v1, %v11003_v54  ;;  %8171 = vmatprep.subr.bf16.mxu1 %v9996_v10  ;;  %v10033_v10 = vcombine.low %v4916_v36, %v4920_v37  ;;  %v10044_v22 = vcombine.high %v4925_v46, %v4929_v32  ;;  %v10336_v18 = vld [vmem:[#allocation12 + $0x80] sm:$0xff]   ;;  %v10337_v0 = vld [vmem:[#allocation12 + $0x48] sm:$0xff]  }
 0x52e   :  { %v10043_v5 = vcombine.low %v4925_v46, %v4929_v32  ;;  %v10338_v1 = vld [vmem:[#allocation12 + $0xc8] sm:$0xff]   ;;  %v10342_v46 = vld [vmem:[#allocation12 + $0xd0] sm:$0xff]   ;;  %v10366_v51 = vld [vmem:[#allocation12 + $0x1c0] sm:$0xff]  }
 0x52f   :  { %8000 = vmatpush1.bf16.msra.mxu0 %v9993_v15  ;;  %v4936_v15 = vld [vmem:[#allocation9 + $0xf70] sm:$0xff]  ;;  %v10343_v32 = vld [vmem:[#allocation12 + $0x10] sm:$0xff]   ;;  %v10367_v55 = vld [vmem:[#allocation12 + $0x100] sm:$0xff]  }
 0x530   :  { %8172 = vmatpush1.bf16.msra.mxu1 %v9995_v59  ;;  %8001 = vmatprep.subr.bf16.mxu0 %v10002_v61  ;;  %v4933_v59 = vld [vmem:[#allocation9 + $0xf58] sm:$0xff]  ;;  %v10050_v6 = vcombine.high %v4932_v57, %v4936_v15  ;;  %v10049_v26 = vcombine.low %v4932_v57, %v4936_v15  ;;  %v10349_v57 = vld [vmem:[#allocation12 + $0x60] sm:$0xff]  }
 0x531   :  { %8173 = vmatprep.subr.bf16.mxu1 %v10004_v3  ;;  %v4937_v61 = vld [vmem:[#allocation9 + $0xf78] sm:$0xff]  ;;  %v8259_v3 = vcombine.high %v8249_v48, %v8249_v48 }
 0x532   :  { %v10052_v56 = vcombine.high %v4933_v59, %v4937_v61  ;;  %v10051_v49 = vcombine.low %v4933_v59, %v4937_v61  ;;  %v10350_v59 = vld [vmem:[#allocation12 + $0xe0] sm:$0xff]  }
 0x533   :  { %8002 = vmatpush1.bf16.msra.mxu0 %v10001_v63  ;;  %v4940_v63 = vld [vmem:[#allocation9 + $0xf90] sm:$0xff]  ;;  %v8283_v16 = vpack.i.b16 %v8259_v3, %v8259_v3  ;;  %v10351_v61 = vld [vmem:[#allocation12 + $0x20] sm:$0xff]  }
 0x534   :  { %8174 = vmatpush1.bf16.msra.mxu1 %v10003_v7  ;;  %8003 = vmatprep.subr.bf16.mxu0 %v10010_v8  ;;  %v4944_v7 = vld [vmem:[#allocation9 + $0xfb0] sm:$0xff]  ;;  %v8269_v8 = vpack.i.b16 %v8249_v48, %v8249_v48  ;;  %v10344_v48 = vld [vmem:[#allocation12 + $0x90] sm:$0xff]  }
 0x535   :  { %8175 = vmatprep.subr.bf16.mxu1 %v10012_v9  ;;  %v4941_v9 = vld [vmem:[#allocation9 + $0xf98] sm:$0xff]  ;;  %v8288_v40 = vrot.slane %v8283_v16, %v10793_v23 }
 0x536   :  { %v8274_v27 = vrot.slane %v8269_v8, %v10793_v23  ;;  %v10357_v8 = vld [vmem:[#allocation12 + $0x70] sm:$0xff]  }
 0x537   :  { %8004 = vmatpush1.bf16.msra.mxu0 %v10009_v31  ;;  %v10058_v31 = vcombine.high %v4940_v63, %v4944_v7  ;;  %v8320_v37 = vadd.bf16 %v8288_v40, %v8205_v2  ;;  %v10339_v2 = vld [vmem:[#allocation12 + $0x8] sm:$0xff]   ;;  %v10359_v16 = vld [vmem:[#allocation12 + $0x30] sm:$0xff]  }
 0x538   :  { %8176 = vmatpush1.bf16.msra.mxu1 %v10011_v50  ;;  %8005 = vmatprep.subr.bf16.mxu0 %v10018_v25  ;;  %v10060_v50 = vcombine.high %v4941_v9, %v4945_v12  ;;  %v4948_v25 = vld [vmem:[#allocation9 + $0xfd0] sm:$0xff]  ;;  %v8318_v36 = vadd.bf16 %v8274_v27, %v8203_v52 }
 0x539   :  { %8177 = vmatprep.subr.bf16.mxu1 %v10020_v47  ;;  %v4952_v47 = vld [vmem:[#allocation9 + $0xff0] sm:$0xff] }
 0x53a   :  { %v10065_v38 = vcombine.low %v4948_v25, %v4952_v47 }
 0x53b   :  { %8006 = vmatpush1.bf16.msra.mxu0 %v10017_v21  ;;  %v10057_v21 = vcombine.low %v4940_v63, %v4944_v7  ;;  %v10356_v7 = vld [vmem:[#allocation12 + $0xa8] sm:$0xff]  }
 0x53c   :  { %8178 = vmatpush1.bf16.msra.mxu1 %v10019_v17  ;;  %8007 = vmatprep.subr.bf16.mxu0 %v10026_v33  ;;  %v10059_v17 = vcombine.low %v4941_v9, %v4945_v12  ;;  %v10066_v33 = vcombine.high %v4948_v25, %v4952_v47  ;;  %v10358_v12 = vld [vmem:[#allocation12 + $0xf0] sm:$0xff]   ;;  %v10362_v25 = vld [vmem:[#allocation12 + $0xf8] sm:$0xff]  }
 0x53d   :  { %8179 = vmatprep.subr.bf16.mxu1 %v10028_v34  ;;  %v10068_v34 = vcombine.high %v4949_v28, %v4953_v29  ;;  %v10363_v47 = vld [vmem:[#allocation12 + $0x38] sm:$0xff]   ;;  %v10365_v29 = vld [vmem:[#allocation12 + $0x140] sm:$0xff]  }
 0x53e   :  { %v10364_v28 = vld [vmem:[#allocation12 + $0xb8] sm:$0xff]  }
 0x53f   :  { %8008 = vmatpush1.bf16.msra.mxu0 %v10025_v42  ;;  %v10334_v42 = vld [vmem:[#allocation12 + $0xc0] sm:$0xff]  }
 0x540   :  { %8180 = vmatpush1.bf16.msra.mxu1 %v10027_v43  ;;  %8009 = vmatprep.subr.bf16.mxu0 %v10034_v44  ;;  %v8326_v43 = vmul.bf16 1009007652, %v8318_v36  ;;  %v8328_v44 = vmul.bf16 1009007652, %v8320_v37 }
 0x541   :  { %8181 = vmatprep.subr.bf16.mxu1 %v10036_v30  ;;  %v10335_v30 = vld [vmem:[#allocation12] sm:$0xff]  }
 0x542   :  { %v8334_v54 = vmax.bf16 %v8326_v43, %v8318_v36  ;;  %v8336_v52 = vmax.bf16 %v8328_v44, %v8320_v37  ;;  %v10374_v36 = vld [vmem:[#allocation12 + $0x1d0] sm:$0xff]   ;;  %v10380_v43 = vld [vmem:[#allocation12 + $0x198] sm:$0xff]   ;;  %v10381_v44 = vld [vmem:[#allocation12 + $0x160] sm:$0xff]  }
 0x543   :  { %8010 = vmatpush1.bf16.msra.mxu0 %v10033_v10  ;;  %v10345_v10 = vld [vmem:[#allocation12 + $0x58] sm:$0xff]   ;;  %v10375_v37 = vld [vmem:[#allocation12 + $0x110] sm:$0xff]  }
 0x544   :  { %8182 = vmatpush1.bf16.msra.mxu1 %v10035_v13  ;;  %8011 = vmatprep.subr.bf16.mxu0 %v10042_v24  ;;  %v10346_v13 = vld [vmem:[#allocation12 + $0xd8] sm:$0xff]  }
 0x545   :  { %8183 = vmatprep.subr.bf16.mxu1 %v10044_v22  ;;  %v10347_v24 = vld [vmem:[#allocation12 + $0x18] sm:$0xff]  }
 0x546   :  { %v10348_v22 = vld [vmem:[#allocation12 + $0x98] sm:$0xff]  }
 0x547   :  { %8012 = vmatpush1.bf16.msra.mxu0 %v10041_v4  ;;  %v10352_v4 = vld [vmem:[#allocation12 + $0xa0] sm:$0xff]  }
 0x548   :  { %8184 = vmatpush1.bf16.msra.mxu1 %v10043_v5  ;;  %8013 = vmatprep.subr.bf16.mxu0 %v10050_v6  ;;  %v10353_v5 = vld [vmem:[#allocation12 + $0x68] sm:$0xff]  }
 0x549   :  { %8185 = vmatprep.subr.bf16.mxu1 %v10052_v56  ;;  %v10355_v56 = vld [vmem:[#allocation12 + $0x28] sm:$0xff]  }
 0x54b   :  { %8014 = vmatpush1.bf16.msra.mxu0 %v10049_v26 }
 0x54c   :  { %8186 = vmatpush1.bf16.msra.mxu1 %v10051_v49  ;;  %8015 = vmatprep.subr.bf16.mxu0 %v10058_v31  ;;  %v10360_v49 = vld [vmem:[#allocation12 + $0xb0] sm:$0xff]   ;;  %v10361_v31 = vld [vmem:[#allocation12 + $0x78] sm:$0xff]  }
 0x54d   :  { %8187 = vmatprep.subr.bf16.mxu1 %v10060_v50 }
 0x54f   :  { %8016 = vmatpush1.bf16.msra.mxu0 %v10057_v21  ;;  %v10368_v21 = vld [vmem:[#allocation12 + $0x180] sm:$0xff]  }
 0x550   :  { %8188 = vmatpush1.bf16.msra.mxu1 %v10059_v17  ;;  %8017 = vmatprep.subr.bf16.mxu0 %v10066_v33  ;;  %v10371_v17 = vld [vmem:[#allocation12 + $0x108] sm:$0xff]  }
 0x551   :  { %8189 = vmatprep.subr.bf16.mxu1 %v10068_v34  ;;  %v10372_v33 = vld [vmem:[#allocation12 + $0x188] sm:$0xff]   ;;  %v10373_v34 = vld [vmem:[#allocation12 + $0x150] sm:$0xff]  }
 0x553   :  { %8018 = vmatpush1.bf16.msra.mxu0 %v10065_v38  ;;  %v10376_v38 = vld [vmem:[#allocation12 + $0x190] sm:$0xff]  }
 0x554   :  { %8190 = vmatpush1.bf16.msra.mxu1 %v10067_v11  ;;  %10134 = vmatprep.subr.bf16.mxu0 %v10333_v39  ;;  %v10377_v11 = vld [vmem:[#allocation12 + $0x158] sm:$0xff]  }
 0x555   :  { %10156 = vmatprep.subr.bf16.mxu1 %v10334_v42  ;;  %v10378_v39 = vld [vmem:[#allocation12 + $0x1d8] sm:$0xff]  }
 0x556   :  { %8020 = vmatmul.mubr.bf16.vlgmr.msra.gmra.mrb[20].mxu0 %v10979_v20  ;;  %v10379_v42 = vld [vmem:[#allocation12 + $0x118] sm:$0xff]  }
 0x557   :  { %8192 = vmatmul.mubr.bf16.vlgmr.msra.gmra.mrb[20].mxu1 %v10979_v20  ;;  %10135 = vmatpush3.bf16.msra.mxu0 %v10335_v30  ;;  %v8235_v20 = vrot.slane %v11025_v14, %v10863_v19  ;;  %v10354_v14 = vld [vmem:[#allocation12 + $0xe8] sm:$0xff]   ;;  %v10382_v30 = vld [vmem:[#allocation12 + $0x1e0] sm:$0xff]  }
 0x558   :  { %8892 = vmatprep.mubr.bf16.mxu0 %v8334_v54  ;;  %10157 = vmatpush3.bf16.msra.mxu1 %v10336_v18  ;;  %v10383_v18 = vld [vmem:[#allocation12 + $0x120] sm:$0xff]   ;;  %v10385_v54 = vld [vmem:[#allocation12 + $0x168] sm:$0xff]  }
 0x559   :  { %8933 = vmatprep.mubr.bf16.mxu1 %v8336_v52  ;;  %10136 = vmatprep.subr.bf16.mxu0 %v10337_v0  ;;  %v8257_v15 = vcombine.high %v8235_v20, %v8235_v20  ;;  %v8262_v3 = vpack.i.b16 %v8235_v20, %v8235_v20  ;;  %v10384_v0 = vld [vmem:[#allocation12 + $0x1a0] sm:$0xff]   ;;  %v10388_v52 = vld [vmem:[#allocation12 + $0x128] sm:$0xff]   ;;  %v10396_v20 = vld [vmem:[#allocation12 + $0x138] sm:$0xff]  }
 0x55a   :  { %10158 = vmatprep.subr.bf16.mxu1 %v10338_v1  ;;  %v10386_v1 = vld [vmem:[#allocation12 + $0x1e8] sm:$0xff]  }
 0x55b   :  { %10137 = vmatpush3.bf16.msra.mxu0 %v10339_v2  ;;  %v8276_v6 = vpack.i.b16 %v8257_v15, %v8257_v15  ;;  %v8267_v63 = vrot.slane %v8262_v3, %v10793_v23  ;;  %v10389_v2 = vld [vmem:[#allocation12 + $0x1a8] sm:$0xff]  }
 0x55c   :  { %10159 = vmatpush3.bf16.msra.mxu1 %v10340_v53  ;;  %10138 = vmatprep.subr.bf16.mxu0 %v10341_v45  ;;  %v10390_v53 = vld [vmem:[#allocation12 + $0x170] sm:$0xff]  }
 0x55d   :  { %10160 = vmatprep.subr.bf16.mxu1 %v10342_v46  ;;  %v8281_v9 = vrot.slane %v8276_v6, %v10793_v23  ;;  %v8317_v26 = vadd.bf16 %v8267_v63, %v8202_v60  ;;  %v10391_v45 = vld [vmem:[#allocation12 + $0x1f0] sm:$0xff]  }
 0x55e   :  { %v10392_v46 = vld [vmem:[#allocation12 + $0x130] sm:$0xff]  }
 0x55f   :  { %10139 = vmatpush3.bf16.msra.mxu0 %v10343_v32  ;;  %v8319_v50 = vadd.bf16 %v8281_v9, %v8204_v62  ;;  %v8325_v27 = vmul.bf16 1009007652, %v8317_v26  ;;  %v10370_v62 = vld [vmem:[#allocation12 + $0x1c8] sm:$0xff]   ;;  %v10393_v32 = vld [vmem:[#allocation12 + $0x1b0] sm:$0xff]  }
 0x560   :  { %10161 = vmatpush3.bf16.msra.mxu1 %v10344_v48  ;;  %10140 = vmatprep.subr.bf16.mxu0 %v10345_v10  ;;  %v10394_v48 = vld [vmem:[#allocation12 + $0x178] sm:$0xff]  }
 0x561   :  { %10162 = vmatprep.subr.bf16.mxu1 %v10346_v13  ;;  %v8327_v40 = vmul.bf16 1009007652, %v8319_v50  ;;  %v8333_v60 = vmax.bf16 %v8325_v27, %v8317_v26  ;;  %v10395_v10 = vld [vmem:[#allocation12 + $0x1f8] sm:$0xff]  }
 0x562   :  { %v10397_v13 = vld [vmem:[#allocation12 + $0x1b8] sm:$0xff]  }
 0x563   :  { %10141 = vmatpush3.bf16.msra.mxu0 %v10347_v24  ;;  %v8335_v58 = vmax.bf16 %v8327_v40, %v8319_v50  ;;  %v8212_v24 = vcombine.high %v11021_v35, %v11021_v35 }
 0x564   :  { %10163 = vmatpush3.bf16.msra.mxu1 %v10348_v22  ;;  %10142 = vmatprep.subr.bf16.mxu0 %v10349_v57 }
 0x565   :  { %10164 = vmatprep.subr.bf16.mxu1 %v10350_v59  ;;  %v8226_v22 = vrot.slane %v8212_v24, %v10863_v19 }
 0x567   :  { %10143 = vmatpush3.bf16.msra.mxu0 %v10351_v61  ;;  %v8228_v57 = vcombine.high %v8226_v22, %v8226_v22  ;;  %v8242_v15 = vrot.slane %v8226_v22, %v10863_v19 }
 0x568   :  { %10165 = vmatpush3.bf16.msra.mxu1 %v10352_v4  ;;  %10144 = vmatprep.subr.bf16.mxu0 %v10353_v5 }
 0x569   :  { %10166 = vmatprep.subr.bf16.mxu1 %v10354_v14  ;;  %v8256_v59 = vrot.slane %v8228_v57, %v10863_v19  ;;  %v8258_v61 = vcombine.high %v8242_v15, %v8242_v15  ;;  %v8290_v4 = vpack.i.b16 %v8242_v15, %v8242_v15 }
 0x56b   :  { %10145 = vmatpush3.bf16.msra.mxu0 %v10355_v56  ;;  %v8260_v3 = vcombine.high %v8256_v59, %v8256_v59  ;;  %v8304_v5 = vpack.i.b16 %v8258_v61, %v8258_v61  ;;  %v8297_v6 = vpack.i.b16 %v8256_v59, %v8256_v59 }
 0x56c   :  { %10167 = vmatpush3.bf16.msra.mxu1 %v10356_v7  ;;  %10146 = vmatprep.subr.bf16.mxu0 %v10357_v8  ;;  %v8295_v8 = vrot.slane %v8290_v4, %v10793_v23 }
 0x56d   :  { %10168 = vmatprep.subr.bf16.mxu1 %v10358_v12  ;;  %v8311_v14 = vpack.i.b16 %v8260_v3, %v8260_v3  ;;  %v8309_v12 = vrot.slane %v8304_v5, %v10793_v23 }
 0x56f   :  { %10147 = vmatpush3.bf16.msra.mxu0 %v10359_v16  ;;  %v8302_v16 = vrot.slane %v8297_v6, %v10793_v23 }
 0x570   :  { %10169 = vmatpush3.bf16.msra.mxu1 %v10360_v49  ;;  %10148 = vmatprep.subr.bf16.mxu0 %v10361_v31  ;;  %v8316_v31 = vrot.slane %v8311_v14, %v10793_v23 }
 0x571   :  { %10170 = vmatprep.subr.bf16.mxu1 %v10362_v25 }
 0x573   :  { %10149 = vmatpush3.bf16.msra.mxu0 %v10363_v47 }
 0x574   :  { %10171 = vmatpush3.bf16.msra.mxu1 %v10364_v28  ;;  %10178 = vmatprep.subr.bf16.mxu0 %v10365_v29 }
 0x575   :  { %10200 = vmatprep.subr.bf16.mxu1 %v10366_v51 }
 0x576   :  { %8893 = vmatmul.mubr.bf16.vlgmr.msra.gmra.mrb[24].mxu0 %v8333_v60 }
 0x577   :  { %8934 = vmatmul.mubr.bf16.vlgmr.msra.gmra.mrb[24].mxu1 %v8335_v58  ;;  %10179 = vmatpush3.bf16.msra.mxu0 %v10367_v55 }
 0x578   :  { %10201 = vmatpush3.bf16.msra.mxu1 %v10368_v21  ;;  %10180 = vmatprep.subr.bf16.mxu0 %v10369_v41 }
 0x579   :  { %10202 = vmatprep.subr.bf16.mxu1 %v10370_v62 }
 0x57b   :  { %10181 = vmatpush3.bf16.msra.mxu0 %v10371_v17 }
 0x57c   :  { %10203 = vmatpush3.bf16.msra.mxu1 %v10372_v33  ;;  %10182 = vmatprep.subr.bf16.mxu0 %v10373_v34 }
 0x57d   :  { %10204 = vmatprep.subr.bf16.mxu1 %v10374_v36  ;;  %v10069_v36 = vld [vmem:[#allocation13] ss:$0 sm:$0xff] }
 0x57f   :  { %10183 = vmatpush3.bf16.msra.mxu0 %v10375_v37 }
 0x580   :  { %10205 = vmatpush3.bf16.msra.mxu1 %v10376_v38  ;;  %10184 = vmatprep.subr.bf16.mxu0 %v10377_v11 }
 0x581   :  { %10206 = vmatprep.subr.bf16.mxu1 %v10378_v39 }
 0x583   :  { %10185 = vmatpush3.bf16.msra.mxu0 %v10379_v42 }
 0x584   :  { %10207 = vmatpush3.bf16.msra.mxu1 %v10380_v43  ;;  %10186 = vmatprep.subr.bf16.mxu0 %v10381_v44 }
 0x585   :  { %10208 = vmatprep.subr.bf16.mxu1 %v10382_v30 }
 0x587   :  { %10187 = vmatpush3.bf16.msra.mxu0 %v10383_v18 }
 0x588   :  { %10209 = vmatpush3.bf16.msra.mxu1 %v10384_v0  ;;  %10188 = vmatprep.subr.bf16.mxu0 %v10385_v54 }
 0x589   :  { %10210 = vmatprep.subr.bf16.mxu1 %v10386_v1 }
 0x58b   :  { %10189 = vmatpush3.bf16.msra.mxu0 %v10388_v52 }
 0x58c   :  { %10211 = vmatpush3.bf16.msra.mxu1 %v10389_v2  ;;  %10190 = vmatprep.subr.bf16.mxu0 %v10390_v53 }
 0x58d   :  { %10212 = vmatprep.subr.bf16.mxu1 %v10391_v45 }
 0x58f   :  { %10191 = vmatpush3.bf16.msra.mxu0 %v10392_v46 }
 0x590   :  { %10213 = vmatpush3.bf16.msra.mxu1 %v10393_v32  ;;  %10192 = vmatprep.subr.bf16.mxu0 %v10394_v48 }
 0x591   :  { %10214 = vmatprep.subr.bf16.mxu1 %v10395_v10 }
 0x593   :  { %10193 = vmatpush3.bf16.msra.mxu0 %v10396_v20 }
 0x594   :  { %10215 = vmatpush3.bf16.msra.mxu1 %v10397_v13 }
 0x629   :  { %v8021_v56 = vpop.f32.mrb[20].mxu0 }
 0x62a   :  { %v8193_v63 = vpop.f32.mrb[20].mxu1  ;;  %v8023_v7 = vpop.f32.mrb[21].mxu0 }
 0x62b   :  { %v8195_v9 = vpop.f32.mrb[21].mxu1  ;;  %v8025_v35 = vpop.f32.mrb[22].mxu0 }
 0x62c   :  { %v8206_v26 = vpack.c.bf16 %v8025_v35, %v8021_v56  ;;  %v8197_v49 = vpop.f32.mrb[22].mxu1  ;;  %v8027_v19 = vpop.f32.mrb[23].mxu0 }
 0x62d   :  { %v8208_v50 = vpack.c.bf16 %v8197_v49, %v8193_v63  ;;  %v8207_v25 = vpack.c.bf16 %v8027_v19, %v8023_v7  ;;  %v8199_v47 = vpop.f32.mrb[23].mxu1 }
 0x62e   :  { %v8321_v27 = vadd.bf16 %v8295_v8, %v8206_v26  ;;  %v8209_v28 = vpack.c.bf16 %v8199_v47, %v8195_v9 }
 0x62f   :  { %v8323_v29 = vadd.bf16 %v8309_v12, %v8208_v50  ;;  %v8322_v40 = vadd.bf16 %v8302_v16, %v8207_v25 }
 0x630   :  { %v8329_v51 = vmul.bf16 1009007652, %v8321_v27  ;;  %v8324_v55 = vadd.bf16 %v8316_v31, %v8209_v28 }
 0x631   :  { %v8331_v60 = vmul.bf16 1009007652, %v8323_v29  ;;  %v8330_v21 = vmul.bf16 1009007652, %v8322_v40 }
 0x632   :  { %v8332_v41 = vmul.bf16 1009007652, %v8324_v55  ;;  %v8337_v62 = vmax.bf16 %v8329_v51, %v8321_v27 }
 0x633   :  { %v8338_v58 = vmax.bf16 %v8330_v21, %v8322_v40  ;;  %v8339_v33 = vmax.bf16 %v8331_v60, %v8323_v29 }
 0x634   :  { %v8340_v17 = vmax.bf16 %v8332_v41, %v8324_v55 }
 0x635   :  { %8974 = vmatprep.mubr.bf16.mxu0 %v8338_v58 }
 0x636   :  { %9015 = vmatprep.mubr.bf16.mxu1 %v8340_v17  ;;  %8975 = vmatmul.mubr.bf16.vlgmr.msra.gmra.mrb[28].mxu0 %v8337_v62 }
 0x637   :  { %9016 = vmatmul.mubr.bf16.vlgmr.msra.gmra.mrb[28].mxu1 %v8339_v33 }
 0x649   :  { %v10150_v23 = vpop.f32.mrb[24].mxu0 }
 0x64a   :  { %v10172_v34 = vpop.f32.mrb[24].mxu1  ;;  %v10151_v37 = vpop.f32.mrb[25].mxu0 }
 0x64b   :  { %v10152_v38 = vadd.f32 %v10151_v37, %v10150_v23  ;;  %v10173_v11 = vpop.f32.mrb[25].mxu1  ;;  %v10153_v39 = vpop.f32.mrb[26].mxu0 }
 0x64c   :  { %v10174_v42 = vadd.f32 %v10173_v11, %v10172_v34  ;;  %v10175_v43 = vpop.f32.mrb[26].mxu1  ;;  %v10154_v44 = vpop.f32.mrb[27].mxu0 }
 0x64d   :  { %v8895_v30 = vadd.f32 %v10152_v38, %v10069_v36  ;;  %v10155_v18 = vadd.f32 %v10154_v44, %v10153_v39  ;;  %v10176_v0 = vpop.f32.mrb[27].mxu1 }
 0x64e   :  { %v10177_v54 = vadd.f32 %v10176_v0, %v10175_v43 }
 0x64f   :  { %v8936_v1 = vadd.f32 %v10174_v42, %v8895_v30  ;;  %v8898_v52 = vadd.f32 %v10155_v18, %v10069_v36 }
 0x651   :  { %v8939_v2 = vadd.f32 %v10177_v54, %v8898_v52 }
 0x709   :  { %v10194_v53 = vpop.f32.mrb[28].mxu0 }
 0x70a   :  { %v10216_v45 = vpop.f32.mrb[28].mxu1  ;;  %v10195_v46 = vpop.f32.mrb[29].mxu0 }
 0x70b   :  { %v10196_v32 = vadd.f32 %v10195_v46, %v10194_v53  ;;  %v10217_v48 = vpop.f32.mrb[29].mxu1  ;;  %v10197_v10 = vpop.f32.mrb[30].mxu0 }
 0x70c   :  { %v10218_v20 = vadd.f32 %v10217_v48, %v10216_v45  ;;  %v10219_v13 = vpop.f32.mrb[30].mxu1  ;;  %v10198_v24 = vpop.f32.mrb[31].mxu0 }
 0x70d   :  { %v8977_v22 = vadd.f32 %v10196_v32, %v8936_v1  ;;  %v10199_v57 = vadd.f32 %v10198_v24, %v10197_v10  ;;  %v10220_v15 = vpop.f32.mrb[31].mxu1 }
 0x70e   :  { %v10221_v59 = vadd.f32 %v10220_v15, %v10219_v13 }
 0x70f   :  { %v9018_v61 = vadd.f32 %v10218_v20, %v8977_v22  ;;  %v8980_v3 = vadd.f32 %v10199_v57, %v8939_v2 }
 0x711   :  { %10398 = vtanh.f32 %v9018_v61  ;;  %v9021_v4 = vadd.f32 %v10221_v59, %v8980_v3 }
 0x713   :  { %10400 = vtanh.f32 %v9021_v4 }
 0x71b   :  { %v10399_v5 = vpop.eup %10398 }
 0x71c   :  { %9026 = vst [vmem:[%s11074_s9] sm:$0xff] %v10399_v5 }
 0x71d   :  { %v10401_v6 = vpop.eup %10400 }
 0x71e   :  { %9027 = vst [vmem:[%s11074_s9 + $0x8] sm:$0xff] %v10401_v6 }
 0x71f   :  { %9032 = vsyncpa [#allocation3], 1 }
 0x720   :  { %9033 = vsyncpa [#allocation5], 1 }
 0x721   :  { %9034 = vsyncpa [#allocation8], 1 }
 0x722   :  { %9035 = vsyncpa [#allocation11], 1 }
 0x723   :  { %9036 = vsyncpa [#allocation14], 1 }

</bundles_post_ra>
